<compile_context>
chip_gen: v6e
topology: v6e:2x2x1
jax: 0.10.0
libtpu: 0.0.40
codegen_flags: <defaults>
</compile_context>

<pallas_src>
import functools

import jax
import jax.numpy as jnp
from jax.experimental import pallas as pl
from jax.experimental.pallas import tpu as pltpu

_EPS = 1e-5  # PyTorch InstanceNorm2d default


# ----------------------------- kernel helpers --------------------------------
def _reflect_pad_1(x):
    """Reflect-pad (H, W, C) by 1 on H and W (PyTorch padding_mode='reflect')."""
    H, W = x.shape[0], x.shape[1]
    x = jnp.concatenate([x[1:2], x, x[H - 2:H - 1]], axis=0)
    x = jnp.concatenate([x[:, 1:2], x, x[:, W - 2:W - 1]], axis=1)
    return x


def _conv3x3_im2col(x, w_flat, compute_dtype):
    """3x3 reflect-pad conv as ONE matmul.

    x:      (H, W, Cin) float32
    w_flat: (9*Cin, Cout), already in compute_dtype, (dy, dx, cin) row order.
    Returns (H*W, Cout) float32.
    """
    H, W, C = x.shape
    xp = _reflect_pad_1(x)                                   # (H+2, W+2, C)
    taps = [xp[dy:dy + H, dx:dx + W, :] for dy in range(3) for dx in range(3)]
    lhs = jnp.concatenate(taps, axis=-1)                     # (H, W, 9*C)
    lhs = lhs.reshape(H * W, 9 * C).astype(compute_dtype)    # 2-D MXU operand
    return jax.lax.dot_general(
        lhs, w_flat,
        dimension_numbers=(((1,), (0,)), ((), ())),
        preferred_element_type=jnp.float32)                  # (H*W, Cout) f32


def _instance_norm(y):
    """InstanceNorm2d (affine=False) on (H*W, C), single-pass stats in f32."""
    inv_n = 1.0 / y.shape[0]
    mean = jnp.sum(y, axis=0, keepdims=True) * inv_n
    ex2 = jnp.sum(y * y, axis=0, keepdims=True) * inv_n
    var = jnp.maximum(ex2 - mean * mean, 0.0)
    return (y - mean) * jax.lax.rsqrt(var + _EPS)


# --------------------------------- kernel ------------------------------------
def _residual_block_kernel(x_ref, w1_ref, w2_ref, o_ref, *, compute_dtype):
    # One grid step == one sample: InstanceNorm reduces over the full spatial
    # extent, so the whole (H, W, C) sample stays resident in VMEM.
    x = x_ref[0].astype(jnp.float32)          # (H, W, C)
    H, W, C = x.shape
    w1 = w1_ref[...]                          # (9C, C) compute_dtype
    w2 = w2_ref[...]

    # ConvBlock 1: conv3x3 (bias dropped: cancelled by IN) -> IN -> ReLU
    h = _conv3x3_im2col(x, w1, compute_dtype)              # (H*W, C) f32
    h = jnp.maximum(_instance_norm(h), 0.0)

    # ConvBlock 2: conv3x3 -> IN -> Identity
    h = _conv3x3_im2col(h.reshape(H, W, C), w2, compute_dtype)
    h = _instance_norm(h)

    # Residual add
    o_ref[0] = (x + h.reshape(H, W, C)).astype(o_ref.dtype)


# -------------------------------- wrappers ------------------------------------
def _vmem_limit_bytes(H, W, C):
    """Rough per-grid-step VMEM need with headroom, capped for v7x (64 MiB)."""
    sample_f32 = H * W * C * 4
    pad_f32 = (H + 2) * (W + 2) * C * 4
    im2col = H * W * 9 * C * 4 + H * W * 9 * C * 2   # f32 taps + bf16 lhs
    weights = 2 * 9 * C * C * 2
    acts_f32 = 2 * sample_f32                        # conv outputs / norm temps
    est = 2 * 2 * sample_f32 + pad_f32 + im2col + weights + acts_f32
    return int(min(64 * 1024 * 1024, max(2 * est, 16 * 1024 * 1024)))


def residual_block_nhwc(x, w1_hwio, w2_hwio, *, compute_dtype=jnp.bfloat16):
    """x: (N, H, W, C) float32; weights HWIO (3, 3, C, C). Biases intentionally
    omitted: they are an exact no-op before InstanceNorm2d(affine=False)."""
    N, H, W, C = x.shape
    # Flatten weights to (9*Cin, Cout) in (dy, dx, cin) order, in compute dtype.
    w1f = w1_hwio.reshape(9 * C, C).astype(compute_dtype)
    w2f = w2_hwio.reshape(9 * C, C).astype(compute_dtype)

    kernel = functools.partial(_residual_block_kernel, compute_dtype=compute_dtype)
    return pl.pallas_call(
        kernel,
        out_shape=jax.ShapeDtypeStruct((N, H, W, C), x.dtype),
        grid=(N,),
        in_specs=[
            pl.BlockSpec((1, H, W, C), lambda n: (n, 0, 0, 0)),
            pl.BlockSpec((9 * C, C), lambda n: (0, 0)),
            pl.BlockSpec((9 * C, C), lambda n: (0, 0)),
        ],
        out_specs=pl.BlockSpec((1, H, W, C), lambda n: (n, 0, 0, 0)),
        compiler_params=pltpu.CompilerParams(
            dimension_semantics=("parallel",),
            vmem_limit_bytes=_vmem_limit_bytes(H, W, C),
        ),
    )(x, w1f, w2f)


def residual_block_nchw(x_nchw, w1_oihw, w2_oihw, *, compute_dtype=jnp.bfloat16):
    """PyTorch-facing wrapper: NCHW input, OIHW conv weights, NCHW output."""
    x = jnp.transpose(x_nchw, (0, 2, 3, 1))          # NCHW -> NHWC
    w1 = jnp.transpose(w1_oihw, (2, 3, 1, 0))        # OIHW -> HWIO
    w2 = jnp.transpose(w2_oihw, (2, 3, 1, 0))
    y = residual_block_nhwc(x, w1, w2, compute_dtype=compute_dtype)
    return jnp.transpose(y, (0, 3, 1, 2))            # NHWC -> NCHW


# --------------------- plain-JAX reference (PyTorch math) --------------------
def _conv3x3_ref(x, w_hwio, b, compute_dtype):
    """Reference conv WITH bias; matmul inputs cast to the kernel's MXU dtype."""
    H, W, _ = x.shape
    xp = jnp.pad(x, ((1, 1), (1, 1), (0, 0)), mode="reflect")
    acc = jnp.zeros((H, W, w_hwio.shape[-1]), jnp.float32)
    for dy in range(3):
        for dx in range(3):
            acc = acc + jax.lax.dot_general(
                xp[dy:dy + H, dx:dx + W, :].astype(compute_dtype),
                w_hwio[dy, dx].astype(compute_dtype),
                dimension_numbers=(((2,), (0,)), ((), ())),
                preferred_element_type=jnp.float32)
    return acc + b


def _instance_norm_ref(y):
    mean = jnp.mean(y, axis=(0, 1), keepdims=True)
    var = jnp.mean((y - mean) ** 2, axis=(0, 1), keepdims=True)
    return (y - mean) * jax.lax.rsqrt(var + _EPS)


def _residual_block_ref_single(x, w1, b1, w2, b2, compute_dtype):
    h = jnp.maximum(_instance_norm_ref(_conv3x3_ref(x, w1, b1, compute_dtype)), 0.0)
    h = _instance_norm_ref(_conv3x3_ref(h, w2, b2, compute_dtype))
    return x + h


def residual_block_ref_nchw(x_nchw, w1_oihw, b1, w2_oihw, b2,
                            compute_dtype=jnp.bfloat16):
    x = jnp.transpose(x_nchw, (0, 2, 3, 1))
    w1 = jnp.transpose(w1_oihw, (2, 3, 1, 0))
    w2 = jnp.transpose(w2_oihw, (2, 3, 1, 0))
    y = jax.vmap(
        lambda xi: _residual_block_ref_single(xi, w1, b1, w2, b2, compute_dtype))(x)
    return jnp.transpose(y, (0, 3, 1, 2))


# ----------------------------------- test -------------------------------------
if __name__ == "__main__":
    N, C, H, W = 2, 4, 16, 16

    key = jax.random.PRNGKey(0)
    kx, kw1, kb1, kw2, kb2 = jax.random.split(key, 5)

    # PyTorch-layout input (NCHW) and parameters (OIHW weights, per-C biases).
    x_nchw = jax.random.normal(kx, (N, C, H, W), dtype=jnp.float32)
    w1 = 0.1 * jax.random.normal(kw1, (C, C, 3, 3), dtype=jnp.float32)
    b1 = 0.1 * jax.random.normal(kb1, (C,), dtype=jnp.float32)
    w2 = 0.1 * jax.random.normal(kw2, (C, C, 3, 3), dtype=jnp.float32)
    b2 = 0.1 * jax.random.normal(kb2, (C,), dtype=jnp.float32)

    # Kernel (biases dropped: mathematically cancelled by InstanceNorm).
    out = jax.block_until_ready(residual_block_nchw(x_nchw, w1, w2))

    # Reference keeps the biases -> also validates the "bias is a no-op" claim.
    ref = jax.block_until_ready(residual_block_ref_nchw(x_nchw, w1, b1, w2, b2))

    assert out.shape == (N, C, H, W), out.shape
    max_err = float(jnp.max(jnp.abs(out - ref)))
    assert jnp.allclose(out, ref, rtol=2e-3, atol=2e-3), max_err

    print("KERNEL_OK")
</pallas_src>

<mosaic_0001>
module attributes {stable_mosaic.version = 11 : i64} {
  func.func @_residual_block_kernel(%arg0: i32, %arg1: memref<1x16x16x4xf32, #tpu.memory_space<vmem>>, %arg2: memref<36x4xbf16, #tpu.memory_space<vmem>>, %arg3: memref<36x4xbf16, #tpu.memory_space<vmem>>, %arg4: memref<1x16x16x4xf32, #tpu.memory_space<vmem>>) attributes {dimension_semantics = [#tpu.dimension_semantics<parallel>], iteration_bounds = array<i64: 2>, scalar_prefetch = 0 : i64, scratch_operands = 0 : i64, tpu.core_type = #tpu.core_type<tc>, window_params = [{transform_indices = @transform_0, window_bounds = array<i64: 1, 16, 16, 4>}, {pipeline_mode = #tpu.pipeline_mode<synchronous>, transform_indices = @transform_1, window_bounds = array<i64: 36, 4>}, {pipeline_mode = #tpu.pipeline_mode<synchronous>, transform_indices = @transform_2, window_bounds = array<i64: 36, 4>}, {transform_indices = @transform_3, window_bounds = array<i64: 1, 16, 16, 4>}]} {
    %c0 = arith.constant 0 : index
    %c0_0 = arith.constant 0 : index
    %c0_1 = arith.constant 0 : index
    %c0_2 = arith.constant 0 : index
    %0 = vector.load %arg1[%c0, %c0_0, %c0_1, %c0_2] : memref<1x16x16x4xf32, #tpu.memory_space<vmem>>, vector<1x16x16x4xf32>
    %1 = vector.shape_cast %0 : vector<1x16x16x4xf32> to vector<16x16x4xf32>
    %c0_3 = arith.constant 0 : index
    %c0_4 = arith.constant 0 : index
    %2 = vector.load %arg2[%c0_3, %c0_4] : memref<36x4xbf16, #tpu.memory_space<vmem>>, vector<36x4xbf16>
    %c0_5 = arith.constant 0 : index
    %c0_6 = arith.constant 0 : index
    %3 = vector.load %arg3[%c0_5, %c0_6] : memref<36x4xbf16, #tpu.memory_space<vmem>>, vector<36x4xbf16>
    %4 = vector.extract_strided_slice %1 {offsets = [1, 0, 0], sizes = [1, 16, 4], strides = [1, 1, 1]} : vector<16x16x4xf32> to vector<1x16x4xf32>
    %5 = vector.extract_strided_slice %1 {offsets = [14, 0, 0], sizes = [1, 16, 4], strides = [1, 1, 1]} : vector<16x16x4xf32> to vector<1x16x4xf32>
    %6 = tpu.concatenate %4, %1, %5 in 0 : vector<1x16x4xf32>, vector<16x16x4xf32>, vector<1x16x4xf32> -> vector<18x16x4xf32>
    %7 = vector.extract_strided_slice %6 {offsets = [0, 1, 0], sizes = [18, 1, 4], strides = [1, 1, 1]} : vector<18x16x4xf32> to vector<18x1x4xf32>
    %8 = vector.extract_strided_slice %6 {offsets = [0, 14, 0], sizes = [18, 1, 4], strides = [1, 1, 1]} : vector<18x16x4xf32> to vector<18x1x4xf32>
    %9 = tpu.concatenate %7, %6, %8 in 1 : vector<18x1x4xf32>, vector<18x16x4xf32>, vector<18x1x4xf32> -> vector<18x18x4xf32>
    %10 = vector.extract_strided_slice %9 {offsets = [0, 0, 0], sizes = [16, 16, 4], strides = [1, 1, 1]} : vector<18x18x4xf32> to vector<16x16x4xf32>
    %11 = vector.extract_strided_slice %9 {offsets = [0, 1, 0], sizes = [16, 16, 4], strides = [1, 1, 1]} : vector<18x18x4xf32> to vector<16x16x4xf32>
    %12 = vector.extract_strided_slice %9 {offsets = [0, 2, 0], sizes = [16, 16, 4], strides = [1, 1, 1]} : vector<18x18x4xf32> to vector<16x16x4xf32>
    %13 = vector.extract_strided_slice %9 {offsets = [1, 0, 0], sizes = [16, 16, 4], strides = [1, 1, 1]} : vector<18x18x4xf32> to vector<16x16x4xf32>
    %14 = vector.extract_strided_slice %9 {offsets = [1, 1, 0], sizes = [16, 16, 4], strides = [1, 1, 1]} : vector<18x18x4xf32> to vector<16x16x4xf32>
    %15 = vector.extract_strided_slice %9 {offsets = [1, 2, 0], sizes = [16, 16, 4], strides = [1, 1, 1]} : vector<18x18x4xf32> to vector<16x16x4xf32>
    %16 = vector.extract_strided_slice %9 {offsets = [2, 0, 0], sizes = [16, 16, 4], strides = [1, 1, 1]} : vector<18x18x4xf32> to vector<16x16x4xf32>
    %17 = vector.extract_strided_slice %9 {offsets = [2, 1, 0], sizes = [16, 16, 4], strides = [1, 1, 1]} : vector<18x18x4xf32> to vector<16x16x4xf32>
    %18 = vector.extract_strided_slice %9 {offsets = [2, 2, 0], sizes = [16, 16, 4], strides = [1, 1, 1]} : vector<18x18x4xf32> to vector<16x16x4xf32>
    %19 = tpu.concatenate %10, %11, %12, %13, %14, %15, %16, %17, %18 in 2 : vector<16x16x4xf32>, vector<16x16x4xf32>, vector<16x16x4xf32>, vector<16x16x4xf32>, vector<16x16x4xf32>, vector<16x16x4xf32>, vector<16x16x4xf32>, vector<16x16x4xf32>, vector<16x16x4xf32> -> vector<16x16x36xf32>
    %20 = vector.shape_cast %19 : vector<16x16x36xf32> to vector<256x36xf32>
    %21 = arith.truncf %20 : vector<256x36xf32> to vector<256x36xbf16>
    %cst = arith.constant dense<0.000000e+00> : vector<256x4xf32>
    %22 = tpu.matmul %21, %2, %cst {dimension_numbers = #tpu.dot_dimension_numbers<[1], [0], [0], [1], [0, 0, 1, 1], [], []>} : vector<256x36xbf16>, vector<36x4xbf16>, vector<256x4xf32> -> vector<256x4xf32>
    %cst_7 = arith.constant dense<0.000000e+00> : vector<4xf32>
    %23 = vector.multi_reduction <add>, %22, %cst_7 [0] : vector<256x4xf32> to vector<4xf32>
    %24 = vector.shape_cast %23 : vector<4xf32> to vector<1x4xf32>
    %cst_8 = arith.constant 3.906250e-03 : f32
    %25 = vector.broadcast %cst_8 : f32 to vector<1x4xf32>
    %26 = arith.mulf %24, %25 : vector<1x4xf32>
    %27 = arith.mulf %22, %22 : vector<256x4xf32>
    %cst_9 = arith.constant dense<0.000000e+00> : vector<4xf32>
    %28 = vector.multi_reduction <add>, %27, %cst_9 [0] : vector<256x4xf32> to vector<4xf32>
    %29 = vector.shape_cast %28 : vector<4xf32> to vector<1x4xf32>
    %cst_10 = arith.constant 3.906250e-03 : f32
    %30 = vector.broadcast %cst_10 : f32 to vector<1x4xf32>
    %31 = arith.mulf %29, %30 : vector<1x4xf32>
    %32 = arith.mulf %26, %26 : vector<1x4xf32>
    %33 = arith.subf %31, %32 : vector<1x4xf32>
    %cst_11 = arith.constant 0.000000e+00 : f32
    %34 = vector.broadcast %cst_11 : f32 to vector<1x4xf32>
    %35 = arith.maximumf %33, %34 : vector<1x4xf32>
    %36 = vector.broadcast %26 : vector<1x4xf32> to vector<256x4xf32>
    %37 = arith.subf %22, %36 : vector<256x4xf32>
    %cst_12 = arith.constant 9.99999974E-6 : f32
    %38 = vector.broadcast %cst_12 : f32 to vector<1x4xf32>
    %39 = arith.addf %35, %38 : vector<1x4xf32>
    %40 = math.rsqrt %39 : vector<1x4xf32>
    %41 = vector.broadcast %40 : vector<1x4xf32> to vector<256x4xf32>
    %42 = arith.mulf %37, %41 : vector<256x4xf32>
    %cst_13 = arith.constant 0.000000e+00 : f32
    %43 = vector.broadcast %cst_13 : f32 to vector<256x4xf32>
    %44 = arith.maximumf %42, %43 : vector<256x4xf32>
    %45 = vector.shape_cast %44 : vector<256x4xf32> to vector<16x16x4xf32>
    %46 = vector.extract_strided_slice %45 {offsets = [1, 0, 0], sizes = [1, 16, 4], strides = [1, 1, 1]} : vector<16x16x4xf32> to vector<1x16x4xf32>
    %47 = vector.extract_strided_slice %45 {offsets = [14, 0, 0], sizes = [1, 16, 4], strides = [1, 1, 1]} : vector<16x16x4xf32> to vector<1x16x4xf32>
    %48 = tpu.concatenate %46, %45, %47 in 0 : vector<1x16x4xf32>, vector<16x16x4xf32>, vector<1x16x4xf32> -> vector<18x16x4xf32>
    %49 = vector.extract_strided_slice %48 {offsets = [0, 1, 0], sizes = [18, 1, 4], strides = [1, 1, 1]} : vector<18x16x4xf32> to vector<18x1x4xf32>
    %50 = vector.extract_strided_slice %48 {offsets = [0, 14, 0], sizes = [18, 1, 4], strides = [1, 1, 1]} : vector<18x16x4xf32> to vector<18x1x4xf32>
    %51 = tpu.concatenate %49, %48, %50 in 1 : vector<18x1x4xf32>, vector<18x16x4xf32>, vector<18x1x4xf32> -> vector<18x18x4xf32>
    %52 = vector.extract_strided_slice %51 {offsets = [0, 0, 0], sizes = [16, 16, 4], strides = [1, 1, 1]} : vector<18x18x4xf32> to vector<16x16x4xf32>
    %53 = vector.extract_strided_slice %51 {offsets = [0, 1, 0], sizes = [16, 16, 4], strides = [1, 1, 1]} : vector<18x18x4xf32> to vector<16x16x4xf32>
    %54 = vector.extract_strided_slice %51 {offsets = [0, 2, 0], sizes = [16, 16, 4], strides = [1, 1, 1]} : vector<18x18x4xf32> to vector<16x16x4xf32>
    %55 = vector.extract_strided_slice %51 {offsets = [1, 0, 0], sizes = [16, 16, 4], strides = [1, 1, 1]} : vector<18x18x4xf32> to vector<16x16x4xf32>
    %56 = vector.extract_strided_slice %51 {offsets = [1, 1, 0], sizes = [16, 16, 4], strides = [1, 1, 1]} : vector<18x18x4xf32> to vector<16x16x4xf32>
    %57 = vector.extract_strided_slice %51 {offsets = [1, 2, 0], sizes = [16, 16, 4], strides = [1, 1, 1]} : vector<18x18x4xf32> to vector<16x16x4xf32>
    %58 = vector.extract_strided_slice %51 {offsets = [2, 0, 0], sizes = [16, 16, 4], strides = [1, 1, 1]} : vector<18x18x4xf32> to vector<16x16x4xf32>
    %59 = vector.extract_strided_slice %51 {offsets = [2, 1, 0], sizes = [16, 16, 4], strides = [1, 1, 1]} : vector<18x18x4xf32> to vector<16x16x4xf32>
    %60 = vector.extract_strided_slice %51 {offsets = [2, 2, 0], sizes = [16, 16, 4], strides = [1, 1, 1]} : vector<18x18x4xf32> to vector<16x16x4xf32>
    %61 = tpu.concatenate %52, %53, %54, %55, %56, %57, %58, %59, %60 in 2 : vector<16x16x4xf32>, vector<16x16x4xf32>, vector<16x16x4xf32>, vector<16x16x4xf32>, vector<16x16x4xf32>, vector<16x16x4xf32>, vector<16x16x4xf32>, vector<16x16x4xf32>, vector<16x16x4xf32> -> vector<16x16x36xf32>
    %62 = vector.shape_cast %61 : vector<16x16x36xf32> to vector<256x36xf32>
    %63 = arith.truncf %62 : vector<256x36xf32> to vector<256x36xbf16>
    %cst_14 = arith.constant dense<0.000000e+00> : vector<256x4xf32>
    %64 = tpu.matmul %63, %3, %cst_14 {dimension_numbers = #tpu.dot_dimension_numbers<[1], [0], [0], [1], [0, 0, 1, 1], [], []>} : vector<256x36xbf16>, vector<36x4xbf16>, vector<256x4xf32> -> vector<256x4xf32>
    %cst_15 = arith.constant dense<0.000000e+00> : vector<4xf32>
    %65 = vector.multi_reduction <add>, %64, %cst_15 [0] : vector<256x4xf32> to vector<4xf32>
    %66 = vector.shape_cast %65 : vector<4xf32> to vector<1x4xf32>
    %cst_16 = arith.constant 3.906250e-03 : f32
    %67 = vector.broadcast %cst_16 : f32 to vector<1x4xf32>
    %68 = arith.mulf %66, %67 : vector<1x4xf32>
    %69 = arith.mulf %64, %64 : vector<256x4xf32>
    %cst_17 = arith.constant dense<0.000000e+00> : vector<4xf32>
    %70 = vector.multi_reduction <add>, %69, %cst_17 [0] : vector<256x4xf32> to vector<4xf32>
    %71 = vector.shape_cast %70 : vector<4xf32> to vector<1x4xf32>
    %cst_18 = arith.constant 3.906250e-03 : f32
    %72 = vector.broadcast %cst_18 : f32 to vector<1x4xf32>
    %73 = arith.mulf %71, %72 : vector<1x4xf32>
    %74 = arith.mulf %68, %68 : vector<1x4xf32>
    %75 = arith.subf %73, %74 : vector<1x4xf32>
    %cst_19 = arith.constant 0.000000e+00 : f32
    %76 = vector.broadcast %cst_19 : f32 to vector<1x4xf32>
    %77 = arith.maximumf %75, %76 : vector<1x4xf32>
    %78 = vector.broadcast %68 : vector<1x4xf32> to vector<256x4xf32>
    %79 = arith.subf %64, %78 : vector<256x4xf32>
    %cst_20 = arith.constant 9.99999974E-6 : f32
    %80 = vector.broadcast %cst_20 : f32 to vector<1x4xf32>
    %81 = arith.addf %77, %80 : vector<1x4xf32>
    %82 = math.rsqrt %81 : vector<1x4xf32>
    %83 = vector.broadcast %82 : vector<1x4xf32> to vector<256x4xf32>
    %84 = arith.mulf %79, %83 : vector<256x4xf32>
    %85 = vector.shape_cast %84 : vector<256x4xf32> to vector<16x16x4xf32>
    %86 = arith.addf %1, %85 : vector<16x16x4xf32>
    %c0_21 = arith.constant 0 : index
    %c0_22 = arith.constant 0 : index
    %c0_23 = arith.constant 0 : index
    %c0_24 = arith.constant 0 : index
    %87 = vector.load %arg4[%c0_21, %c0_22, %c0_23, %c0_24] : memref<1x16x16x4xf32, #tpu.memory_space<vmem>>, vector<1x16x16x4xf32>
    %88 = vector.shape_cast %87 : vector<1x16x16x4xf32> to vector<16x16x4xf32>
    %89 = vector.shape_cast %86 : vector<16x16x4xf32> to vector<1x16x16x4xf32>
    tpu.vector_store %arg4[%c0_21, %c0_22, %c0_23, %c0_24], %89 {strides = array<i32>} : memref<1x16x16x4xf32, #tpu.memory_space<vmem>>, vector<1x16x16x4xf32>,
    return
  }
  func.func @transform_0(%arg0: i32) -> (i32, i32, i32, i32) {
    %c0_i32 = arith.constant 0 : i32
    %c0_i32_0 = arith.constant 0 : i32
    %c0_i32_1 = arith.constant 0 : i32
    %c0_i32_2 = arith.constant 0 : i32
    return %arg0, %c0_i32, %c0_i32_0, %c0_i32_1 : i32, i32, i32, i32
  }
  func.func @transform_1(%arg0: i32) -> (i32, i32) {
    %c0_i32 = arith.constant 0 : i32
    %c0_i32_0 = arith.constant 0 : i32
    %c0_i32_1 = arith.constant 0 : i32
    return %c0_i32, %c0_i32_0 : i32, i32
  }
  func.func @transform_2(%arg0: i32) -> (i32, i32) {
    %c0_i32 = arith.constant 0 : i32
    %c0_i32_0 = arith.constant 0 : i32
    %c0_i32_1 = arith.constant 0 : i32
    return %c0_i32, %c0_i32_0 : i32, i32
  }
  func.func @transform_3(%arg0: i32) -> (i32, i32, i32, i32) {
    %c0_i32 = arith.constant 0 : i32
    %c0_i32_0 = arith.constant 0 : i32
    %c0_i32_1 = arith.constant 0 : i32
    %c0_i32_2 = arith.constant 0 : i32
    return %arg0, %c0_i32, %c0_i32_0, %c0_i32_1 : i32, i32, i32, i32
  }
}

</mosaic_0001>

<bundles_post_ra>
// kernel: tpu_custom_call.1
= control target key start
LH: loop header
LB: loop body
LE: loop exit
PB: predicated region body
PF: predicated region fallthrough
CT: control target
= control target key end

     0   :  { %s5647_s12 = smov 0   ;;  %s9227_s0 = inlined_call_operand.vmem [shape: f32[2,16,16,4], index: 0, kind: input, shape index: {}]   ;;  %s9228_s1 = inlined_call_operand.vmem [shape: bf16[36,4], index: 1, kind: input, shape index: {}]   ;;  %s9229_s2 = inlined_call_operand.vmem [shape: bf16[36,4], index: 2, kind: input, shape index: {}]   ;;  %s9230_s3 = inlined_call_operand.vmem [shape: f32[2,16,16,4], index: 3, kind: output, shape index: {}]  }
   0x1 LB: > { %s4156_s13 = sadd.s32 4294967295, %s5617_s12   ;;  %p4160_p0 = scmp.ge.s32.totalorder %s5617_s12, 1  ;;  %s5617_s12 = sphi %s5647_s12, %s13_s12  }
   0x2   : > { %p137_p1 = scmp.lt.s32.totalorder %s5617_s12, 3 }
   0x4   : > { %p138_p2 = pnand %p4160_p0, %p137_p1 }
   0x6   : > { %141 = sbr.rel (%p138_p2) target bundleno = 1319 (0x527), region = 32 }
   0xb   : > { %p161_p3 = scmp.lt.s32.totalorder %s4156_s13, 1  ;;  %vm278_vm0 = vcmask 1040384   ;;  %vm468_vm1 = vcmask 1046528   ;;  %s5619_s18 = smov 4   ;;  %vm634_vm2 = vcmask 1045504   ;;  %vm1710_vm3 = vcmask 1041408  }
   0xc   : > { %s5620_s19 = smov 8   ;;  %s5621_s20 = smov 12   ;;  %vm1370_vm4 = vcmask 31744   ;;  %vm1401_vm5 = vcmask 64512   ;;  %vm1432_vm6 = vcmask 97280   ;;  %vm1465_vm7 = vcmask 130048  }
   0xd   : > { %s9683_s13 = smov (!%p161_p3, %s4156_s13), 1  ;;  %s5622_s21 = smov 16   ;;  %vm1498_vm8 = vcmask 162816   ;;  %vm1531_vm9 = vcmask 195584   ;;  %vm1564_vm10 = vcmask 228352   ;;  %vm1597_vm11 = vcmask 261120  }
   0xe   : > { %s4205_s14 = sshll.u32 %s9683_s13, 8  ;;  %s5623_s26 = smov 20   ;;  %vm1661_vm12 = vcmask 293888  }
   0xf   : > { %s5663_s17 = scalar_lea.vmem %s9227_s0, %s4205_s14  ;;  %s5624_s29 = smov 24  }
  0x10   : > { %v176_v0 = vld [vmem:[%s5663_s17 + $0x20] sm:$0xff]  ;;  %v177_v1 = vld [vmem:[%s5663_s17 + $0x28] sm:$0xff]  ;;  %v174_v2 = vld [vmem:[%s5663_s17 + $0x10] sm:$0xff]  ;;  %s5625_s30 = smov 28   ;;  %s5626_s4 = smov 32  }
  0x11   : > { %v232_v3 = vrot.slane %v176_v0, 1  ;;  %v285_v4 = vrot.slane %v176_v0, 7  ;;  %v286_v5 = vrot.slane %v177_v1, 7  ;;  %v376_v6 = vrot.slane %v177_v1, 5  ;;  %v175_v7 = vld [vmem:[%s5663_s17 + $0x18] sm:$0xff]  ;;  %v178_v8 = vld [vmem:[%s5663_s17 + $0x30] sm:$0xff]  ;;  %s9106_s16 = scalar_lea.vmem %s9230_s3, %s4205_s14 }
  0x12   : > { %v230_v9 = vrot.slane %v174_v2, 1  ;;  %v279_v10 = vrot.slane %v174_v2, 7  ;;  %v280_v11 = vrot.slane %v175_v7, 7  ;;  %v374_v12 = vrot.slane %v175_v7, 5  ;;  %v179_v21 = vld [vmem:[%s5663_s17 + $0x38] sm:$0xff]  ;;  %v172_v26 = vld [vmem:[%s5663_s17] sm:$0xff] }
  0x13   : > { %v5671_v13 = vsel %vm278_vm0, %v285_v4, %v286_v5  ;;  %v5674_v14 = vsel %vm278_vm0, %v232_v3, %v285_v4  ;;  %v5677_v15 = vsel %vm278_vm0, %v286_v5, %v376_v6  ;;  %v233_v16 = vrot.slane %v178_v8, 1  ;;  %v173_v35 = vld [vmem:[%s5663_s17 + $0x8] sm:$0xff]  ;;  %v182_v40 = vld [vmem:[%s5663_s17 + $0x50] sm:$0xff]  ;;  %v183_v49 = vld [vmem:[%s5663_s17 + $0x58] sm:$0xff] }
  0x14   : > { %v479_v17 = vrot.slane %v5674_v14, 1  ;;  %v480_v18 = vrot.slane %v5671_v13, 1  ;;  %v482_v19 = vrot.slane %v5677_v15, 1  ;;  %v5685_v22 = vsel %vm278_vm0, %v279_v10, %v280_v11  ;;  %v180_v58 = vld [vmem:[%s5663_s17 + $0x40] sm:$0xff]  ;;  %v181_v3 = vld [vmem:[%s5663_s17 + $0x48] sm:$0xff] }
  0x15   : > { %v5688_v23 = vsel %vm278_vm0, %v230_v9, %v279_v10  ;;  %v5691_v24 = vsel %vm278_vm0, %v280_v11, %v374_v12  ;;  %v288_v25 = vrot.slane %v178_v8, 7  ;;  %v470_v30 = vrot.slane %v5685_v22, 1  ;;  %v186_v8 = vld [vmem:[%s5663_s17 + $0x70] sm:$0xff] }
  0x16   : > { %v481_v27 = vsel %vm468_vm1, %v479_v17, %v480_v18  ;;  %v483_v28 = vsel %vm468_vm1, %v480_v18, %v482_v19  ;;  %v469_v29 = vrot.slane %v5688_v23, 1  ;;  %v472_v32 = vrot.slane %v5691_v24, 1 }
  0x17   : > { %v5698_v31 = vpack.i.bf16 %v483_v28, %v481_v27  ;;  %v289_v34 = vrot.slane %v179_v21, 7  ;;  %v377_v37 = vrot.slane %v179_v21, 5  ;;  %v5705_v38 = vsel %vm278_vm0, %v233_v16, %v288_v25  ;;  %v187_v21 = vld [vmem:[%s5663_s17 + $0x78] sm:$0xff] }
  0x18   : > { %v471_v36 = vsel %vm468_vm1, %v469_v29, %v470_v30  ;;  %9386 = vst [vmem:[#allocation3_spill] sm:$0xff] %v5705_v38  ;;  %v231_v39 = vrot.slane %v172_v26, 1  ;;  %v473_v41 = vsel %vm468_vm1, %v470_v30, %v472_v32  ;;  %v484_v43 = vrot.slane %v5705_v38, 1  ;;  %v184_v29 = vld [vmem:[%s5663_s17 + $0x60] sm:$0xff] }
  0x19   : > { %9385 = vst [vmem:[#allocation2_spill] sm:$0xff] %v5698_v31  ;;  %4350 = vrot.lane.b32.xlu1 %v5698_v31, %s5619_s18  ;;  %v5712_v42 = vsel %vm278_vm0, %v288_v25, %v289_v34  ;;  %v282_v44 = vrot.slane %v172_v26, 7  ;;  %v5715_v45 = vpack.i.bf16 %v473_v41, %v471_v36  ;;  %v5718_v46 = vsel %vm278_vm0, %v289_v34, %v377_v37  ;;  %v185_v41 = vld [vmem:[%s5663_s17 + $0x68] sm:$0xff] }
  0x1a   : > { %v485_v47 = vrot.slane %v5712_v42, 1  ;;  %v283_v48 = vrot.slane %v173_v35, 7  ;;  %v487_v50 = vrot.slane %v5718_v46, 1  ;;  %v375_v51 = vrot.slane %v173_v35, 5 }
  0x1b   : > { %v5724_v52 = vsel %vm278_vm0, %v231_v39, %v282_v44  ;;  %v235_v53 = vrot.slane %v182_v40, 1  ;;  %4340 = vrot.lane.b32.xlu0 %v5715_v45, %s5619_s18  ;;  %v294_v57 = vrot.slane %v182_v40, 7  ;;  %v295_v62 = vrot.slane %v183_v49, 7 }
  0x1c   : > { %v486_v54 = vsel %vm468_vm1, %v484_v43, %v485_v47  ;;  %v5730_v55 = vsel %vm278_vm0, %v282_v44, %v283_v48  ;;  %v474_v56 = vrot.slane %v5724_v52, 1  ;;  %v488_v59 = vsel %vm468_vm1, %v485_v47, %v487_v50 }
  0x1d   : > { %v5736_v60 = vsel %vm278_vm0, %v283_v48, %v375_v51  ;;  %v475_v61 = vrot.slane %v5730_v55, 1  ;;  %v5739_v63 = vpack.i.bf16 %v488_v59, %v486_v54  ;;  %v379_v1 = vrot.slane %v183_v49, 5  ;;  %v190_v49 = vld [vmem:[%s5663_s17 + $0x90] sm:$0xff] }
  0x1e   : > { %v477_v0 = vrot.slane %v5736_v60, 1  ;;  %v5743_v2 = vsel %vm278_vm0, %v235_v53, %v294_v57  ;;  %v5748_v5 = vsel %vm278_vm0, %v294_v57, %v295_v62  ;;  %v234_v7 = vrot.slane %v180_v58, 1 }
  0x1f   : > { %9387 = vst [vmem:[#allocation4_spill] sm:$0xff] %v5739_v63  ;;  %9388 = vst [vmem:[#allocation5_spill] sm:$0xff] %v5743_v2  ;;  %v476_v4 = vsel %vm468_vm1, %v474_v56, %v475_v61  ;;  %v494_v6 = vrot.slane %v5743_v2, 1  ;;  %4355 = vrot.lane.b32.xlu1 %v5739_v63, %s5619_s18  ;;  %v5756_v10 = vsel %vm278_vm0, %v295_v62, %v379_v1  ;;  %v495_v11 = vrot.slane %v5748_v5, 1 }
  0x20   : > { %9389 = vst [vmem:[#allocation6_spill] sm:$0xff] %v5748_v5  ;;  %v478_v9 = vsel %vm468_vm1, %v475_v61, %v477_v0  ;;  %v291_v12 = vrot.slane %v180_v58, 7  ;;  %v497_v17 = vrot.slane %v5756_v10, 1  ;;  %v292_v18 = vrot.slane %v181_v3, 7  ;;  %v191_v61 = vld [vmem:[%s5663_s17 + $0x98] sm:$0xff] }
  0x21   : > { %v5759_v16 = vpack.i.bf16 %v478_v9, %v476_v4  ;;  %v378_v19 = vrot.slane %v181_v3, 5  ;;  %v496_v25 = vsel %vm468_vm1, %v494_v6, %v495_v11  ;;  %v237_v27 = vrot.slane %v186_v8, 1  ;;  %v188_v9 = vld [vmem:[%s5663_s17 + $0x80] sm:$0xff] }
  0x22   : > { %v5765_v26 = vsel %vm278_vm0, %v234_v7, %v291_v12  ;;  %v300_v28 = vrot.slane %v186_v8, 7  ;;  %v498_v30 = vsel %vm468_vm1, %v495_v11, %v497_v17  ;;  %v5772_v32 = vsel %vm278_vm0, %v291_v12, %v292_v18 }
  0x23   : > { %9390 = vst [vmem:[#allocation7_spill] sm:$0xff] %v5765_v26  ;;  %4345 = vrot.lane.b32.xlu0 %v5759_v16, %s5619_s18  ;;  %9391 = vst [vmem:[#allocation8_spill] sm:$0xff] %v5772_v32  ;;  %v5775_v34 = vsel %vm278_vm0, %v292_v18, %v378_v19  ;;  %v489_v35 = vrot.slane %v5765_v26, 1  ;;  %v5778_v36 = vpack.i.bf16 %v498_v30, %v496_v25  ;;  %v490_v37 = vrot.slane %v5772_v32, 1 }
  0x24   : > { %v492_v39 = vrot.slane %v5775_v34, 1  ;;  %v301_v40 = vrot.slane %v187_v21, 7  ;;  %v381_v43 = vrot.slane %v187_v21, 5  ;;  %v5784_v44 = vsel %vm278_vm0, %v237_v27, %v300_v28 }
  0x25   : > { %9392 = vst [vmem:[#allocation9_spill] sm:$0xff] %v5778_v36  ;;  %9393 = vst [vmem:[#allocation10_spill] sm:$0xff] %v5784_v44  ;;  %v236_v47 = vrot.slane %v184_v29, 1  ;;  %v297_v48 = vrot.slane %v184_v29, 7  ;;  %4365 = vrot.lane.b32.xlu1 %v5778_v36, %s5619_s18  ;;  %v491_v50 = vsel %vm468_vm1, %v489_v35, %v490_v37  ;;  %v504_v54 = vrot.slane %v5784_v44, 1 }
  0x26   : > { %v493_v51 = vsel %vm468_vm1, %v490_v37, %v492_v39  ;;  %v5792_v53 = vsel %vm278_vm0, %v300_v28, %v301_v40  ;;  %v5798_v57 = vsel %vm278_vm0, %v301_v40, %v381_v43  ;;  %v298_v59 = vrot.slane %v185_v41, 7  ;;  %v189_v28 = vld [vmem:[%s5663_s17 + $0x88] sm:$0xff]  ;;  %v194_v39 = vld [vmem:[%s5663_s17 + $0xb0] sm:$0xff] }
  0x27   : > { %9394 = vst [vmem:[#allocation11_spill] sm:$0xff] %v5792_v53  ;;  %v5795_v56 = vpack.i.bf16 %v493_v51, %v491_v50  ;;  %v505_v58 = vrot.slane %v5792_v53, 1  ;;  %v507_v62 = vrot.slane %v5798_v57, 1  ;;  %v380_v0 = vrot.slane %v185_v41, 5 }
  0x28   : > { %v5804_v1 = vsel %vm278_vm0, %v236_v47, %v297_v48  ;;  %v239_v3 = vrot.slane %v190_v49, 1  ;;  %v5810_v6 = vsel %vm278_vm0, %v297_v48, %v298_v59  ;;  %v306_v8 = vrot.slane %v190_v49, 7 }
  0x29   : > { %9395 = vst [vmem:[#allocation12_spill] sm:$0xff] %v5795_v56  ;;  %9396 = vst [vmem:[#allocation13_spill] sm:$0xff] %v5804_v1  ;;  %4360 = vrot.lane.b32.xlu0 %v5795_v56, %s5619_s18  ;;  %v506_v4 = vsel %vm468_vm1, %v504_v54, %v505_v58  ;;  %v499_v7 = vrot.slane %v5804_v1, 1  ;;  %v508_v11 = vsel %vm468_vm1, %v505_v58, %v507_v62  ;;  %v500_v17 = vrot.slane %v5810_v6, 1  ;;  %v195_v54 = vld [vmem:[%s5663_s17 + $0xb8] sm:$0xff] }
  0x2a   : > { %9397 = vst [vmem:[#allocation14_spill] sm:$0xff] %v5810_v6  ;;  %v5816_v12 = vsel %vm278_vm0, %v298_v59, %v380_v0  ;;  %v307_v18 = vrot.slane %v191_v61, 7  ;;  %v5819_v19 = vpack.i.bf16 %v508_v11, %v506_v4  ;;  %v383_v25 = vrot.slane %v191_v61, 5  ;;  %v192_v0 = vld [vmem:[%s5663_s17 + $0xa0] sm:$0xff] }
  0x2b   : > { %v502_v21 = vrot.slane %v5816_v12, 1  ;;  %v5823_v27 = vsel %vm278_vm0, %v239_v3, %v306_v8  ;;  %v501_v29 = vsel %vm468_vm1, %v499_v7, %v500_v17  ;;  %v238_v37 = vrot.slane %v188_v9, 1 }
  0x2c   : > { %9398 = vst [vmem:[#allocation15_spill] sm:$0xff] %v5819_v19  ;;  %9399 = vst [vmem:[#allocation16_spill] sm:$0xff] %v5823_v27  ;;  %v5828_v30 = vsel %vm278_vm0, %v306_v8, %v307_v18  ;;  %v514_v35 = vrot.slane %v5823_v27, 1  ;;  %4375 = vrot.lane.b32.xlu1 %v5819_v19, %s5619_s18  ;;  %v5836_v41 = vsel %vm278_vm0, %v307_v18, %v383_v25  ;;  %v303_v47 = vrot.slane %v188_v9, 7 }
  0x2d   : > { %9400 = vst [vmem:[#allocation17_spill] sm:$0xff] %v5828_v30  ;;  %v503_v40 = vsel %vm468_vm1, %v500_v17, %v502_v21  ;;  %v515_v43 = vrot.slane %v5828_v30, 1  ;;  %v517_v49 = vrot.slane %v5836_v41, 1  ;;  %v304_v50 = vrot.slane %v189_v28, 7  ;;  %v193_v21 = vld [vmem:[%s5663_s17 + $0xa8] sm:$0xff] }
  0x2e   : > { %v5839_v48 = vpack.i.bf16 %v503_v40, %v501_v29  ;;  %v382_v51 = vrot.slane %v189_v28, 5  ;;  %v5845_v59 = vsel %vm278_vm0, %v238_v37, %v303_v47  ;;  %v241_v61 = vrot.slane %v194_v39, 1  ;;  %v198_v37 = vld [vmem:[%s5663_s17 + $0xd0] sm:$0xff] }
  0x2f   : > { %v516_v58 = vsel %vm468_vm1, %v514_v35, %v515_v43  ;;  %9402 = vst [vmem:[#allocation19_spill] sm:$0xff] %v5845_v59  ;;  %v312_v62 = vrot.slane %v194_v39, 7  ;;  %v518_v3 = vsel %vm468_vm1, %v515_v43, %v517_v49  ;;  %v5852_v4 = vsel %vm278_vm0, %v303_v47, %v304_v50 }
  0x30   : > { %9401 = vst [vmem:[#allocation18_spill] sm:$0xff] %v5839_v48  ;;  %4370 = vrot.lane.b32.xlu0 %v5839_v48, %s5619_s18  ;;  %9403 = vst [vmem:[#allocation20_spill] sm:$0xff] %v5852_v4  ;;  %v5855_v7 = vsel %vm278_vm0, %v304_v50, %v382_v51  ;;  %v509_v8 = vrot.slane %v5845_v59, 1  ;;  %v5858_v9 = vpack.i.bf16 %v518_v3, %v516_v58  ;;  %v510_v11 = vrot.slane %v5852_v4, 1  ;;  %v199_v58 = vld [vmem:[%s5663_s17 + $0xd8] sm:$0xff] }
  0x31   : > { %v512_v17 = vrot.slane %v5855_v7, 1  ;;  %v313_v18 = vrot.slane %v195_v54, 7  ;;  %v385_v25 = vrot.slane %v195_v54, 5  ;;  %v5864_v28 = vsel %vm278_vm0, %v241_v61, %v312_v62 }
  0x32   : > { %9404 = vst [vmem:[#allocation21_spill] sm:$0xff] %v5858_v9  ;;  %9405 = vst [vmem:[#allocation22_spill] sm:$0xff] %v5864_v28  ;;  %v240_v29 = vrot.slane %v192_v0, 1  ;;  %v309_v35 = vrot.slane %v192_v0, 7  ;;  %4385 = vrot.lane.b32.xlu1 %v5858_v9, %s5619_s18  ;;  %v511_v39 = vsel %vm468_vm1, %v509_v8, %v510_v11  ;;  %v524_v47 = vrot.slane %v5864_v28, 1 }
  0x33   : > { %v513_v40 = vsel %vm468_vm1, %v510_v11, %v512_v17  ;;  %v5872_v43 = vsel %vm278_vm0, %v312_v62, %v313_v18  ;;  %v5878_v50 = vsel %vm278_vm0, %v313_v18, %v385_v25  ;;  %v310_v54 = vrot.slane %v193_v21, 7  ;;  %v196_v25 = vld [vmem:[%s5663_s17 + $0xc0] sm:$0xff] }
  0x34   : > { %9406 = vst [vmem:[#allocation23_spill] sm:$0xff] %v5872_v43  ;;  %v5875_v49 = vpack.i.bf16 %v513_v40, %v511_v39  ;;  %v525_v51 = vrot.slane %v5872_v43, 1  ;;  %v527_v61 = vrot.slane %v5878_v50, 1  ;;  %v384_v0 = vrot.slane %v193_v21, 5 }
  0x35   : > { %v5884_v3 = vsel %vm278_vm0, %v240_v29, %v309_v35  ;;  %v243_v62 = vrot.slane %v198_v37, 1  ;;  %v5890_v11 = vsel %vm278_vm0, %v309_v35, %v310_v54  ;;  %v318_v18 = vrot.slane %v198_v37, 7 }
  0x36   : > { %9407 = vst [vmem:[#allocation24_spill] sm:$0xff] %v5875_v49  ;;  %9408 = vst [vmem:[#allocation25_spill] sm:$0xff] %v5884_v3  ;;  %4380 = vrot.lane.b32.xlu0 %v5875_v49, %s5619_s18  ;;  %v526_v8 = vsel %vm468_vm1, %v524_v47, %v525_v51  ;;  %v519_v17 = vrot.slane %v5884_v3, 1  ;;  %v528_v39 = vsel %vm468_vm1, %v525_v51, %v527_v61  ;;  %v520_v29 = vrot.slane %v5890_v11, 1  ;;  %v197_v49 = vld [vmem:[%s5663_s17 + $0xc8] sm:$0xff] }
  0x37   : > { %9409 = vst [vmem:[#allocation26_spill] sm:$0xff] %v5890_v11  ;;  %v5896_v21 = vsel %vm278_vm0, %v310_v54, %v384_v0  ;;  %v319_v40 = vrot.slane %v199_v58, 7  ;;  %v5899_v20 = vpack.i.bf16 %v528_v39, %v526_v8  ;;  %v387_v47 = vrot.slane %v199_v58, 5 }
  0x38   : > { %v522_v33 = vrot.slane %v5896_v21, 1  ;;  %v5903_v35 = vsel %vm278_vm0, %v243_v62, %v318_v18  ;;  %v521_v37 = vsel %vm468_vm1, %v519_v17, %v520_v29  ;;  %v242_v54 = vrot.slane %v196_v25, 1 }
  0x39   : > { %9410 = vst [vmem:[#allocation27_spill] sm:$0xff] %v5899_v20  ;;  %9411 = vst [vmem:[#allocation28_spill] sm:$0xff] %v5903_v35  ;;  %v5908_v9 = vsel %vm278_vm0, %v318_v18, %v319_v40  ;;  %v534_v51 = vrot.slane %v5903_v35, 1  ;;  %4395 = vrot.lane.b32.xlu1 %v5899_v20, %s5619_s18  ;;  %v5915_v58 = vsel %vm278_vm0, %v319_v40, %v387_v47  ;;  %v315_v62 = vrot.slane %v196_v25, 7  ;;  %v201_v40 = vld [vmem:[%s5663_s17 + $0xe8] sm:$0xff] }
  0x3a   : > { %9412 = vst [vmem:[#allocation29_spill] sm:$0xff] %v5908_v9  ;;  %v523_v61 = vsel %vm468_vm1, %v520_v29, %v522_v33  ;;  %v535_v0 = vrot.slane %v5908_v9, 1  ;;  %v537_v17 = vrot.slane %v5915_v58, 1  ;;  %v316_v18 = vrot.slane %v197_v49, 7  ;;  %v200_v29 = vld [vmem:[%s5663_s17 + $0xe0] sm:$0xff] }
  0x3b   : > { %v5918_v8 = vpack.i.bf16 %v523_v61, %v521_v37  ;;  %v386_v39 = vrot.slane %v197_v49, 5  ;;  %v5923_v19 = vsel %vm278_vm0, %v242_v54, %v315_v62  ;;  %v635_v20 = vrot.slane %v5688_v23, 2 }
  0x3c   : > { %v536_v48 = vsel %vm468_vm1, %v534_v51, %v535_v0  ;;  %9414 = vst [vmem:[#allocation31_spill] sm:$0xff] %v5923_v19  ;;  %v636_v33 = vrot.slane %v5685_v22, 2  ;;  %v538_v25 = vsel %vm468_vm1, %v535_v0, %v537_v17  ;;  %v5933_v47 = vsel %vm278_vm0, %v315_v62, %v316_v18 }
  0x3d   : > { %9413 = vst [vmem:[#allocation30_spill] sm:$0xff] %v5918_v8  ;;  %4390 = vrot.lane.b32.xlu0 %v5918_v8, %s5619_s18  ;;  %9415 = vst [vmem:[#allocation32_spill] sm:$0xff] %v5933_v47  ;;  %v5936_v49 = vsel %vm278_vm0, %v316_v18, %v386_v39  ;;  %v529_v37 = vrot.slane %v5923_v19, 1  ;;  %v5939_v51 = vpack.i.bf16 %v538_v25, %v536_v48  ;;  %v530_v54 = vrot.slane %v5933_v47, 1 }
  0x3e   : > { %v532_v61 = vrot.slane %v5936_v49, 1  ;;  %v637_v56 = vsel %vm634_vm2, %v635_v20, %v636_v33  ;;  %v9417_v8 = vrot.slane %v5691_v24, 2  ;;  %v244_v17 = vrot.slane %v200_v29, 1 }
  0x3f   : > { %9416 = vst [vmem:[#allocation33_spill] sm:$0xff] %v5939_v51  ;;  %v321_v62 = vrot.slane %v200_v29, 7  ;;  %v322_v36 = vrot.slane %v201_v40, 7  ;;  %4405 = vrot.lane.b32.xlu1 %v5939_v51, %s5619_s18  ;;  %v531_v18 = vsel %vm468_vm1, %v529_v37, %v530_v54  ;;  %v388_v25 = vrot.slane %v201_v40, 5 }
  0x40   : > { %v639_v0 = vsel %vm634_vm2, %v636_v33, %v9417_v8  ;;  %v533_v48 = vsel %vm468_vm1, %v530_v54, %v532_v61  ;;  %v645_v8 = vrot.slane %v5674_v14, 2  ;;  %v640_v54 = vrot.slane %v5724_v52, 2 }
  0x41   : > { %v5951_v39 = vpack.i.bf16 %v639_v0, %v637_v56  ;;  %v5953_v31 = vpack.i.bf16 %v533_v48, %v531_v18  ;;  %v5956_v20 = vsel %vm278_vm0, %v321_v62, %v322_v36  ;;  %v5959_v24 = vsel %vm278_vm0, %v244_v17, %v321_v62 }
  0x42   : > { %9420 = vst [vmem:[#allocation36_spill] sm:$0xff] %v5956_v20  ;;  %9421 = vst [vmem:[#allocation37_spill] sm:$0xff] %v5959_v24  ;;  %v5963_v33 = vsel %vm278_vm0, %v322_v36, %v388_v25  ;;  %v539_v29 = vrot.slane %v5959_v24, 1  ;;  %v540_v37 = vrot.slane %v5956_v20, 1  ;;  %v646_v56 = vrot.slane %v5671_v13, 2 }
  0x43   : > { %9418 = vst [vmem:[#allocation34_spill] sm:$0xff] %v5951_v39  ;;  %9419 = vst [vmem:[#allocation35_spill] sm:$0xff] %v5953_v31  ;;  %4400 = vrot.lane.b32.xlu0 %v5953_v31, %s5619_s18  ;;  %v542_v40 = vrot.slane %v5963_v33, 1  ;;  %v641_v61 = vrot.slane %v5730_v55, 2  ;;  %v643_v0 = vrot.slane %v5736_v60, 2  ;;  %4415 = vrot.lane.b32.xlu1 %v5951_v39, %s5620_s19  ;;  %v9422_v62 = vrot.slane %v5677_v15, 2 }
  0x44   : > { %v541_v36 = vsel %vm468_vm1, %v539_v29, %v540_v37  ;;  %v647_v17 = vsel %vm634_vm2, %v645_v8, %v646_v56  ;;  %v655_v48 = vrot.slane %v5765_v26, 2  ;;  %v656_v8 = vrot.slane %v5772_v32, 2 }
  0x45   : > { %v649_v18 = vsel %vm634_vm2, %v646_v56, %v9422_v62  ;;  %v543_v25 = vsel %vm468_vm1, %v540_v37, %v542_v40  ;;  %v642_v60 = vsel %vm634_vm2, %v640_v54, %v641_v61  ;;  %v644_v51 = vsel %vm634_vm2, %v641_v61, %v643_v0 }
  0x46   : > { %v5983_v31 = vpack.i.bf16 %v649_v18, %v647_v17  ;;  %v5987_v63 = vpack.i.bf16 %v543_v25, %v541_v36  ;;  %v5989_v39 = vpack.i.bf16 %v644_v51, %v642_v60  ;;  %v658_v15 = vrot.slane %v5775_v34, 2 }
  0x47   : > { %v650_v29 = vrot.slane %v5705_v38, 2  ;;  %v651_v56 = vrot.slane %v5712_v42, 2  ;;  %v653_v37 = vrot.slane %v5718_v46, 2  ;;  %v665_v40 = vrot.slane %v5804_v1, 2 }
  0x48   : > { %4410 = vrot.lane.b32.xlu0 %v5987_v63, %s5619_s18  ;;  %4425 = vrot.lane.b32.xlu1 %v5983_v31, %s5620_s19  ;;  %v657_v51 = vsel %vm634_vm2, %v655_v48, %v656_v8  ;;  %v659_v54 = vsel %vm634_vm2, %v656_v8, %v658_v15  ;;  %v666_v34 = vrot.slane %v5810_v6, 2  ;;  %v668_v61 = vrot.slane %v5816_v12, 2 }
  0x49   : > { %v6005_v0 = vpack.i.bf16 %v659_v54, %v657_v51  ;;  %v652_v46 = vsel %vm634_vm2, %v650_v29, %v651_v56  ;;  %v654_v36 = vsel %vm634_vm2, %v651_v56, %v653_v37  ;;  %v660_v17 = vrot.slane %v5743_v2, 2 }
  0x4a   : > { %v6010_v62 = vpack.i.bf16 %v654_v36, %v652_v46  ;;  %v667_v18 = vsel %vm634_vm2, %v665_v40, %v666_v34  ;;  %v669_v48 = vsel %vm634_vm2, %v666_v34, %v668_v61  ;;  %v661_v25 = vrot.slane %v5748_v5, 2 }
  0x4b   : > { %v6015_v60 = vpack.i.bf16 %v669_v48, %v667_v18  ;;  %v663_v12 = vrot.slane %v5756_v10, 2  ;;  %v675_v8 = vrot.slane %v5845_v59, 2  ;;  %v676_v15 = vrot.slane %v5852_v4, 2 }
  0x4c   : > { %4420 = vrot.lane.b32.xlu0 %v5989_v39, %s5620_s19  ;;  %4435 = vrot.lane.b32.xlu1 %v6005_v0, %s5620_s19  ;;  %v662_v29 = vsel %vm634_vm2, %v660_v17, %v661_v25  ;;  %v678_v56 = vrot.slane %v5855_v7, 2  ;;  %v670_v37 = vrot.slane %v5784_v44, 2  ;;  %v671_v40 = vrot.slane %v5792_v53, 2 }
  0x4d   : > { %v664_v10 = vsel %vm634_vm2, %v661_v25, %v663_v12  ;;  %v677_v51 = vsel %vm634_vm2, %v675_v8, %v676_v15  ;;  %v673_v54 = vrot.slane %v5798_v57, 2  ;;  %v685_v34 = vrot.slane %v5884_v3, 2 }
  0x4e   : > { %v6032_v61 = vpack.i.bf16 %v664_v10, %v662_v29  ;;  %v679_v46 = vsel %vm634_vm2, %v676_v15, %v678_v56  ;;  %v686_v36 = vrot.slane %v5890_v11, 2  ;;  %v672_v7 = vsel %vm634_vm2, %v670_v37, %v671_v40 }
  0x4f   : > { %v674_v17 = vsel %vm634_vm2, %v671_v40, %v673_v54  ;;  %v688_v18 = vrot.slane %v5896_v21, 2  ;;  %v680_v48 = vrot.slane %v5823_v27, 2  ;;  %v6044_v57 = vpack.i.bf16 %v679_v46, %v677_v51 }
  0x50   : > { %4430 = vrot.lane.b32.xlu0 %v6010_v62, %s5620_s19  ;;  %4445 = vrot.lane.b32.xlu1 %v6015_v60, %s5620_s19  ;;  %v687_v25 = vsel %vm634_vm2, %v685_v34, %v686_v36  ;;  %v681_v12 = vrot.slane %v5828_v30, 2  ;;  %v683_v8 = vrot.slane %v5836_v41, 2  ;;  %v695_v21 = vrot.slane %v5923_v19, 2 }
  0x51   : > { %v689_v15 = vsel %vm634_vm2, %v686_v36, %v688_v18  ;;  %v696_v29 = vrot.slane %v5933_v47, 2  ;;  %v698_v56 = vrot.slane %v5936_v49, 2  ;;  %v6053_v37 = vpack.i.bf16 %v674_v17, %v672_v7 }
  0x52   : > { %v6055_v40 = vpack.i.bf16 %v689_v15, %v687_v25  ;;  %v682_v10 = vsel %vm634_vm2, %v680_v48, %v681_v12  ;;  %v690_v51 = vrot.slane %v5864_v28, 2  ;;  %v691_v54 = vrot.slane %v5872_v43, 2 }
  0x53   : > { %v684_v41 = vsel %vm634_vm2, %v681_v12, %v683_v8  ;;  %v697_v49 = vsel %vm634_vm2, %v695_v21, %v696_v29  ;;  %v699_v34 = vsel %vm634_vm2, %v696_v29, %v698_v56  ;;  %v693_v46 = vrot.slane %v5878_v50, 2 }
  0x54   : > { %4440 = vrot.lane.b32.xlu0 %v6032_v61, %s5620_s19  ;;  %4455 = vrot.lane.b32.xlu1 %v6044_v57, %s5620_s19  ;;  %v705_v36 = vrot.slane %v5959_v24, 2  ;;  %v706_v7 = vrot.slane %v5956_v20, 2  ;;  %v708_v17 = vrot.slane %v5963_v33, 2  ;;  %v6071_v18 = vpack.i.bf16 %v684_v41, %v682_v10 }
  0x55   : > { %v6073_v48 = vpack.i.bf16 %v699_v34, %v697_v49  ;;  %v692_v25 = vsel %vm634_vm2, %v690_v51, %v691_v54  ;;  %v694_v50 = vsel %vm634_vm2, %v691_v54, %v693_v46  ;;  %v700_v12 = vrot.slane %v5903_v35, 2 }
  0x56   : > { %v701_v8 = vrot.slane %v5908_v9, 2  ;;  %v703_v33 = vrot.slane %v5915_v58, 2  ;;  %v707_v15 = vsel %vm634_vm2, %v705_v36, %v706_v7  ;;  %v709_v21 = vsel %vm634_vm2, %v706_v7, %v708_v17 }
  0x57   : > { %v6086_v29 = vpack.i.bf16 %v694_v50, %v692_v25  ;;  %v6092_v56 = vpack.i.bf16 %v709_v21, %v707_v15  ;;  %v6100_v58 = vpack.i.bf16 %v5685_v22, %v5688_v23  ;;  %v4489_v41 = vpack.i.bf16 %v5730_v55, %v5724_v52  ;;  %v202_v50 = vld [vmem:[%s5663_s17 + $0xf0] sm:$0xff] }
  0x58   : > { %4450 = vrot.lane.b32.xlu0 %v6053_v37, %s5620_s19  ;;  %4465 = vrot.lane.b32.xlu1 %v6055_v40, %s5620_s19  ;;  %v702_v10 = vsel %vm634_vm2, %v700_v12, %v701_v8  ;;  %v704_v51 = vsel %vm634_vm2, %v701_v8, %v703_v33  ;;  %v6110_v49 = vpack.i.bf16 %v5712_v42, %v5705_v38  ;;  %v203_v12 = vld [vmem:[%s5663_s17 + $0xf8] sm:$0xff]  ;;  %v245_v15 = vrot.slane %v202_v50, 1 }
  0x59   : > { %v6096_v54 = vpack.i.bf16 %v704_v51, %v702_v10  ;;  %v6118_v34 = vpack.i.bf16 %v5671_v13, %v5674_v14  ;;  %v6125_v46 = vpack.i.bf16 %v5748_v5, %v5743_v2  ;;  %v6129_v36 = vpack.i.bf16 %v5772_v32, %v5765_v26  ;;  %v9435_v2 = vld [vmem:[#allocation34_spill] sm:$0xff] }
  0x5a   : > { %v6137_v7 = vpack.i.bf16 %v5792_v53, %v5784_v44  ;;  %v6145_v17 = vpack.i.bf16 %v5810_v6, %v5804_v1  ;;  %v6149_v25 = vpack.i.bf16 %v5828_v30, %v5823_v27  ;;  %v6159_v8 = vpack.i.bf16 %v5852_v4, %v5845_v59  ;;  %v9426_v59 = vld [vmem:[#allocation12_spill] sm:$0xff] }
  0x5b   : > { %v6163_v33 = vpack.i.bf16 %v5872_v43, %v5864_v28  ;;  %v324_v21 = vrot.slane %v202_v50, 7  ;;  %v325_v10 = vrot.slane %v203_v12, 7  ;;  %v6171_v51 = vpack.i.bf16 %v5890_v11, %v5884_v3 }
  0x5c   : > { %4460 = vrot.lane.b32.xlu0 %v6071_v18, %s5620_s19  ;;  %4475 = vrot.lane.b32.xlu1 %v6073_v48, %s5620_s19  ;;  %v6185_v50 = vpack.i.bf16 %v5933_v47, %v5923_v19 }
  0x5d   : > { %v326_v28 = vsel %vm278_vm0, %v324_v21, %v325_v10  ;;  %v421_v43 = vsel %vm278_vm0, %v245_v15, %v324_v21  ;;  %v6195_v15 = vpack.i.bf16 %v5956_v20, %v5959_v24  ;;  %v9423_v21 = vld [vmem:[#allocation4_spill] sm:$0xff]  ;;  %v9425_v24 = vld [vmem:[#allocation9_spill] sm:$0xff] }
  0x5e   : > { %v6187_v3 = vpack.i.bf16 %v326_v28, %v421_v43  ;;  %v899_v20 = vrot.slane %v326_v28, 1  ;;  %v898_v19 = vrot.slane %v421_v43, 1  ;;  %v999_v27 = vrot.slane %v421_v43, 2 }
  0x60   : > { %4470 = vrot.lane.b32.xlu0 %v6086_v29, %s5620_s19  ;;  %4485 = vrot.lane.b32.xlu1 %v6092_v56, %s5620_s19  ;;  %v900_v1 = vsel %vm468_vm1, %v898_v19, %v899_v20 }
  0x64   : > { %4480 = vrot.lane.b32.xlu0 %v6096_v54, %s5620_s19  ;;  %4495 = vrot.lane.b32.xlu1 %v6100_v58, %s5621_s20 }
  0x68   : > { %4490 = vrot.lane.b32.xlu0 %v4489_v41, %s5621_s20  ;;  %4505 = vrot.lane.b32.xlu1 %v6110_v49, %s5621_s20  ;;  %v6175_v41 = vpack.i.bf16 %v5908_v9, %v5903_v35  ;;  %v389_v35 = vrot.slane %v203_v12, 5  ;;  %v9424_v9 = vld [vmem:[#allocation2_spill] sm:$0xff]  ;;  %v1000_v12 = vrot.slane %v326_v28, 2 }
  0x6a   : > { %v437_v11 = vsel %vm278_vm0, %v325_v10, %v389_v35  ;;  %v9428_v35 = vld [vmem:[#allocation18_spill] sm:$0xff]  ;;  %v9429_v10 = vld [vmem:[#allocation21_spill] sm:$0xff]  ;;  %v1001_v28 = vsel %vm634_vm2, %v999_v27, %v1000_v12 }
  0x6b   : > { %v901_v4 = vrot.slane %v437_v11, 1  ;;  %v1002_v53 = vrot.slane %v437_v11, 2  ;;  %v5569_v11 = vld [vmem:[%s9228_s1 + $0x10] ss:$0 sps:$4 sm:$0x33]   ;;  %v9432_v27 = vld [vmem:[#allocation30_spill] sm:$0xff] }
  0x6c   : > { %4500 = vrot.lane.b32.xlu0 %v6118_v34, %s5621_s20  ;;  %4515 = vrot.lane.b32.xlu1 %v6125_v46, %s5621_s20 }
  0x6d   : > { %v902_v6 = vsel %vm468_vm1, %v899_v20, %v901_v4  ;;  %v1003_v43 = vsel %vm634_vm2, %v1000_v12, %v1002_v53  ;;  %v9433_v53 = vld [vmem:[#allocation33_spill] sm:$0xff]  ;;  %4321 = vmatprep.subr.msk.bf16.mxu0 %vm1710_vm3, %v5569_v11  ;;  %v1712_v12 = vsel %vm1710_vm3, %v5569_v11, 0  ;;  %v5571_v11 = vld [vmem:[%s9228_s1] sm:$0xff]  }
  0x6e   : > { %v6220_v44 = vpack.i.bf16 %v902_v6, %v900_v1  ;;  %v6232_v19 = vpack.i.bf16 %v1003_v43, %v1001_v28  ;;  %v9430_v1 = vld [vmem:[#allocation24_spill] sm:$0xff]  ;;  %v9431_v6 = vld [vmem:[#allocation27_spill] sm:$0xff]  ;;  %4246 = vmatpush3.bf16.msra.mxu0 %v1712_v12 }
  0x6f   : > { %v5570_v28 = vld [vmem:[%s9228_s1 + $0x8] sm:$0xff]  }
  0x70   : > { %4510 = vrot.lane.b32.xlu0 %v6129_v36, %s5621_s20  ;;  %4525 = vrot.lane.b32.xlu1 %v6137_v7, %s5621_s20  ;;  %v9434_v43 = vld [vmem:[#allocation35_spill] sm:$0xff] }
  0x71   : > { %4247 = vmatprep.subr.bf16.mxu0 %v5570_v28 }
  0x72   : > { %4248 = vmatpush3.bf16.msra.mxu0 %v5570_v28 }
  0x73   : > { %4249 = vmatprep.subr.bf16.mxu0 %v5571_v11 }
  0x74   : > { %4520 = vrot.lane.b32.xlu0 %v6145_v17, %s5621_s20  ;;  %4535 = vrot.lane.b32.xlu1 %v6149_v25, %s5621_s20 }
  0x76   : > { %4250 = vmatpush3.bf16.msra.mxu0 %v5571_v11 }
  0x78   : > { %4530 = vrot.lane.b32.xlu0 %v6159_v8, %s5621_s20  ;;  %4545 = vrot.lane.b32.xlu1 %v6163_v33, %s5621_s20 }
  0x7c   : > { %4540 = vrot.lane.b32.xlu0 %v6171_v51, %s5621_s20  ;;  %4555 = vrot.lane.b32.xlu1 %v6175_v41, %s5621_s20 }
  0x80   : > { %4550 = vrot.lane.b32.xlu0 %v6185_v50, %s5621_s20  ;;  %4565 = vrot.lane.b32.xlu1 %v6187_v3, %s5621_s20 }
  0x84   : > { %4560 = vrot.lane.b32.xlu0 %v6195_v15, %s5621_s20  ;;  %4575 = vrot.lane.b32.xlu1 %v5715_v45, %s5622_s21 }
  0x88   : > { %4570 = vrot.lane.b32.xlu0 %v5759_v16, %s5622_s21  ;;  %4585 = vrot.lane.b32.xlu1 %v9423_v21, %s5622_s21  ;;  %v9427_v16 = vld [vmem:[#allocation15_spill] sm:$0xff] }
  0x8b   : > { %v6209_v47 = vpop.permute.xlu1 %4350 }
  0x8c   : > { %4580 = vrot.lane.b32.xlu0 %v9424_v9, %s5622_s21  ;;  %4595 = vrot.lane.b32.xlu1 %v9425_v24, %s5622_s21 }
  0x8d   : > { %v6216_v30 = vpop.permute.xlu0 %4340 }
  0x90   : > { %4590 = vrot.lane.b32.xlu0 %v9426_v59, %s5622_s21  ;;  %4605 = vrot.lane.b32.xlu1 %v9427_v16, %s5622_s21 }
  0x91   : > { %v6226_v26 = vpop.permute.xlu1 %4355 }
  0x94   : > { %4600 = vrot.lane.b32.xlu0 %v9428_v35, %s5622_s21  ;;  %4615 = vrot.lane.b32.xlu1 %v9429_v10, %s5622_s21 }
  0x95   : > { %v6230_v32 = vpop.permute.xlu0 %4345 }
  0x97   : > { %v6238_v4 = vpop.permute.xlu1 %4365 }
  0x98   : > { %4610 = vrot.lane.b32.xlu0 %v9430_v1, %s5622_s21  ;;  %4625 = vrot.lane.b32.xlu1 %v9431_v6, %s5622_s21 }
  0x9b   : > { %v6247_v20 = vpop.permute.xlu0 %4360 }
  0x9c   : > { %4620 = vrot.lane.b32.xlu0 %v9432_v27, %s5622_s21  ;;  %4635 = vrot.lane.b32.xlu1 %v9433_v53, %s5622_s21 }
  0x9e   : > { %v6258_v5 = vpop.permute.xlu1 %4375 }
  0xa0   : > { %4630 = vrot.lane.b32.xlu0 %v9434_v43, %s5622_s21  ;;  %4645 = vrot.lane.b32.xlu1 %v9435_v2, %s5623_s26 }
  0xa2   : > { %v6260_v38 = vpop.permute.xlu0 %4370 }
  0xa4   : > { %4640 = vrot.lane.b32.xlu0 %v5989_v39, %s5623_s26  ;;  %4655 = vrot.lane.b32.xlu1 %v6118_v34, %s5624_s29  ;;  %v6269_v12 = vpop.permute.xlu1 %4385 }
  0xa8   : > { %4650 = vrot.lane.b32.xlu0 %v6100_v58, %s5624_s29  ;;  %4665 = vrot.lane.b32.xlu1 %v9424_v9, %s5625_s30  ;;  %v6275_v28 = vpop.permute.xlu0 %4380 }
  0xab   : > { %v6281_v39 = vpop.permute.xlu1 %4395 }
  0xac   : > { %4660 = vrot.lane.b32.xlu0 %v5715_v45, %s5625_s30  ;;  %4675 = vrot.lane.b32.xlu1 %v5983_v31, %s5626_s4 }
  0xaf   : > { %v6283_v34 = vpop.permute.xlu0 %4390 }
  0xb0   : > { %9436 = vst [vmem:[#allocation4_spill] sm:$0xff] %v6283_v34  ;;  %4670 = vrot.lane.b32.xlu0 %v9435_v2, %s5626_s4  ;;  %4685 = vrot.lane.b32.xlu1 %v6010_v62, %s5623_s26 }
  0xb1   : > { %v6289_v9 = vpop.permute.xlu1 %4405 }
  0xb2   : > { %9437 = vst [vmem:[#allocation2_spill] sm:$0xff] %v6289_v9 }
  0xb4   : > { %4680 = vrot.lane.b32.xlu0 %v5983_v31, %s5623_s26  ;;  %4695 = vrot.lane.b32.xlu1 %v6129_v36, %s5624_s29 }
  0xb5   : > { %v6295_v45 = vpop.permute.xlu0 %4400  ;;  %v6297_v58 = vpop.permute.xlu1 %4415 }
  0xb6   : > { %9438 = vst [vmem:[#allocation9_spill] sm:$0xff] %v6295_v45 }
  0xb8   : > { %4690 = vrot.lane.b32.xlu0 %v6110_v49, %s5624_s29  ;;  %4705 = vrot.lane.b32.xlu1 %v9426_v59, %s5625_s30 }
  0xba   : > { %v6303_v2 = vpop.permute.xlu0 %4410  ;;  %v6305_v11 = vpop.permute.xlu1 %4425 }
  0xbb   : > { %9439 = vst [vmem:[#allocation12_spill] sm:$0xff] %v6303_v2 }
  0xbc   : > { %4700 = vrot.lane.b32.xlu0 %v9423_v21, %s5625_s30  ;;  %4715 = vrot.lane.b32.xlu1 %v6005_v0, %s5626_s4 }
  0xbe   : > { %v6311_v31 = vpop.permute.xlu0 %4420  ;;  %v6313_v36 = vpop.permute.xlu1 %4435 }
  0xc0   : > { %4710 = vrot.lane.b32.xlu0 %v6010_v62, %s5626_s4  ;;  %4725 = vrot.lane.b32.xlu1 %v6032_v61, %s5623_s26 }
  0xc2   : > { %v6319_v59 = vpop.permute.xlu0 %4430  ;;  %v6321_v49 = vpop.permute.xlu1 %4445 }
  0xc4   : > { %4720 = vrot.lane.b32.xlu0 %v6005_v0, %s5623_s26  ;;  %4735 = vrot.lane.b32.xlu1 %v6145_v17, %s5624_s29 }
  0xc6   : > { %v6327_v21 = vpop.permute.xlu0 %4440  ;;  %v6329_v9 = vpop.permute.xlu1 %4455 }
  0xc8   : > { %4730 = vrot.lane.b32.xlu0 %v6125_v46, %s5624_s29  ;;  %4745 = vrot.lane.b32.xlu1 %v9428_v35, %s5625_s30 }
  0xca   : > { %v6335_v62 = vpop.permute.xlu0 %4450  ;;  %v6337_v2 = vpop.permute.xlu1 %4465 }
  0xcb   : > { %9440 = vst [vmem:[#allocation15_spill] sm:$0xff] %v6337_v2 }
  0xcc   : > { %4740 = vrot.lane.b32.xlu0 %v9425_v24, %s5625_s30  ;;  %4755 = vrot.lane.b32.xlu1 %v6015_v60, %s5626_s4 }
  0xce   : > { %v6343_v0 = vpop.permute.xlu0 %4460  ;;  %v6345_v17 = vpop.permute.xlu1 %4475 }
  0xcf   : > { %9441 = vst [vmem:[#allocation18_spill] sm:$0xff] %v6343_v0  ;;  %9442 = vst [vmem:[#allocation21_spill] sm:$0xff] %v6345_v17 }
  0xd0   : > { %4750 = vrot.lane.b32.xlu0 %v6032_v61, %s5626_s4  ;;  %4765 = vrot.lane.b32.xlu1 %v6053_v37, %s5623_s26 }
  0xd2   : > { %v6351_v46 = vpop.permute.xlu0 %4470  ;;  %v6353_v35 = vpop.permute.xlu1 %4485 }
  0xd3   : > { %9443 = vst [vmem:[#allocation24_spill] sm:$0xff] %v6351_v46  ;;  %9444 = vst [vmem:[#allocation27_spill] sm:$0xff] %v6353_v35 }
  0xd4   : > { %4760 = vrot.lane.b32.xlu0 %v6015_v60, %s5623_s26  ;;  %4775 = vrot.lane.b32.xlu1 %v6159_v8, %s5624_s29 }
  0xd6   : > { %v6359_v24 = vpop.permute.xlu0 %4480  ;;  %v6361_v45 = vpop.permute.xlu1 %4495 }
  0xd7   : > { %9445 = vst [vmem:[#allocation30_spill] sm:$0xff] %v6359_v24 }
  0xd8   : > { %4770 = vrot.lane.b32.xlu0 %v6137_v7, %s5624_s29  ;;  %4785 = vrot.lane.b32.xlu1 %v9430_v1, %s5625_s30 }
  0xda   : > { %v6367_v61 = vpop.permute.xlu0 %4490  ;;  %v6369_v46 = vpop.permute.xlu1 %4505 }
  0xdc   : > { %4780 = vrot.lane.b32.xlu0 %v9427_v16, %s5625_s30  ;;  %4795 = vrot.lane.b32.xlu1 %v6044_v57, %s5626_s4 }
  0xde   : > { %v6375_v60 = vpop.permute.xlu0 %4500  ;;  %v6377_v8 = vpop.permute.xlu1 %4515 }
  0xe0   : > { %4790 = vrot.lane.b32.xlu0 %v6053_v37, %s5626_s4  ;;  %4805 = vrot.lane.b32.xlu1 %v6071_v18, %s5623_s26 }
  0xe2   : > { %v6383_v7 = vpop.permute.xlu0 %4510  ;;  %v6385_v1 = vpop.permute.xlu1 %4525 }
  0xe4   : > { %4800 = vrot.lane.b32.xlu0 %v6044_v57, %s5623_s26  ;;  %4815 = vrot.lane.b32.xlu1 %v6171_v51, %s5624_s29 }
  0xe6   : > { %v6391_v16 = vpop.permute.xlu0 %4520  ;;  %v6393_v24 = vpop.permute.xlu1 %4535 }
  0xe8   : > { %4810 = vrot.lane.b32.xlu0 %v6149_v25, %s5624_s29  ;;  %4825 = vrot.lane.b32.xlu1 %v9432_v27, %s5625_s30 }
  0xea   : > { %v6399_v37 = vpop.permute.xlu0 %4530  ;;  %v6401_v35 = vpop.permute.xlu1 %4545 }
  0xeb   : > { %9446 = vst [vmem:[#allocation33_spill] sm:$0xff] %v6401_v35  ;;  %v4342_v35 = vunpack.i.l.bf16 %v6216_v30 }
  0xec   : > { %4820 = vrot.lane.b32.xlu0 %v9429_v10, %s5625_s30  ;;  %4835 = vrot.lane.b32.xlu1 %v6055_v40, %s5626_s4 }
  0xee   : > { %v6407_v57 = vpop.permute.xlu0 %4540  ;;  %v6409_v51 = vpop.permute.xlu1 %4555 }
  0xef   : > { %9447 = vst [vmem:[#allocation35_spill] sm:$0xff] %v6407_v57  ;;  %9448 = vst [vmem:[#allocation34_spill] sm:$0xff] %v6409_v51  ;;  %v4353_v51 = vunpack.i.h.bf16 %v6209_v47  ;;  %v4343_v57 = vunpack.i.h.bf16 %v6216_v30 }
  0xf0   : > { %4830 = vrot.lane.b32.xlu0 %v6071_v18, %s5626_s4  ;;  %4845 = vrot.lane.b32.xlu1 %v6086_v29, %s5623_s26 }
  0xf2   : > { %v6415_v25 = vpop.permute.xlu0 %4550  ;;  %v6417_v27 = vpop.permute.xlu1 %4565 }
  0xf3   : > { %9449 = vst [vmem:[#allocation38_spill] sm:$0xff] %v6415_v25  ;;  %9450 = vst [vmem:[#allocation39_spill] sm:$0xff] %v6417_v27 }
  0xf4   : > { %4840 = vrot.lane.b32.xlu0 %v6055_v40, %s5623_s26  ;;  %4855 = vrot.lane.b32.xlu1 %v6185_v50, %s5624_s29 }
  0xf6   : > { %v6423_v10 = vpop.permute.xlu0 %4560  ;;  %v6425_v17 = vpop.permute.xlu1 %4575 }
  0xf7   : > { %9451 = vst [vmem:[#allocation40_spill] sm:$0xff] %v6423_v10 }
  0xf8   : > { %4850 = vrot.lane.b32.xlu0 %v6163_v33, %s5624_s29  ;;  %4865 = vrot.lane.b32.xlu1 %v9434_v43, %s5625_s30 }
  0xfa   : > { %v6431_v18 = vpop.permute.xlu0 %4570  ;;  %v6433_v25 = vpop.permute.xlu1 %4585 }
  0xfc   : > { %4860 = vrot.lane.b32.xlu0 %v9431_v6, %s5625_s30  ;;  %4875 = vrot.lane.b32.xlu1 %v6073_v48, %s5626_s4 }
  0xfe   : > { %v6439_v40 = vpop.permute.xlu0 %4580  ;;  %v6441_v50 = vpop.permute.xlu1 %4595 }
 0x100   : > { %4870 = vrot.lane.b32.xlu0 %v6086_v29, %s5626_s4  ;;  %4885 = vrot.lane.b32.xlu1 %v6096_v54, %s5623_s26 }
 0x102   : > { %v6447_v33 = vpop.permute.xlu0 %4590  ;;  %v6449_v43 = vpop.permute.xlu1 %4605 }
 0x104   : > { %4880 = vrot.lane.b32.xlu0 %v6073_v48, %s5623_s26  ;;  %4895 = vrot.lane.b32.xlu1 %v6195_v15, %s5624_s29 }
 0x106   : > { %v6455_v6 = vpop.permute.xlu0 %4600  ;;  %v6457_v10 = vpop.permute.xlu1 %4615 }
 0x107   : > { %9452 = vst [vmem:[#allocation41_spill] sm:$0xff] %v6457_v10 }
 0x108   : > { %4890 = vrot.lane.b32.xlu0 %v6175_v41, %s5624_s29  ;;  %4905 = vrot.lane.b32.xlu1 %v5987_v63, %s5625_s30  ;;  %v4352_v41 = vunpack.i.l.bf16 %v6209_v47  ;;  %v6489_v47 = vsel %vm1370_vm4, %v5671_v13, %v4353_v51 }
 0x10a   : > { %v6463_v29 = vpop.permute.xlu0 %4610  ;;  %v6465_v27 = vpop.permute.xlu1 %4625  ;;  %v6493_v30 = vsel %vm1370_vm4, %v5674_v14, %v4352_v41  ;;  %v4418_v14 = vunpack.i.h.bf16 %v6297_v58 }
 0x10b   : > { %9453 = vst [vmem:[#allocation42_spill] sm:$0xff] %v6463_v29  ;;  %9454 = vst [vmem:[#allocation43_spill] sm:$0xff] %v6465_v27 }
 0x10c   : > { %4900 = vrot.lane.b32.xlu0 %v9433_v53, %s5625_s30  ;;  %4915 = vrot.lane.b32.xlu1 %v6092_v56, %s5626_s4  ;;  %v4348_v53 = vunpack.i.h.bf16 %v6230_v32 }
 0x10e   : > { %v6471_v48 = vpop.permute.xlu0 %4620  ;;  %v6473_v15 = vpop.permute.xlu1 %4635  ;;  %v1374_v13 = vsel %vm1370_vm4, %v5730_v55, %v4348_v53  ;;  %v4497_v55 = vunpack.i.l.bf16 %v6361_v45  ;;  %v4493_v53 = vunpack.i.h.bf16 %v6367_v61 }
 0x10f   : > { %9455 = vst [vmem:[#allocation44_spill] sm:$0xff] %v6471_v48  ;;  %9456 = vst [vmem:[#allocation45_spill] sm:$0xff] %v6473_v15  ;;  %v4347_v48 = vunpack.i.l.bf16 %v6230_v32  ;;  %v1371_v32 = vsel %vm1370_vm4, %v5688_v23, %v4342_v35 }
 0x110   : > { %4910 = vrot.lane.b32.xlu0 %v6096_v54, %s5626_s4  ;;  %4925 = vrot.lane.b32.xlu1 %v6220_v44, %s5622_s21  ;;  %v1372_v54 = vsel %vm1370_vm4, %v5685_v22, %v4343_v57  ;;  %v4417_v22 = vunpack.i.l.bf16 %v6297_v58  ;;  %v4423_v57 = vunpack.i.h.bf16 %v6311_v31  ;;  %v4492_v58 = vunpack.i.l.bf16 %v6367_v61 }
 0x111   : > { %v1373_v23 = vsel %vm1370_vm4, %v5724_v52, %v4347_v48  ;;  %v4578_v52 = vunpack.i.h.bf16 %v6425_v17  ;;  %v4577_v48 = vunpack.i.l.bf16 %v6425_v17 }
 0x112   : > { %v6485_v15 = vpop.permute.xlu0 %4630  ;;  %v4646_v27 = vpop.permute.xlu1 %4645  ;;  %v1405_v0 = vsel %vm1401_vm5, %v1374_v13, %v4423_v57  ;;  %v4572_v57 = vunpack.i.l.bf16 %v6431_v18 }
 0x113   : > { %9457 = vst [vmem:[#allocation46_spill] sm:$0xff] %v6485_v15  ;;  %v4498_v15 = vunpack.i.h.bf16 %v6361_v45  ;;  %v6529_v45 = vsel %vm1401_vm5, %v1372_v54, %v4418_v14  ;;  %v4648_v17 = vunpack.i.h.bf16 %v4646_v27  ;;  %v4647_v35 = vunpack.i.l.bf16 %v4646_v27 }
 0x114   : > { %4920 = vrot.lane.b32.xlu0 %v5987_v63, %s5622_s21  ;;  %4935 = vrot.lane.b32.xlu1 %v6232_v19, %s5623_s26  ;;  %v4422_v63 = vunpack.i.l.bf16 %v6311_v31  ;;  %v6526_v31 = vsel %vm1401_vm5, %v1371_v32, %v4417_v22  ;;  %v1434_v32 = vsel %vm1432_vm6, %v6529_v45, %v4493_v53  ;;  %v4573_v27 = vunpack.i.h.bf16 %v6431_v18 }
 0x115   : > { %v1433_v54 = vsel %vm1432_vm6, %v6526_v31, %v4492_v58 }
 0x116   : > { %v4641_v51 = vpop.permute.xlu0 %4640  ;;  %v4656_v41 = vpop.permute.xlu1 %4655  ;;  %v1404_v61 = vsel %vm1401_vm5, %v1373_v23, %v4422_v63 }
 0x117   : > { %v1435_v29 = vsel %vm1432_vm6, %v1404_v61, %v4497_v55  ;;  %v4658_v23 = vunpack.i.h.bf16 %v4656_v41  ;;  %v4657_v13 = vunpack.i.l.bf16 %v4656_v41  ;;  %v4643_v53 = vunpack.i.h.bf16 %v4641_v51 }
 0x118   : > { %4930 = vrot.lane.b32.xlu0 %v6092_v56, %s5623_s26  ;;  %4945 = vrot.lane.b32.xlu1 %v6220_v44, %s5625_s30  ;;  %v1436_v44 = vsel %vm1432_vm6, %v1405_v0, %v4498_v15  ;;  %v1468_v14 = vsel %vm1465_vm7, %v1435_v29, %v4577_v48  ;;  %v4642_v58 = vunpack.i.l.bf16 %v4641_v51 }
 0x119   : > { %v1469_v22 = vsel %vm1465_vm7, %v1436_v44, %v4578_v52  ;;  %v1501_v63 = vsel %vm1498_vm8, %v1468_v14, %v4647_v35  ;;  %v1466_v35 = vsel %vm1465_vm7, %v1433_v54, %v4572_v57 }
 0x11a   : > { %v4651_v2 = vpop.permute.xlu0 %4650  ;;  %v4666_v56 = vpop.permute.xlu1 %4665  ;;  %v1502_v55 = vsel %vm1498_vm8, %v1469_v22, %v4648_v17  ;;  %v1467_v17 = vsel %vm1465_vm7, %v1434_v32, %v4573_v27  ;;  %v4363_v27 = vunpack.i.h.bf16 %v6247_v20 }
 0x11b   : > { %v4668_v0 = vunpack.i.h.bf16 %v4666_v56  ;;  %v4667_v15 = vunpack.i.l.bf16 %v4666_v56  ;;  %v4653_v52 = vunpack.i.h.bf16 %v4651_v2  ;;  %v4652_v61 = vunpack.i.l.bf16 %v4651_v2 }
 0x11c   : > { %4940 = vrot.lane.b32.xlu0 %v6187_v3, %s5624_s29  ;;  %v1534_v3 = vsel %vm1531_vm9, %v1501_v63, %v4657_v13  ;;  %v1535_v34 = vsel %vm1531_vm9, %v1502_v55, %v4658_v23  ;;  %v1499_v2 = vsel %vm1498_vm8, %v1466_v35, %v4642_v58  ;;  %v1500_v14 = vsel %vm1498_vm8, %v1467_v17, %v4643_v53 }
 0x11d   : > { %v1567_v51 = vsel %vm1564_vm10, %v1534_v3, %v4667_v15  ;;  %v1568_v56 = vsel %vm1564_vm10, %v1535_v34, %v4668_v0  ;;  %v1532_v54 = vsel %vm1531_vm9, %v1499_v2, %v4652_v61  ;;  %v1533_v32 = vsel %vm1531_vm9, %v1500_v14, %v4653_v52 }
 0x11e   : > { %v4661_v29 = vpop.permute.xlu0 %4660  ;;  %v4676_v48 = vpop.permute.xlu1 %4675  ;;  %v4362_v34 = vunpack.i.l.bf16 %v6247_v20  ;;  %v4428_v52 = vunpack.i.h.bf16 %v6305_v11  ;;  %v4427_v20 = vunpack.i.l.bf16 %v6305_v11  ;;  %v4507_v3 = vunpack.i.l.bf16 %v6369_v46  ;;  %v9462_v11 = vld [vmem:[#allocation6_spill] sm:$0xff] }
 0x11f   : > { %v4678_v41 = vunpack.i.h.bf16 %v4676_v48  ;;  %v4677_v44 = vunpack.i.l.bf16 %v4676_v48  ;;  %v4663_v10 = vunpack.i.h.bf16 %v4661_v29  ;;  %v4662_v18 = vunpack.i.l.bf16 %v4661_v29 }
 0x120   : > { %4950 = vrot.lane.b32.xlu0 %v6232_v19, %s5626_s4  ;;  %v9458_v29 = vunpack.i.h.bf16 %v6226_v26  ;;  %v4502_v35 = vunpack.i.l.bf16 %v6375_v60  ;;  %v9459_v17 = vunpack.i.l.bf16 %v6226_v26  ;;  %v4588_v14 = vunpack.i.h.bf16 %v6433_v25 }
 0x121   : > { %v1600_v22 = vsel %vm1597_vm11, %v1567_v51, %v4677_v44  ;;  %v1601_v23 = vsel %vm1597_vm11, %v1568_v56, %v4678_v41  ;;  %v1565_v57 = vsel %vm1564_vm10, %v1532_v54, %v4662_v18  ;;  %v1566_v0 = vsel %vm1564_vm10, %v1533_v32, %v4663_v10  ;;  %v9460_v51 = vld [vmem:[#allocation3_spill] sm:$0xff] }
 0x122   : > { %v4671_v13 = vpop.permute.xlu0 %4670  ;;  %v4686_v63 = vpop.permute.xlu1 %4685  ;;  %v1631_v58 = vpack.c.bf16 %v1601_v23, %v1600_v22  ;;  %v6571_v48 = vsel %vm1370_vm4, %v5712_v42, %v9458_v29  ;;  %v4508_v10 = vunpack.i.h.bf16 %v6369_v46  ;;  %v4503_v18 = vunpack.i.h.bf16 %v6375_v60  ;;  %v9464_v22 = vld [vmem:[#allocation5_spill] sm:$0xff]  ;;  %v9465_v23 = vld [vmem:[#allocation8_spill] sm:$0xff] }
 0x123   : > { %v4673_v55 = vunpack.i.h.bf16 %v4671_v13  ;;  %v4672_v19 = vunpack.i.l.bf16 %v4671_v13  ;;  %v6583_v42 = vsel %vm1370_vm4, %v9460_v51, %v9459_v17  ;;  %v9461_v56 = vunpack.i.h.bf16 %v6238_v4 }
 0x124   : > { %v4587_v46 = vunpack.i.l.bf16 %v6433_v25  ;;  %v9463_v60 = vunpack.i.l.bf16 %v6238_v4  ;;  %v6602_v13 = vsel %vm1370_vm4, %v9465_v23, %v4363_v27  ;;  %v4378_v54 = vunpack.i.h.bf16 %v6258_v5 }
 0x125   : > { %v1598_v15 = vsel %vm1597_vm11, %v1565_v57, %v4672_v19  ;;  %v1599_v53 = vsel %vm1597_vm11, %v1566_v0, %v4673_v55  ;;  %v6589_v2 = vsel %vm1370_vm4, %v9462_v11, %v9461_v56  ;;  %v9466_v55 = vld [vmem:[#allocation7_spill] sm:$0xff]  ;;  %v1407_v25 = vsel %vm1401_vm5, %v6489_v47, %v4428_v52 }
 0x126   : > { %v4681_v61 = vpop.permute.xlu0 %4680  ;;  %v1630_v41 = vpack.c.bf16 %v1599_v53, %v1598_v15  ;;  %v4696_v44 = vpop.permute.xlu1 %4695  ;;  %v6598_v26 = vsel %vm1370_vm4, %v9464_v22, %v9463_v60  ;;  %v6606_v19 = vsel %vm1370_vm4, %v9466_v55, %v4362_v34  ;;  %v1406_v4 = vsel %vm1401_vm5, %v6493_v30, %v4427_v20 }
 0x127   : > { %v4688_v32 = vunpack.i.h.bf16 %v4686_v63  ;;  %v4687_v57 = vunpack.i.l.bf16 %v4686_v63  ;;  %v1439_v27 = vsel %vm1432_vm6, %v1406_v4, %v4507_v3  ;;  %v1440_v53 = vsel %vm1432_vm6, %v1407_v25, %v4508_v10 }
 0x128   : > { %4251 = vmatprep.mubr.msk.bf16.mxu0 %vm1661_vm12, %v1630_v41  ;;  %v1438_v34 = vsel %vm1432_vm6, %v6529_v45, %v4503_v18  ;;  %v1473_v29 = vsel %vm1465_vm7, %v1440_v53, %v4588_v14  ;;  %v1472_v47 = vsel %vm1465_vm7, %v1439_v27, %v4587_v46  ;;  %v4698_v52 = vunpack.i.h.bf16 %v4696_v44 }
 0x129   : > { %4252 = vmatmul.mubr.msk.bf16.vlgmr.msra.gmra.mxu0 %vm1661_vm12, %v1631_v58  ;;  %v1437_v58 = vsel %vm1432_vm6, %v6526_v31, %v4502_v35  ;;  %v4697_v30 = vunpack.i.l.bf16 %v4696_v44  ;;  %v4583_v63 = vunpack.i.h.bf16 %v6439_v40  ;;  %v4582_v20 = vunpack.i.l.bf16 %v6439_v40 }
 0x12a   : > { %v4691_v0 = vpop.permute.xlu0 %4690  ;;  %v4706_v15 = vpop.permute.xlu1 %4705  ;;  %v1505_v10 = vsel %vm1498_vm8, %v1472_v47, %v4687_v57  ;;  %v1506_v17 = vsel %vm1498_vm8, %v1473_v29, %v4688_v32  ;;  %v4683_v45 = vunpack.i.h.bf16 %v4681_v61  ;;  %v4682_v18 = vunpack.i.l.bf16 %v4681_v61 }
 0x12b   : > { %v4708_v41 = vunpack.i.h.bf16 %v4706_v15  ;;  %v4707_v3 = vunpack.i.l.bf16 %v4706_v15  ;;  %v4693_v35 = vunpack.i.h.bf16 %v4691_v0  ;;  %v4692_v56 = vunpack.i.l.bf16 %v4691_v0 }
 0x12c   : > { %v1538_v44 = vsel %vm1531_vm9, %v1505_v10, %v4697_v30  ;;  %v1539_v46 = vsel %vm1531_vm9, %v1506_v17, %v4698_v52  ;;  %v1470_v22 = vsel %vm1465_vm7, %v1437_v58, %v4582_v20  ;;  %v1471_v23 = vsel %vm1465_vm7, %v1438_v34, %v4583_v63  ;;  %v9467_v10 = vld [vmem:[#allocation11_spill] sm:$0xff] }
 0x12d   : > { %v1571_v55 = vsel %vm1564_vm10, %v1538_v44, %v4707_v3  ;;  %v1572_v61 = vsel %vm1564_vm10, %v1539_v46, %v4708_v41  ;;  %v1503_v25 = vsel %vm1498_vm8, %v1470_v22, %v4682_v18  ;;  %v1504_v4 = vsel %vm1498_vm8, %v1471_v23, %v4683_v45 }
 0x12e   : > { %v4701_v51 = vpop.permute.xlu0 %4700  ;;  %v4716_v31 = vpop.permute.xlu1 %4715  ;;  %v1536_v27 = vsel %vm1531_vm9, %v1503_v25, %v4692_v56  ;;  %v1537_v53 = vsel %vm1531_vm9, %v1504_v4, %v4693_v35  ;;  %v4377_v29 = vunpack.i.l.bf16 %v6258_v5  ;;  %v4438_v47 = vunpack.i.h.bf16 %v6313_v36 }
 0x12f   : > { %v4718_v11 = vunpack.i.h.bf16 %v4716_v31  ;;  %v4717_v14 = vunpack.i.l.bf16 %v4716_v31  ;;  %v4703_v60 = vunpack.i.h.bf16 %v4701_v51  ;;  %v4702_v40 = vunpack.i.l.bf16 %v4701_v51 }
 0x130   : > { %v4437_v63 = vunpack.i.l.bf16 %v6313_v36  ;;  %v6647_v17 = vsel %vm1370_vm4, %v9467_v10, %v4378_v54  ;;  %v4433_v45 = vunpack.i.h.bf16 %v6319_v59  ;;  %v4432_v5 = vunpack.i.l.bf16 %v6319_v59 }
 0x131   : > { %v1604_v32 = vsel %vm1597_vm11, %v1571_v55, %v4717_v14  ;;  %v1605_v57 = vsel %vm1597_vm11, %v1572_v61, %v4718_v11  ;;  %v1569_v52 = vsel %vm1564_vm10, %v1536_v27, %v4702_v40  ;;  %v1570_v30 = vsel %vm1564_vm10, %v1537_v53, %v4703_v60  ;;  %v9468_v14 = vld [vmem:[#allocation10_spill] sm:$0xff] }
 0x132   : > { %v4711_v0 = vpop.permute.xlu0 %4710  ;;  %v4726_v15 = vpop.permute.xlu1 %4725  ;;  %v1633_v3 = vpack.c.bf16 %v1605_v57, %v1604_v32  ;;  %v4518_v35 = vunpack.i.h.bf16 %v6377_v8  ;;  %v4517_v36 = vunpack.i.l.bf16 %v6377_v8  ;;  %v4513_v56 = vunpack.i.h.bf16 %v6383_v7 }
 0x133   : > { %v4713_v58 = vunpack.i.h.bf16 %v4711_v0  ;;  %v4712_v34 = vunpack.i.l.bf16 %v4711_v0  ;;  %v4512_v11 = vunpack.i.l.bf16 %v6383_v7  ;;  %v6657_v44 = vsel %vm1370_vm4, %v9468_v14, %v4377_v29 }
 0x134   : > { %v4373_v54 = vunpack.i.h.bf16 %v6260_v38  ;;  %v4598_v46 = vunpack.i.h.bf16 %v6441_v50  ;;  %v4597_v59 = vunpack.i.l.bf16 %v6441_v50  ;;  %v4372_v60 = vunpack.i.l.bf16 %v6260_v38 }
 0x135   : > { %v1602_v20 = vsel %vm1597_vm11, %v1569_v52, %v4712_v34  ;;  %v1603_v41 = vsel %vm1597_vm11, %v1570_v30, %v4713_v58  ;;  %v4388_v8 = vunpack.i.h.bf16 %v6269_v12  ;;  %v1410_v40 = vsel %vm1401_vm5, %v6606_v19, %v4437_v63 }
 0x136   : > { %v4721_v18 = vpop.permute.xlu0 %4720  ;;  %v1632_v51 = vpack.c.bf16 %v1603_v41, %v1602_v20  ;;  %v4736_v31 = vpop.permute.xlu1 %4735  ;;  %v1411_v7 = vsel %vm1401_vm5, %v6602_v13, %v4438_v47  ;;  %v1409_v22 = vsel %vm1401_vm5, %v6571_v48, %v4433_v45  ;;  %v1408_v50 = vsel %vm1401_vm5, %v6583_v42, %v4432_v5 }
 0x137   : > { %v4728_v23 = vunpack.i.h.bf16 %v4726_v15  ;;  %v4727_v55 = vunpack.i.l.bf16 %v4726_v15  ;;  %v1443_v4 = vsel %vm1432_vm6, %v1410_v40, %v4517_v36  ;;  %v1444_v32 = vsel %vm1432_vm6, %v1411_v7, %v4518_v35 }
 0x138   : > { %4255 = vmatprep.mubr.msk.bf16.mxu0 %vm1661_vm12, %v1632_v51  ;;  %v1441_v19 = vsel %vm1432_vm6, %v1408_v50, %v4512_v11  ;;  %v1442_v13 = vsel %vm1432_vm6, %v1409_v22, %v4513_v56  ;;  %v1476_v57 = vsel %vm1465_vm7, %v1443_v4, %v4597_v59  ;;  %v1477_v0 = vsel %vm1465_vm7, %v1444_v32, %v4598_v46 }
 0x139   : > { %4256 = vmatmul.mubr.msk.bf16.gmra.mxu0 %vm1661_vm12, %v1633_v3  ;;  %v4738_v48 = vunpack.i.h.bf16 %v4736_v31  ;;  %v4737_v27 = vunpack.i.l.bf16 %v4736_v31  ;;  %v4593_v42 = vunpack.i.h.bf16 %v6447_v33  ;;  %v4592_v15 = vunpack.i.l.bf16 %v6447_v33 }
 0x13a   : > { %v4731_v61 = vpop.permute.xlu0 %4730  ;;  %v4746_v25 = vpop.permute.xlu1 %4745  ;;  %v1509_v34 = vsel %vm1498_vm8, %v1476_v57, %v4727_v55  ;;  %v1510_v29 = vsel %vm1498_vm8, %v1477_v0, %v4728_v23  ;;  %v4723_v47 = vunpack.i.h.bf16 %v4721_v18  ;;  %v4722_v52 = vunpack.i.l.bf16 %v4721_v18  ;;  %v9469_v0 = vld [vmem:[#allocation14_spill] sm:$0xff] }
 0x13b   : > { %v4748_v53 = vunpack.i.h.bf16 %v4746_v25  ;;  %v4747_v58 = vunpack.i.l.bf16 %v4746_v25  ;;  %v4733_v20 = vunpack.i.h.bf16 %v4731_v61  ;;  %v4732_v41 = vunpack.i.l.bf16 %v4731_v61 }
 0x13c   : > { %v1542_v45 = vsel %vm1531_vm9, %v1509_v34, %v4737_v27  ;;  %v1543_v5 = vsel %vm1531_vm9, %v1510_v29, %v4738_v48  ;;  %v1474_v31 = vsel %vm1465_vm7, %v1441_v19, %v4592_v15  ;;  %v1475_v35 = vsel %vm1465_vm7, %v1442_v13, %v4593_v42 }
 0x13d   : > { %v1575_v36 = vsel %vm1564_vm10, %v1542_v45, %v4747_v58  ;;  %v1576_v18 = vsel %vm1564_vm10, %v1543_v5, %v4748_v53  ;;  %v1507_v56 = vsel %vm1498_vm8, %v1474_v31, %v4722_v52  ;;  %v1508_v11 = vsel %vm1498_vm8, %v1475_v35, %v4723_v47  ;;  %v9470_v52 = vld [vmem:[#allocation13_spill] sm:$0xff] }
 0x13e   : > { %v4741_v30 = vpop.permute.xlu0 %4740  ;;  %v4756_v63 = vpop.permute.xlu1 %4755  ;;  %v1540_v7 = vsel %vm1531_vm9, %v1507_v56, %v4732_v41  ;;  %v1541_v22 = vsel %vm1531_vm9, %v1508_v11, %v4733_v20  ;;  %v4387_v55 = vunpack.i.l.bf16 %v6269_v12  ;;  %v4448_v61 = vunpack.i.h.bf16 %v6321_v49 }
 0x13f   : > { %v4758_v3 = vunpack.i.h.bf16 %v4756_v63  ;;  %v4757_v10 = vunpack.i.l.bf16 %v4756_v63  ;;  %v4743_v51 = vunpack.i.h.bf16 %v4741_v30  ;;  %v4742_v33 = vunpack.i.l.bf16 %v4741_v30  ;;  %v9471_v30 = vld [vmem:[#allocation17_spill] sm:$0xff] }
 0x140   : > { %v4447_v32 = vunpack.i.l.bf16 %v6321_v49  ;;  %v1384_v48 = vsel %vm1370_vm4, %v9469_v0, %v4373_v54  ;;  %v4443_v27 = vunpack.i.h.bf16 %v6327_v21  ;;  %v4442_v42 = vunpack.i.l.bf16 %v6327_v21 }
 0x141   : > { %v1608_v14 = vsel %vm1597_vm11, %v1575_v36, %v4757_v10  ;;  %v1609_v46 = vsel %vm1597_vm11, %v1576_v18, %v4758_v3  ;;  %v1573_v25 = vsel %vm1564_vm10, %v1540_v7, %v4742_v33  ;;  %v1574_v4 = vsel %vm1564_vm10, %v1541_v22, %v4743_v51 }
 0x142   : > { %v4751_v59 = vpop.permute.xlu0 %4750  ;;  %v4766_v40 = vpop.permute.xlu1 %4765  ;;  %v1635_v57 = vpack.c.bf16 %v1609_v46, %v1608_v14  ;;  %v4528_v34 = vunpack.i.h.bf16 %v6385_v1  ;;  %v4527_v49 = vunpack.i.l.bf16 %v6385_v1  ;;  %v4523_v29 = vunpack.i.h.bf16 %v6391_v16  ;;  %v9472_v1 = vld [vmem:[#allocation16_spill] sm:$0xff] }
 0x143   : > { %v4753_v50 = vunpack.i.h.bf16 %v4751_v59  ;;  %v4752_v23 = vunpack.i.l.bf16 %v4751_v59  ;;  %v4522_v47 = vunpack.i.l.bf16 %v6391_v16  ;;  %v1383_v54 = vsel %vm1370_vm4, %v9470_v52, %v4372_v60 }
 0x144   : > { %v6721_v21 = vsel %vm1370_vm4, %v9471_v30, %v4388_v8  ;;  %v4608_v63 = vunpack.i.h.bf16 %v6449_v43  ;;  %v4607_v20 = vunpack.i.l.bf16 %v6449_v43  ;;  %v6728_v16 = vsel %vm1370_vm4, %v9472_v1, %v4387_v55 }
 0x145   : > { %v1606_v19 = vsel %vm1597_vm11, %v1573_v25, %v4752_v23  ;;  %v1607_v13 = vsel %vm1597_vm11, %v1574_v4, %v4753_v50  ;;  %v4383_v38 = vunpack.i.h.bf16 %v6275_v28  ;;  %v1414_v60 = vsel %vm1401_vm5, %v1383_v54, %v4447_v32 }
 0x146   : > { %v4761_v15 = vpop.permute.xlu0 %4760  ;;  %v1634_v53 = vpack.c.bf16 %v1607_v13, %v1606_v19  ;;  %v4776_v58 = vpop.permute.xlu1 %4775  ;;  %v1415_v12 = vsel %vm1401_vm5, %v1384_v48, %v4448_v61  ;;  %v1413_v8 = vsel %vm1401_vm5, %v6589_v2, %v4443_v27  ;;  %v1412_v43 = vsel %vm1401_vm5, %v6598_v26, %v4442_v42 }
 0x147   : > { %v4768_v41 = vunpack.i.h.bf16 %v4766_v40  ;;  %v4767_v3 = vunpack.i.l.bf16 %v4766_v40  ;;  %v1447_v5 = vsel %vm1432_vm6, %v1414_v60, %v4527_v49  ;;  %v1448_v51 = vsel %vm1432_vm6, %v1415_v12, %v4528_v34 }
 0x148   : > { %4259 = vmatprep.mubr.msk.bf16.mxu0 %vm1661_vm12, %v1634_v53  ;;  %v1445_v33 = vsel %vm1432_vm6, %v1412_v43, %v4522_v47  ;;  %v1446_v31 = vsel %vm1432_vm6, %v1413_v8, %v4523_v29  ;;  %v1480_v35 = vsel %vm1465_vm7, %v1447_v5, %v4607_v20  ;;  %v1481_v36 = vsel %vm1465_vm7, %v1448_v51, %v4608_v63  ;;  %v9473_v43 = vld [vmem:[#allocation20_spill] sm:$0xff] }
 0x149   : > { %4260 = vmatmul.mubr.msk.bf16.gmra.mxu0 %vm1661_vm12, %v1635_v57  ;;  %v4778_v2 = vunpack.i.h.bf16 %v4776_v58  ;;  %v4777_v18 = vunpack.i.l.bf16 %v4776_v58  ;;  %v4603_v26 = vunpack.i.h.bf16 %v6455_v6  ;;  %v4602_v56 = vunpack.i.l.bf16 %v6455_v6 }
 0x14a   : > { %v4771_v10 = vpop.permute.xlu0 %4770  ;;  %v4786_v45 = vpop.permute.xlu1 %4785  ;;  %v1513_v46 = vsel %vm1498_vm8, %v1480_v35, %v4767_v3  ;;  %v1514_v59 = vsel %vm1498_vm8, %v1481_v36, %v4768_v41  ;;  %v4763_v40 = vunpack.i.h.bf16 %v4761_v15  ;;  %v4762_v7 = vunpack.i.l.bf16 %v4761_v15  ;;  %v9474_v35 = vld [vmem:[#allocation19_spill] sm:$0xff] }
 0x14b   : > { %v4788_v11 = vunpack.i.h.bf16 %v4786_v45  ;;  %v4787_v14 = vunpack.i.l.bf16 %v4786_v45  ;;  %v4773_v23 = vunpack.i.h.bf16 %v4771_v10  ;;  %v4772_v55 = vunpack.i.l.bf16 %v4771_v10 }
 0x14c   : > { %v1546_v4 = vsel %vm1531_vm9, %v1513_v46, %v4777_v18  ;;  %v1547_v32 = vsel %vm1531_vm9, %v1514_v59, %v4778_v2  ;;  %v1478_v13 = vsel %vm1465_vm7, %v1445_v33, %v4602_v56  ;;  %v1479_v57 = vsel %vm1465_vm7, %v1446_v31, %v4603_v26  ;;  %v9475_v2 = vld [vmem:[#allocation41_spill] sm:$0xff]  ;;  %v9476_v56 = vld [vmem:[#allocation4_spill] sm:$0xff] }
 0x14d   : > { %v1579_v0 = vsel %vm1564_vm10, %v1546_v4, %v4787_v14  ;;  %v1580_v48 = vsel %vm1564_vm10, %v1547_v32, %v4788_v11  ;;  %v1511_v27 = vsel %vm1498_vm8, %v1478_v13, %v4762_v7  ;;  %v1512_v42 = vsel %vm1498_vm8, %v1479_v57, %v4763_v40 }
 0x14e   : > { %v4781_v22 = vpop.permute.xlu0 %4780  ;;  %v4796_v50 = vpop.permute.xlu1 %4795  ;;  %v1544_v49 = vsel %vm1531_vm9, %v1511_v27, %v4772_v55  ;;  %v1545_v29 = vsel %vm1531_vm9, %v1512_v42, %v4773_v23  ;;  %v4382_v54 = vunpack.i.l.bf16 %v6275_v28  ;;  %v4458_v30 = vunpack.i.h.bf16 %v6329_v9 }
 0x14f   : > { %v4798_v61 = vunpack.i.h.bf16 %v4796_v50  ;;  %v4797_v25 = vunpack.i.l.bf16 %v4796_v50  ;;  %v4783_v19 = vunpack.i.h.bf16 %v4781_v22  ;;  %v4782_v6 = vunpack.i.l.bf16 %v4781_v22 }
 0x150   : > { %v4457_v1 = vunpack.i.l.bf16 %v6329_v9  ;;  %v1388_v41 = vsel %vm1370_vm4, %v9473_v43, %v4383_v38  ;;  %v4453_v3 = vunpack.i.h.bf16 %v6335_v62  ;;  %v4452_v28 = vunpack.i.l.bf16 %v6335_v62 }
 0x151   : > { %v1612_v15 = vsel %vm1597_vm11, %v1579_v0, %v4797_v25  ;;  %v1613_v53 = vsel %vm1597_vm11, %v1580_v48, %v4798_v61  ;;  %v1577_v63 = vsel %vm1564_vm10, %v1544_v49, %v4782_v6  ;;  %v1578_v20 = vsel %vm1564_vm10, %v1545_v29, %v4783_v19  ;;  %v9477_v19 = vld [vmem:[#allocation42_spill] sm:$0xff] }
 0x152   : > { %v4791_v58 = vpop.permute.xlu0 %4790  ;;  %v4806_v34 = vpop.permute.xlu1 %4805  ;;  %v1637_v8 = vpack.c.bf16 %v1613_v53, %v1612_v15  ;;  %v4538_v51 = vunpack.i.h.bf16 %v6393_v24  ;;  %v4537_v33 = vunpack.i.l.bf16 %v6393_v24  ;;  %v4533_v9 = vunpack.i.h.bf16 %v6399_v37 }
 0x153   : > { %v4793_v47 = vunpack.i.h.bf16 %v4791_v58  ;;  %v4792_v52 = vunpack.i.l.bf16 %v4791_v58  ;;  %v4532_v31 = vunpack.i.l.bf16 %v6399_v37  ;;  %v1387_v36 = vsel %vm1370_vm4, %v9474_v35, %v4382_v54 }
 0x154   : > { %v4398_v38 = vunpack.i.h.bf16 %v6281_v39  ;;  %v4618_v18 = vunpack.i.h.bf16 %v9475_v2  ;;  %v4617_v62 = vunpack.i.l.bf16 %v9475_v2  ;;  %v4397_v26 = vunpack.i.l.bf16 %v6281_v39 }
 0x155   : > { %v1610_v60 = vsel %vm1597_vm11, %v1577_v63, %v4792_v52  ;;  %v1611_v12 = vsel %vm1597_vm11, %v1578_v20, %v4793_v47  ;;  %v4393_v11 = vunpack.i.h.bf16 %v9476_v56  ;;  %v1418_v24 = vsel %vm1401_vm5, %v1387_v36, %v4457_v1 }
 0x156   : > { %v4801_v10 = vpop.permute.xlu0 %4800  ;;  %v1636_v45 = vpack.c.bf16 %v1611_v12, %v1610_v60  ;;  %v4816_v5 = vpop.permute.xlu1 %4815  ;;  %v1419_v14 = vsel %vm1401_vm5, %v1388_v41, %v4458_v30  ;;  %v1417_v37 = vsel %vm1401_vm5, %v6647_v17, %v4453_v3  ;;  %v1416_v46 = vsel %vm1401_vm5, %v6657_v44, %v4452_v28 }
 0x157   : > { %v4808_v59 = vunpack.i.h.bf16 %v4806_v34  ;;  %v4807_v40 = vunpack.i.l.bf16 %v4806_v34  ;;  %v1451_v50 = vsel %vm1432_vm6, %v1418_v24, %v4537_v33  ;;  %v1452_v23 = vsel %vm1432_vm6, %v1419_v14, %v4538_v51  ;;  %v9479_v14 = vld [vmem:[#allocation23_spill] sm:$0xff] }
 0x158   : > { %4263 = vmatprep.mubr.msk.bf16.mxu0 %vm1661_vm12, %v1636_v45  ;;  %v1449_v55 = vsel %vm1432_vm6, %v1416_v46, %v4532_v31  ;;  %v1450_v61 = vsel %vm1432_vm6, %v1417_v37, %v4533_v9  ;;  %v1484_v25 = vsel %vm1465_vm7, %v1451_v50, %v4617_v62  ;;  %v1485_v4 = vsel %vm1465_vm7, %v1452_v23, %v4618_v18  ;;  %v9478_v9 = vld [vmem:[#allocation15_spill] sm:$0xff]  ;;  %v9480_v46 = vld [vmem:[#allocation18_spill] sm:$0xff]  ;;  %v9481_v23 = vld [vmem:[#allocation33_spill] sm:$0xff] }
 0x159   : > { %4264 = vmatmul.mubr.msk.bf16.gmra.mxu0 %vm1661_vm12, %v1637_v8  ;;  %v4818_v17 = vunpack.i.h.bf16 %v4816_v5  ;;  %v4817_v32 = vunpack.i.l.bf16 %v4816_v5  ;;  %v4613_v44 = vunpack.i.h.bf16 %v9477_v19  ;;  %v4612_v6 = vunpack.i.l.bf16 %v9477_v19  ;;  %v9484_v19 = vld [vmem:[#allocation25_spill] sm:$0xff] }
 0x15a   : > { %v4811_v7 = vpop.permute.xlu0 %4810  ;;  %v4826_v22 = vpop.permute.xlu1 %4825  ;;  %v1517_v0 = vsel %vm1498_vm8, %v1484_v25, %v4807_v40  ;;  %v1518_v48 = vsel %vm1498_vm8, %v1485_v4, %v4808_v59  ;;  %v4803_v27 = vunpack.i.h.bf16 %v4801_v10  ;;  %v4802_v42 = vunpack.i.l.bf16 %v4801_v10  ;;  %v9482_v25 = vld [vmem:[#allocation35_spill] sm:$0xff] }
 0x15b   : > { %v4828_v13 = vunpack.i.h.bf16 %v4826_v22  ;;  %v4827_v57 = vunpack.i.l.bf16 %v4826_v22  ;;  %v4813_v58 = vunpack.i.h.bf16 %v4811_v7  ;;  %v4812_v34 = vunpack.i.l.bf16 %v4811_v7 }
 0x15c   : > { %v1550_v47 = vsel %vm1531_vm9, %v1517_v0, %v4817_v32  ;;  %v1551_v52 = vsel %vm1531_vm9, %v1518_v48, %v4818_v17  ;;  %v1482_v63 = vsel %vm1465_vm7, %v1449_v55, %v4612_v6  ;;  %v1483_v20 = vsel %vm1465_vm7, %v1450_v61, %v4613_v44  ;;  %v9483_v32 = vld [vmem:[#allocation26_spill] sm:$0xff]  ;;  %v9485_v6 = vld [vmem:[#allocation43_spill] sm:$0xff] }
 0x15d   : > { %v1583_v1 = vsel %vm1564_vm10, %v1550_v47, %v4827_v57  ;;  %v1584_v60 = vsel %vm1564_vm10, %v1551_v52, %v4828_v13  ;;  %v1515_v12 = vsel %vm1498_vm8, %v1482_v63, %v4802_v42  ;;  %v1516_v8 = vsel %vm1498_vm8, %v1483_v20, %v4803_v27  ;;  %v9486_v0 = vld [vmem:[#allocation22_spill] sm:$0xff]  ;;  %v9487_v27 = vld [vmem:[#allocation9_spill] sm:$0xff]  ;;  %v9488_v20 = vld [vmem:[#allocation44_spill] sm:$0xff] }
 0x15e   : > { %v4821_v15 = vpop.permute.xlu0 %4820  ;;  %v4836_v53 = vpop.permute.xlu1 %4835  ;;  %v1548_v10 = vsel %vm1531_vm9, %v1515_v12, %v4812_v34  ;;  %v1549_v45 = vsel %vm1531_vm9, %v1516_v8, %v4813_v58  ;;  %v4392_v33 = vunpack.i.l.bf16 %v9476_v56  ;;  %v4468_v31 = vunpack.i.h.bf16 %v9478_v9 }
 0x15f   : > { %v4838_v49 = vunpack.i.h.bf16 %v4836_v53  ;;  %v4837_v29 = vunpack.i.l.bf16 %v4836_v53  ;;  %v4823_v54 = vunpack.i.h.bf16 %v4821_v15  ;;  %v4822_v30 = vunpack.i.l.bf16 %v4821_v15 }
 0x160   : > { %v4467_v2 = vunpack.i.l.bf16 %v9478_v9  ;;  %v6823_v37 = vsel %vm1370_vm4, %v9479_v14, %v4398_v38  ;;  %v4463_v59 = vunpack.i.h.bf16 %v9480_v46  ;;  %v4462_v40 = vunpack.i.l.bf16 %v9480_v46 }
 0x161   : > { %v1616_v43 = vsel %vm1597_vm11, %v1583_v1, %v4837_v29  ;;  %v1617_v41 = vsel %vm1597_vm11, %v1584_v60, %v4838_v49  ;;  %v1581_v35 = vsel %vm1564_vm10, %v1548_v10, %v4822_v30  ;;  %v1582_v36 = vsel %vm1564_vm10, %v1549_v45, %v4823_v54 }
 0x162   : > { %v4831_v3 = vpop.permute.xlu0 %4830  ;;  %v4846_v28 = vpop.permute.xlu1 %4845  ;;  %v1639_v24 = vpack.c.bf16 %v1617_v41, %v1616_v43  ;;  %v4548_v55 = vunpack.i.h.bf16 %v9481_v23  ;;  %v4547_v61 = vunpack.i.l.bf16 %v9481_v23  ;;  %v4543_v4 = vunpack.i.h.bf16 %v9482_v25 }
 0x163   : > { %v4833_v5 = vunpack.i.h.bf16 %v4831_v3  ;;  %v4832_v51 = vunpack.i.l.bf16 %v4831_v3  ;;  %v4542_v17 = vunpack.i.l.bf16 %v9482_v25  ;;  %v1392_v38 = vsel %vm1370_vm4, %v9483_v32, %v4393_v11 }
 0x164   : > { %v1391_v44 = vsel %vm1370_vm4, %v9484_v19, %v4392_v33  ;;  %v4628_v13 = vunpack.i.h.bf16 %v9485_v6  ;;  %v4627_v57 = vunpack.i.l.bf16 %v9485_v6  ;;  %v6844_v48 = vsel %vm1370_vm4, %v9486_v0, %v4397_v26 }
 0x165   : > { %v1614_v18 = vsel %vm1597_vm11, %v1581_v35, %v4832_v51  ;;  %v1615_v62 = vsel %vm1597_vm11, %v1582_v36, %v4833_v5  ;;  %v4403_v56 = vunpack.i.h.bf16 %v9487_v27  ;;  %v1422_v42 = vsel %vm1401_vm5, %v1391_v44, %v4467_v2 }
 0x166   : > { %v4841_v7 = vpop.permute.xlu0 %4840  ;;  %v1638_v22 = vpack.c.bf16 %v1615_v62, %v1614_v18  ;;  %v4856_v50 = vpop.permute.xlu1 %4855  ;;  %v1423_v11 = vsel %vm1401_vm5, %v1392_v38, %v4468_v31  ;;  %v1421_v15 = vsel %vm1401_vm5, %v6721_v21, %v4463_v59  ;;  %v1420_v53 = vsel %vm1401_vm5, %v6728_v16, %v4462_v40 }
 0x167   : > { %v4848_v58 = vunpack.i.h.bf16 %v4846_v28  ;;  %v4847_v39 = vunpack.i.l.bf16 %v4846_v28  ;;  %v1455_v26 = vsel %vm1432_vm6, %v1422_v42, %v4547_v61  ;;  %v1456_v29 = vsel %vm1432_vm6, %v1423_v11, %v4548_v55  ;;  %v9491_v42 = vld [vmem:[#allocation24_spill] sm:$0xff] }
 0x168   : > { %4267 = vmatprep.mubr.msk.bf16.mxu0 %vm1661_vm12, %v1638_v22  ;;  %v1453_v47 = vsel %vm1432_vm6, %v1420_v53, %v4542_v17  ;;  %v1454_v52 = vsel %vm1432_vm6, %v1421_v15, %v4543_v4  ;;  %v1488_v54 = vsel %vm1465_vm7, %v1455_v26, %v4627_v57  ;;  %v1489_v30 = vsel %vm1465_vm7, %v1456_v29, %v4628_v13  ;;  %v9489_v4 = vld [vmem:[#allocation21_spill] sm:$0xff]  ;;  %v9490_v57 = vld [vmem:[#allocation32_spill] sm:$0xff]  ;;  %v9493_v26 = vld [vmem:[#allocation38_spill] sm:$0xff] }
 0x169   : > { %4268 = vmatmul.mubr.msk.bf16.gmra.mxu0 %vm1661_vm12, %v1639_v24  ;;  %v4858_v21 = vunpack.i.h.bf16 %v4856_v50  ;;  %v4857_v63 = vunpack.i.l.bf16 %v4856_v50  ;;  %v4623_v16 = vunpack.i.h.bf16 %v9488_v20  ;;  %v4622_v1 = vunpack.i.l.bf16 %v9488_v20 }
 0x16a   : > { %v4851_v34 = vpop.permute.xlu0 %4850  ;;  %v4866_v49 = vpop.permute.xlu1 %4865  ;;  %v1521_v8 = vsel %vm1498_vm8, %v1488_v54, %v4847_v39  ;;  %v1522_v43 = vsel %vm1498_vm8, %v1489_v30, %v4848_v58  ;;  %v4843_v41 = vunpack.i.h.bf16 %v4841_v7  ;;  %v4842_v3 = vunpack.i.l.bf16 %v4841_v7  ;;  %v9492_v39 = vld [vmem:[#allocation34_spill] sm:$0xff] }
 0x16b   : > { %v4868_v60 = vunpack.i.h.bf16 %v4866_v49  ;;  %v4867_v12 = vunpack.i.l.bf16 %v4866_v49  ;;  %v4853_v45 = vunpack.i.h.bf16 %v4851_v34  ;;  %v4852_v5 = vunpack.i.l.bf16 %v4851_v34 }
 0x16c   : > { %v1554_v9 = vsel %vm1531_vm9, %v1521_v8, %v4857_v63  ;;  %v1555_v31 = vsel %vm1531_vm9, %v1522_v43, %v4858_v21  ;;  %v1486_v2 = vsel %vm1465_vm7, %v1453_v47, %v4622_v1  ;;  %v1487_v18 = vsel %vm1465_vm7, %v1454_v52, %v4623_v16  ;;  %v9494_v52 = vld [vmem:[#allocation31_spill] sm:$0xff]  ;;  %v9496_v21 = vld [vmem:[#allocation45_spill] sm:$0xff] }
 0x16d   : > { %v1587_v62 = vsel %vm1564_vm10, %v1554_v9, %v4867_v12  ;;  %v1588_v24 = vsel %vm1564_vm10, %v1555_v31, %v4868_v60  ;;  %v1519_v14 = vsel %vm1498_vm8, %v1486_v2, %v4842_v3  ;;  %v1520_v46 = vsel %vm1498_vm8, %v1487_v18, %v4843_v41  ;;  %v9497_v12 = vld [vmem:[#allocation27_spill] sm:$0xff] }
 0x16e   : > { %v4861_v28 = vpop.permute.xlu0 %4860  ;;  %v4876_v10 = vpop.permute.xlu1 %4875  ;;  %v1552_v50 = vsel %vm1531_vm9, %v1519_v14, %v4852_v5  ;;  %v1553_v23 = vsel %vm1531_vm9, %v1520_v46, %v4853_v45  ;;  %v4402_v25 = vunpack.i.l.bf16 %v9487_v27  ;;  %v4478_v17 = vunpack.i.h.bf16 %v9489_v4 }
 0x16f   : > { %v4878_v51 = vunpack.i.h.bf16 %v4876_v10  ;;  %v4877_v33 = vunpack.i.l.bf16 %v4876_v10  ;;  %v4863_v35 = vunpack.i.h.bf16 %v4861_v28  ;;  %v4862_v36 = vunpack.i.l.bf16 %v4861_v28 }
 0x170   : > { %v4477_v19 = vunpack.i.l.bf16 %v9489_v4  ;;  %v1396_v0 = vsel %vm1370_vm4, %v9490_v57, %v4403_v56  ;;  %v4473_v11 = vunpack.i.h.bf16 %v9491_v42  ;;  %v4472_v27 = vunpack.i.l.bf16 %v9491_v42  ;;  %v9495_v56 = vld [vmem:[#allocation12_spill] sm:$0xff] }
 0x171   : > { %v1620_v59 = vsel %vm1597_vm11, %v1587_v62, %v4877_v33  ;;  %v1621_v40 = vsel %vm1597_vm11, %v1588_v24, %v4878_v51  ;;  %v1585_v32 = vsel %vm1564_vm10, %v1552_v50, %v4862_v36  ;;  %v1586_v38 = vsel %vm1564_vm10, %v1553_v23, %v4863_v35  ;;  %v9498_v36 = vld [vmem:[#allocation46_spill] sm:$0xff] }
 0x172   : > { %v4871_v7 = vpop.permute.xlu0 %4870  ;;  %v4886_v22 = vpop.permute.xlu1 %4885  ;;  %v1641_v13 = vpack.c.bf16 %v1621_v40, %v1620_v59  ;;  %v4558_v34 = vunpack.i.h.bf16 %v9492_v39  ;;  %v4557_v49 = vunpack.i.l.bf16 %v9492_v39  ;;  %v4553_v29 = vunpack.i.h.bf16 %v9493_v26 }
 0x173   : > { %v4873_v55 = vunpack.i.h.bf16 %v4871_v7  ;;  %v4872_v61 = vunpack.i.l.bf16 %v4871_v7  ;;  %v4552_v47 = vunpack.i.l.bf16 %v9493_v26  ;;  %v1395_v54 = vsel %vm1370_vm4, %v9494_v52, %v4402_v25  ;;  %v9499_v26 = vld [vmem:[#allocation39_spill] sm:$0xff] }
 0x174   : > { %v4413_v30 = vunpack.i.h.bf16 %v9495_v56  ;;  %v4638_v63 = vunpack.i.h.bf16 %v9496_v21  ;;  %v4637_v20 = vunpack.i.l.bf16 %v9496_v21  ;;  %v4412_v16 = vunpack.i.l.bf16 %v9495_v56 }
 0x175   : > { %v1618_v44 = vsel %vm1597_vm11, %v1585_v32, %v4872_v61  ;;  %v1619_v6 = vsel %vm1597_vm11, %v1586_v38, %v4873_v55  ;;  %v1426_v1 = vsel %vm1401_vm5, %v1395_v54, %v4477_v19  ;;  %v1427_v60 = vsel %vm1401_vm5, %v1396_v0, %v4478_v17 }
 0x176   : > { %v4881_v15 = vpop.permute.xlu0 %4880  ;;  %v1640_v53 = vpack.c.bf16 %v1619_v6, %v1618_v44  ;;  %v6887_v58 = vpop.permute.xlu1 %4895  ;;  %v4488_v8 = vunpack.i.h.bf16 %v9497_v12  ;;  %v1425_v43 = vsel %vm1401_vm5, %v6823_v37, %v4473_v11  ;;  %v1424_v41 = vsel %vm1401_vm5, %v6844_v48, %v4472_v27 }
 0x177   : > { %v4888_v3 = vunpack.i.h.bf16 %v4886_v22  ;;  %v4887_v28 = vunpack.i.l.bf16 %v4886_v22  ;;  %v1459_v5 = vsel %vm1432_vm6, %v1426_v1, %v4557_v49  ;;  %v1460_v51 = vsel %vm1432_vm6, %v1427_v60, %v4558_v34 }
 0x178   : > { %4271 = vmatprep.mubr.msk.bf16.mxu0 %vm1661_vm12, %v1640_v53  ;;  %v1457_v33 = vsel %vm1432_vm6, %v1424_v41, %v4552_v47  ;;  %v1458_v9 = vsel %vm1432_vm6, %v1425_v43, %v4553_v29  ;;  %v1492_v31 = vsel %vm1465_vm7, %v1459_v5, %v4637_v20  ;;  %v1493_v37 = vsel %vm1465_vm7, %v1460_v51, %v4638_v63  ;;  %v9501_v5 = vld [vmem:[#allocation37_spill] sm:$0xff] }
 0x179   : > { %4272 = vmatmul.mubr.msk.bf16.gmra.mxu0 %vm1661_vm12, %v1641_v13  ;;  %v4898_v35 = vunpack.i.h.bf16 %v6887_v58  ;;  %v4897_v48 = vunpack.i.l.bf16 %v6887_v58  ;;  %v4633_v2 = vunpack.i.h.bf16 %v9498_v36  ;;  %v4632_v18 = vunpack.i.l.bf16 %v9498_v36 }
 0x17a   : > { %v4891_v10 = vpop.permute.xlu0 %4890  ;;  %v6908_v45 = vpop.permute.xlu1 %4905  ;;  %v1525_v14 = vsel %vm1498_vm8, %v1492_v31, %v4887_v28  ;;  %v1526_v46 = vsel %vm1498_vm8, %v1493_v37, %v4888_v3  ;;  %v4883_v59 = vunpack.i.h.bf16 %v4881_v15  ;;  %v4882_v40 = vunpack.i.l.bf16 %v4881_v15  ;;  %v9500_v28 = vld [vmem:[#allocation36_spill] sm:$0xff]  ;;  %v9502_v31 = vld [vmem:[#allocation2_spill] sm:$0xff] }
 0x17b   : > { %v4908_v62 = vunpack.i.h.bf16 %v6908_v45  ;;  %v4907_v24 = vunpack.i.l.bf16 %v6908_v45  ;;  %v4893_v50 = vunpack.i.h.bf16 %v4891_v10  ;;  %v4892_v23 = vunpack.i.l.bf16 %v4891_v10 }
 0x17c   : > { %v1558_v25 = vsel %vm1531_vm9, %v1525_v14, %v4897_v48  ;;  %v1559_v4 = vsel %vm1531_vm9, %v1526_v46, %v4898_v35  ;;  %v1490_v38 = vsel %vm1465_vm7, %v1457_v33, %v4632_v18  ;;  %v1491_v19 = vsel %vm1465_vm7, %v1458_v9, %v4633_v2 }
 0x17d   : > { %v1591_v44 = vsel %vm1564_vm10, %v1558_v25, %v4907_v24  ;;  %v1592_v6 = vsel %vm1564_vm10, %v1559_v4, %v4908_v62  ;;  %v1523_v13 = vsel %vm1498_vm8, %v1490_v38, %v4882_v40  ;;  %v1524_v57 = vsel %vm1498_vm8, %v1491_v19, %v4883_v59  ;;  %v9504_v59 = vld [vmem:[#allocation40_spill] sm:$0xff] }
 0x17e   : > { %v4901_v7 = vpop.permute.xlu0 %4900  ;;  %v6924_v22 = vpop.permute.xlu1 %4915  ;;  %v1556_v15 = vsel %vm1531_vm9, %v1523_v13, %v4892_v23  ;;  %v1557_v53 = vsel %vm1531_vm9, %v1524_v57, %v4893_v50  ;;  %v4487_v49 = vunpack.i.l.bf16 %v9497_v12  ;;  %v4568_v29 = vunpack.i.h.bf16 %v9499_v26  ;;  %v9506_v19 = vld [vmem:[#allocation28_spill] sm:$0xff] }
 0x17f   : > { %v4918_v55 = vunpack.i.h.bf16 %v6924_v22  ;;  %v4917_v61 = vunpack.i.l.bf16 %v6924_v22  ;;  %v4903_v17 = vunpack.i.h.bf16 %v4901_v7  ;;  %v4902_v32 = vunpack.i.l.bf16 %v4901_v7 }
 0x180   : > { %v4567_v54 = vunpack.i.l.bf16 %v9499_v26  ;;  %v1400_v10 = vsel %vm1370_vm4, %v9500_v28, %v4413_v30  ;;  %v1399_v51 = vsel %vm1370_vm4, %v9501_v5, %v4412_v16  ;;  %v4408_v37 = vunpack.i.h.bf16 %v9502_v31  ;;  %v9503_v30 = vld [vmem:[#allocation30_spill] sm:$0xff] }
 0x181   : > { %v1624_v0 = vsel %vm1597_vm11, %v1591_v44, %v4917_v61  ;;  %v1625_v42 = vsel %vm1597_vm11, %v1592_v6, %v4918_v55  ;;  %v1589_v47 = vsel %vm1564_vm10, %v1556_v15, %v4902_v32  ;;  %v1590_v52 = vsel %vm1564_vm10, %v1557_v53, %v4903_v17  ;;  %v9505_v32 = vld [vmem:[#allocation29_spill] sm:$0xff] }
 0x182   : > { %v4911_v11 = vpop.permute.xlu0 %4910  ;;  %v4926_v27 = vpop.permute.xlu1 %4925  ;;  %v1643_v20 = vpack.c.bf16 %v1625_v42, %v1624_v0  ;;  %v4407_v36 = vunpack.i.l.bf16 %v9502_v31  ;;  %v1430_v2 = vsel %vm1401_vm5, %v1399_v51, %v4487_v49  ;;  %v1431_v18 = vsel %vm1401_vm5, %v1400_v10, %v4488_v8 }
 0x183   : > { %v4913_v39 = vunpack.i.h.bf16 %v4911_v11  ;;  %v4912_v34 = vunpack.i.l.bf16 %v4911_v11  ;;  %v4928_v1 = vunpack.i.h.bf16 %v4926_v27  ;;  %v4927_v60 = vunpack.i.l.bf16 %v4926_v27 }
 0x184   : > { %v4483_v14 = vunpack.i.h.bf16 %v9503_v30  ;;  %v4482_v56 = vunpack.i.l.bf16 %v9503_v30  ;;  %v1463_v16 = vsel %vm1432_vm6, %v1430_v2, %v4567_v54  ;;  %v1464_v46 = vsel %vm1432_vm6, %v1431_v18, %v4568_v29 }
 0x185   : > { %v1622_v21 = vsel %vm1597_vm11, %v1589_v47, %v4912_v34  ;;  %v1623_v63 = vsel %vm1597_vm11, %v1590_v52, %v4913_v39  ;;  %v4563_v40 = vunpack.i.h.bf16 %v9504_v59  ;;  %v4562_v7 = vunpack.i.l.bf16 %v9504_v59 }
 0x186   : > { %v4921_v43 = vpop.permute.xlu0 %4920  ;;  %v1642_v41 = vpack.c.bf16 %v1623_v63, %v1622_v21  ;;  %v4936_v3 = vpop.permute.xlu1 %4935  ;;  %v1496_v12 = vsel %vm1465_vm7, %v1463_v16, %v4927_v60  ;;  %v1497_v8 = vsel %vm1465_vm7, %v1464_v46, %v4928_v1  ;;  %v1398_v38 = vsel %vm1370_vm4, %v9505_v32, %v4408_v37 }
 0x187   : > { %v4938_v33 = vunpack.i.h.bf16 %v4936_v3  ;;  %v4937_v9 = vunpack.i.l.bf16 %v4936_v3  ;;  %v4923_v23 = vunpack.i.h.bf16 %v4921_v43  ;;  %v4922_v25 = vunpack.i.l.bf16 %v4921_v43 }
 0x188   : > { %4275 = vmatprep.mubr.msk.bf16.mxu0 %vm1661_vm12, %v1642_v41  ;;  %v1397_v44 = vsel %vm1370_vm4, %v9506_v19, %v4407_v36  ;;  %v1429_v57 = vsel %vm1401_vm5, %v1398_v38, %v4483_v14 }
 0x189   : > { %4276 = vmatmul.mubr.msk.bf16.gmra.mxu0 %vm1661_vm12, %v1643_v20  ;;  %v1529_v4 = vsel %vm1498_vm8, %v1496_v12, %v4937_v9  ;;  %v1530_v17 = vsel %vm1498_vm8, %v1497_v8, %v4938_v33  ;;  %v1428_v0 = vsel %vm1401_vm5, %v1397_v44, %v4482_v56  ;;  %v1462_v27 = vsel %vm1432_vm6, %v1429_v57, %v4563_v40 }
 0x18a   : > { %v4931_v50 = vpop.permute.xlu0 %4930  ;;  %v4946_v42 = vpop.permute.xlu1 %4945  ;;  %v1461_v11 = vsel %vm1432_vm6, %v1428_v0, %v4562_v7  ;;  %v1562_v15 = vsel %vm1531_vm9, %v1529_v4, %v4897_v48  ;;  %v1563_v53 = vsel %vm1531_vm9, %v1530_v17, %v4898_v35  ;;  %v1495_v49 = vsel %vm1465_vm7, %v1462_v27, %v4923_v23 }
 0x18b   : > { %v4933_v6 = vunpack.i.h.bf16 %v4931_v50  ;;  %v4932_v13 = vunpack.i.l.bf16 %v4931_v50  ;;  %v1494_v34 = vsel %vm1465_vm7, %v1461_v11, %v4922_v25  ;;  %v4948_v54 = vunpack.i.h.bf16 %v4946_v42 }
 0x18c   : > { %v4947_v21 = vunpack.i.l.bf16 %v4946_v42  ;;  %v1595_v58 = vsel %vm1564_vm10, %v1562_v15, %v4907_v24  ;;  %v1596_v35 = vsel %vm1564_vm10, %v1563_v53, %v4908_v62 }
 0x18d   : > { %v1527_v47 = vsel %vm1498_vm8, %v1494_v34, %v4932_v13  ;;  %v1528_v52 = vsel %vm1498_vm8, %v1495_v49, %v4933_v6  ;;  %v1628_v3 = vsel %vm1597_vm11, %v1595_v58, %v4917_v61  ;;  %v1629_v28 = vsel %vm1597_vm11, %v1596_v35, %v4918_v55 }
 0x18e   : > { %v4941_v39 = vpop.permute.xlu0 %4940  ;;  %v1645_v10 = vpack.c.bf16 %v1629_v28, %v1628_v3 }
 0x18f   : > { %v4943_v26 = vunpack.i.h.bf16 %v4941_v39  ;;  %v4942_v29 = vunpack.i.l.bf16 %v4941_v39 }
 0x191   : > { %v1560_v63 = vsel %vm1531_vm9, %v1527_v47, %v4942_v29  ;;  %v1561_v48 = vsel %vm1531_vm9, %v1528_v52, %v4943_v26 }
 0x192   : > { %v4951_v20 = vpop.permute.xlu0 %4950  ;;  %v1593_v43 = vsel %vm1564_vm10, %v1560_v63, %v4947_v21  ;;  %v1594_v41 = vsel %vm1564_vm10, %v1561_v48, %v4948_v54 }
 0x193   : > { %v4953_v1 = vunpack.i.h.bf16 %v4951_v20  ;;  %v4952_v60 = vunpack.i.l.bf16 %v4951_v20 }
 0x195   : > { %v1626_v24 = vsel %vm1597_vm11, %v1593_v43, %v4952_v60  ;;  %v1627_v45 = vsel %vm1597_vm11, %v1594_v41, %v4953_v1 }
 0x196   : > { %v1644_v62 = vpack.c.bf16 %v1627_v45, %v1626_v24 }
 0x198   : > { %4279 = vmatprep.mubr.msk.bf16.mxu0 %vm1661_vm12, %v1644_v62 }
 0x199   : > { %4280 = vmatmul.mubr.msk.bf16.gmra.mxu0 %vm1661_vm12, %v1645_v10 }
 0x1e9   : > { %v7023_v5 = vpop.f32.mrf.mxu0 }
 0x1ea   : > { %v1947_v16 = vmul.f32 %v7023_v5, %v7023_v5  ;;  %v1878_v40 = vsel %vm1370_vm4, %v7023_v5, 0.0 }
 0x1eb   : > { %v7025_v51 = vpop.f32.mrf.mxu0 }
 0x1ec   : > { %v1945_v37 = vmul.f32 %v7025_v51, %v7025_v51  ;;  %v1875_v18 = vsel %vm1370_vm4, %v7025_v51, 0.0  ;;  %v1980_v8 = vsel %vm1370_vm4, %v1947_v16, 0.0 }
 0x1ed   : > { %v7027_v33 = vpop.f32.mrf.mxu0 }
 0x1ee   : > { %v1977_v46 = vsel %vm1370_vm4, %v1945_v37, 0.0  ;;  %v1948_v50 = vmul.f32 %v7027_v33, %v7027_v33  ;;  %v1880_v4 = vsel %vm1370_vm4, %v7027_v33, 0.0 }
 0x1ef   : > { %v7029_v61 = vpop.f32.mrf.mxu0 }
 0x1f0   : > { %v1946_v31 = vmul.f32 %v7029_v61, %v7029_v61  ;;  %v1876_v36 = vsel %vm1370_vm4, %v7029_v61, 0.0  ;;  %v1982_v44 = vsel %vm1370_vm4, %v1948_v50, 0.0 }
 0x1f1   : > { %v1877_v14 = vadd.f32 %v1876_v36, %v1875_v18 }
 0x1f2   : > { %v1978_v30 = vsel %vm1370_vm4, %v1946_v31, 0.0 }
 0x1f3   : > { %v1979_v59 = vadd.f32 %v1978_v30, %v1977_v46  ;;  %v1879_v7 = vadd.f32 %v1878_v40, %v1877_v14 }
 0x1f5   : > { %v1981_v25 = vadd.f32 %v1980_v8, %v1979_v59  ;;  %v1881_v38 = vadd.f32 %v1880_v4, %v1879_v7 }
 0x1f7   : > { %v1983_v0 = vadd.f32 %v1982_v44, %v1981_v25 }
 0x1f9   : > { %v7031_v22 = vpop.f32.mrf.mxu0 }
 0x1fa   : > { %v1951_v53 = vmul.f32 %v7031_v22, %v7031_v22  ;;  %v1886_v49 = vsel %vm1370_vm4, %v7031_v22, 0.0 }
 0x1fb   : > { %v7033_v55 = vpop.f32.mrf.mxu0 }
 0x1fc   : > { %v1949_v23 = vmul.f32 %v7033_v55, %v7033_v55  ;;  %v1882_v17 = vsel %vm1370_vm4, %v7033_v55, 0.0  ;;  %v1988_v29 = vsel %vm1370_vm4, %v1951_v53, 0.0 }
 0x1fd   : > { %v7035_v9 = vpop.f32.mrf.mxu0  ;;  %v1883_v57 = vadd.f32 %v1882_v17, %v1881_v38 }
 0x1fe   : > { %v1984_v6 = vsel %vm1370_vm4, %v1949_v23, 0.0  ;;  %v1952_v47 = vmul.f32 %v7035_v9, %v7035_v9  ;;  %v1888_v63 = vsel %vm1370_vm4, %v7035_v9, 0.0 }
 0x1ff   : > { %v7043_v2 = vpop.f32.mrf.mxu0  ;;  %v1985_v11 = vadd.f32 %v1984_v6, %v1983_v0 }
 0x200   : > { %v1950_v32 = vmul.f32 %v7043_v2, %v7043_v2  ;;  %v1884_v13 = vsel %vm1370_vm4, %v7043_v2, 0.0  ;;  %v1990_v20 = vsel %vm1370_vm4, %v1952_v47, 0.0 }
 0x201   : > { %v1885_v27 = vadd.f32 %v1884_v13, %v1883_v57 }
 0x202   : > { %v1986_v42 = vsel %vm1370_vm4, %v1950_v32, 0.0 }
 0x203   : > { %v1987_v39 = vadd.f32 %v1986_v42, %v1985_v11  ;;  %v1887_v26 = vadd.f32 %v1886_v49, %v1885_v27 }
 0x205   : > { %v1989_v54 = vadd.f32 %v1988_v29, %v1987_v39  ;;  %v1889_v35 = vadd.f32 %v1888_v63, %v1887_v26 }
 0x207   : > { %v1991_v41 = vadd.f32 %v1990_v20, %v1989_v54 }
 0x209   : > { %v7048_v56 = vpop.f32.mrf.mxu0 }
 0x20a   : > { %v1955_v62 = vmul.f32 %v7048_v56, %v7048_v56  ;;  %v1894_v37 = vsel %vm1370_vm4, %v7048_v56, 0.0 }
 0x20b   : > { %v7055_v12 = vpop.f32.mrf.mxu0 }
 0x20c   : > { %v1953_v52 = vmul.f32 %v7055_v12, %v7055_v12  ;;  %v1890_v48 = vsel %vm1370_vm4, %v7055_v12, 0.0  ;;  %v1996_v30 = vsel %vm1370_vm4, %v1955_v62, 0.0 }
 0x20d   : > { %v7068_v19 = vpop.f32.mrf.mxu0  ;;  %v1891_v43 = vadd.f32 %v1890_v48, %v1889_v35 }
 0x20e   : > { %v1992_v1 = vsel %vm1370_vm4, %v1953_v52, 0.0  ;;  %v1956_v14 = vmul.f32 %v7068_v19, %v7068_v19  ;;  %v1896_v59 = vsel %vm1370_vm4, %v7068_v19, 0.0 }
 0x20f   : > { %v7075_v15 = vpop.f32.mrf.mxu0  ;;  %v1993_v24 = vadd.f32 %v1992_v1, %v1991_v41 }
 0x210   : > { %v1954_v58 = vmul.f32 %v7075_v15, %v7075_v15  ;;  %v1892_v60 = vsel %vm1370_vm4, %v7075_v15, 0.0  ;;  %v1998_v23 = vsel %vm1370_vm4, %v1956_v14, 0.0 }
 0x211   : > { %v1893_v45 = vadd.f32 %v1892_v60, %v1891_v43 }
 0x212   : > { %v1994_v28 = vsel %vm1370_vm4, %v1954_v58, 0.0 }
 0x213   : > { %v1995_v10 = vadd.f32 %v1994_v28, %v1993_v24  ;;  %v1895_v36 = vadd.f32 %v1894_v37, %v1893_v45 }
 0x215   : > { %v1997_v46 = vadd.f32 %v1996_v30, %v1995_v10  ;;  %v1897_v8 = vadd.f32 %v1896_v59, %v1895_v36 }
 0x217   : > { %v1999_v32 = vadd.f32 %v1998_v23, %v1997_v46 }
 0x219   : > { %v7079_v34 = vpop.f32.mrf.mxu0 }
 0x21a   : > { %v1959_v57 = vmul.f32 %v7079_v34, %v7079_v34  ;;  %v1902_v42 = vsel %vm1370_vm4, %v7079_v34, 0.0 }
 0x21b   : > { %v7088_v21 = vpop.f32.mrf.mxu0 }
 0x21c   : > { %v1957_v16 = vmul.f32 %v7088_v21, %v7088_v21  ;;  %v1898_v40 = vsel %vm1370_vm4, %v7088_v21, 0.0  ;;  %v2004_v53 = vsel %vm1370_vm4, %v1959_v57, 0.0 }
 0x21d   : > { %v7100_v3 = vpop.f32.mrf.mxu0  ;;  %v1899_v17 = vadd.f32 %v1898_v40, %v1897_v8 }
 0x21e   : > { %v2000_v25 = vsel %vm1370_vm4, %v1957_v16, 0.0  ;;  %v1960_v39 = vmul.f32 %v7100_v3, %v7100_v3  ;;  %v1904_v29 = vsel %vm1370_vm4, %v7100_v3, 0.0 }
 0x21f   : > { %v7105_v31 = vpop.f32.mrf.mxu0  ;;  %v2001_v44 = vadd.f32 %v2000_v25, %v1999_v32 }
 0x220   : > { %v1958_v7 = vmul.f32 %v7105_v31, %v7105_v31  ;;  %v1900_v4 = vsel %vm1370_vm4, %v7105_v31, 0.0  ;;  %v2006_v48 = vsel %vm1370_vm4, %v1960_v39, 0.0 }
 0x221   : > { %v1901_v6 = vadd.f32 %v1900_v4, %v1899_v17 }
 0x222   : > { %v2002_v38 = vsel %vm1370_vm4, %v1958_v7, 0.0 }
 0x223   : > { %v2003_v0 = vadd.f32 %v2002_v38, %v2001_v44  ;;  %v1903_v11 = vadd.f32 %v1902_v42, %v1901_v6 }
 0x225   : > { %v2005_v26 = vadd.f32 %v2004_v53, %v2003_v0  ;;  %v1905_v54 = vadd.f32 %v1904_v29, %v1903_v11 }
 0x227   : > { %v2007_v1 = vadd.f32 %v2006_v48, %v2005_v26 }
 0x229   : > { %v7109_v18 = vpop.f32.mrf.mxu0 }
 0x22a   : > { %v1963_v45 = vmul.f32 %v7109_v18, %v7109_v18  ;;  %v1910_v10 = vsel %vm1370_vm4, %v7109_v18, 0.0 }
 0x22b   : > { %v7122_v50 = vpop.f32.mrf.mxu0 }
 0x22c   : > { %v1961_v49 = vmul.f32 %v7122_v50, %v7122_v50  ;;  %v1906_v47 = vsel %vm1370_vm4, %v7122_v50, 0.0  ;;  %v2012_v30 = vsel %vm1370_vm4, %v1963_v45, 0.0 }
 0x22d   : > { %v7129_v13 = vpop.f32.mrf.mxu0  ;;  %v1907_v20 = vadd.f32 %v1906_v47, %v1905_v54 }
 0x22e   : > { %v2008_v58 = vsel %vm1370_vm4, %v1961_v49, 0.0  ;;  %v1964_v14 = vmul.f32 %v7129_v13, %v7129_v13  ;;  %v1912_v59 = vsel %vm1370_vm4, %v7129_v13, 0.0 }
 0x22f   : > { %v7135_v27 = vpop.f32.mrf.mxu0  ;;  %v2009_v41 = vadd.f32 %v2008_v58, %v2007_v1 }
 0x230   : > { %v1962_v52 = vmul.f32 %v7135_v27, %v7135_v27  ;;  %v1908_v35 = vsel %vm1370_vm4, %v7135_v27, 0.0  ;;  %v2014_v23 = vsel %vm1370_vm4, %v1964_v14, 0.0 }
 0x231   : > { %v1909_v28 = vadd.f32 %v1908_v35, %v1907_v20 }
 0x232   : > { %v2010_v43 = vsel %vm1370_vm4, %v1962_v52, 0.0 }
 0x233   : > { %v2011_v62 = vadd.f32 %v2010_v43, %v2009_v41  ;;  %v1911_v37 = vadd.f32 %v1910_v10, %v1909_v28 }
 0x235   : > { %v2013_v46 = vadd.f32 %v2012_v30, %v2011_v62  ;;  %v1913_v8 = vadd.f32 %v1912_v59, %v1911_v37 }
 0x237   : > { %v2015_v32 = vadd.f32 %v2014_v23, %v2013_v46 }
 0x239   : > { %v7148_v63 = vpop.f32.mrf.mxu0 }
 0x23a   : > { %v1967_v0 = vmul.f32 %v7148_v63, %v7148_v63  ;;  %v1918_v53 = vsel %vm1370_vm4, %v7148_v63, 0.0 }
 0x23b   : > { %v7154_v60 = vpop.f32.mrf.mxu0 }
 0x23c   : > { %v1965_v16 = vmul.f32 %v7154_v60, %v7154_v60  ;;  %v1914_v40 = vsel %vm1370_vm4, %v7154_v60, 0.0  ;;  %v2020_v26 = vsel %vm1370_vm4, %v1967_v0, 0.0 }
 0x23d   : > { %v7157_v24 = vpop.f32.mrf.mxu0  ;;  %v1915_v17 = vadd.f32 %v1914_v40, %v1913_v8 }
 0x23e   : > { %v2016_v25 = vsel %vm1370_vm4, %v1965_v16, 0.0  ;;  %v1968_v29 = vmul.f32 %v7157_v24, %v7157_v24  ;;  %v1920_v48 = vsel %vm1370_vm4, %v7157_v24, 0.0 }
 0x23f   : > { %v7163_v36 = vpop.f32.mrf.mxu0  ;;  %v2017_v44 = vadd.f32 %v2016_v25, %v2015_v32 }
 0x240   : > { %v1966_v7 = vmul.f32 %v7163_v36, %v7163_v36  ;;  %v1916_v4 = vsel %vm1370_vm4, %v7163_v36, 0.0  ;;  %v2022_v1 = vsel %vm1370_vm4, %v1968_v29, 0.0 }
 0x241   : > { %v1917_v6 = vadd.f32 %v1916_v4, %v1915_v17 }
 0x242   : > { %v2018_v38 = vsel %vm1370_vm4, %v1966_v7, 0.0 }
 0x243   : > { %v2019_v42 = vadd.f32 %v2018_v38, %v2017_v44  ;;  %v1919_v39 = vadd.f32 %v1918_v53, %v1917_v6 }
 0x245   : > { %v2021_v52 = vadd.f32 %v2020_v26, %v2019_v42  ;;  %v1921_v20 = vadd.f32 %v1920_v48, %v1919_v39 }
 0x247   : > { %v2023_v45 = vadd.f32 %v2022_v1, %v2021_v52 }
 0x249   : > { %v7181_v57 = vpop.f32.mrf.mxu0 }
 0x24a   : > { %v1971_v30 = vmul.f32 %v7181_v57, %v7181_v57  ;;  %v1926_v16 = vsel %vm1370_vm4, %v7181_v57, 0.0 }
 0x24b   : > { %v7185_v11 = vpop.f32.mrf.mxu0 }
 0x24c   : > { %v1969_v47 = vmul.f32 %v7185_v11, %v7185_v11  ;;  %v1922_v58 = vsel %vm1370_vm4, %v7185_v11, 0.0  ;;  %v2028_v40 = vsel %vm1370_vm4, %v1971_v30, 0.0 }
 0x24d   : > { %v7189_v49 = vpop.f32.mrf.mxu0  ;;  %v1923_v28 = vadd.f32 %v1922_v58, %v1921_v20 }
 0x24e   : > { %v2024_v43 = vsel %vm1370_vm4, %v1969_v47, 0.0  ;;  %v1972_v7 = vmul.f32 %v7189_v49, %v7189_v49  ;;  %v1928_v25 = vsel %vm1370_vm4, %v7189_v49, 0.0 }
 0x24f   : > { %v7196_v54 = vpop.f32.mrf.mxu0  ;;  %v2025_v10 = vadd.f32 %v2024_v43, %v2023_v45 }
 0x250   : > { %v1970_v35 = vmul.f32 %v7196_v54, %v7196_v54  ;;  %v1924_v41 = vsel %vm1370_vm4, %v7196_v54, 0.0  ;;  %v2030_v44 = vsel %vm1370_vm4, %v1972_v7, 0.0 }
 0x251   : > { %v1925_v37 = vadd.f32 %v1924_v41, %v1923_v28 }
 0x252   : > { %v2026_v62 = vsel %vm1370_vm4, %v1970_v35, 0.0 }
 0x253   : > { %v2027_v14 = vadd.f32 %v2026_v62, %v2025_v10  ;;  %v1927_v46 = vadd.f32 %v1926_v16, %v1925_v37 }
 0x255   : > { %v2029_v8 = vadd.f32 %v2028_v40, %v2027_v14  ;;  %v1929_v32 = vadd.f32 %v1928_v25, %v1927_v46 }
 0x257   : > { %v2031_v42 = vadd.f32 %v2030_v44, %v2029_v8 }
 0x259   : > { %v7213_v59 = vpop.f32.mrf.mxu0 }
 0x25a   : > { %v1975_v39 = vmul.f32 %v7213_v59, %v7213_v59  ;;  %v1934_v48 = vsel %vm1370_vm4, %v7213_v59, 0.0 }
 0x25b   : > { %v1860_v23 = vpop.f32.mrf.mxu0 }
 0x25c   : > { %v1930_v4 = vsel %vm1370_vm4, %v1860_v23, 0.0  ;;  %v1973_v17 = vmul.f32 %v1860_v23, %v1860_v23  ;;  %v2036_v43 = vsel %vm1370_vm4, %v1975_v39, 0.0 }
 0x25d   : > { %v7221_v38 = vpop.f32.mrf.mxu0  ;;  %v1931_v0 = vadd.f32 %v1930_v4, %v1929_v32 }
 0x25e   : > { %v2032_v6 = vsel %vm1370_vm4, %v1973_v17, 0.0  ;;  %v1976_v58 = vmul.f32 %v7221_v38, %v7221_v38  ;;  %v1936_v41 = vsel %vm1370_vm4, %v7221_v38, 0.0 }
 0x25f   : > { %v1863_v53 = vpop.f32.mrf.mxu0  ;;  %v2033_v47 = vadd.f32 %v2032_v6, %v2031_v42 }
 0x260   : > { %v1932_v26 = vsel %vm1370_vm4, %v1863_v53, 0.0  ;;  %v1974_v29 = vmul.f32 %v1863_v53, %v1863_v53  ;;  %v2038_v62 = vsel %vm1370_vm4, %v1976_v58, 0.0 }
 0x261   : > { %v1933_v52 = vadd.f32 %v1932_v26, %v1931_v0 }
 0x262   : > { %v2034_v35 = vsel %vm1370_vm4, %v1974_v29, 0.0 }
 0x263   : > { %v1935_v20 = vadd.f32 %v1934_v48, %v1933_v52  ;;  %v2035_v1 = vadd.f32 %v2034_v35, %v2033_v47 }
 0x265   : > { %v1937_v28 = vadd.f32 %v1936_v41, %v1935_v20  ;;  %v2037_v45 = vadd.f32 %v2036_v43, %v2035_v1 }
 0x267   : > { %v1938_v10 = vrot.slane %v1937_v28, 4  ;;  %v2039_v37 = vadd.f32 %v2038_v62, %v2037_v45 }
 0x269   : > { %v1939_v30 = vadd.f32 %v1938_v10, %v1937_v28  ;;  %v2040_v14 = vrot.slane %v2039_v37, 4 }
 0x26b   : > { %v1940_v16 = vrot.slane %v1939_v30, 2  ;;  %v2041_v46 = vadd.f32 %v2040_v14, %v2039_v37 }
 0x26d   : > { %v1941_v40 = vadd.f32 %v1940_v16, %v1939_v30  ;;  %v2042_v7 = vrot.slane %v2041_v46, 2 }
 0x26f   : > { %v1942_v8 = vrot.slane %v1941_v40, 1  ;;  %v2043_v25 = vadd.f32 %v2042_v7, %v2041_v46 }
 0x271   : > { %v1943_v4 = vadd.f32 %v1942_v8, %v1941_v40  ;;  %v2044_v17 = vrot.slane %v2043_v25, 1 }
 0x273   : > { %v7237_v32 = vmul.f32 0.00390625, %v1943_v4  ;;  %v2045_v44 = vadd.f32 %v2044_v17, %v2043_v25 }
 0x275   : > { %v2046_v6 = vmul.f32 0.00390625, %v2045_v44  ;;  %v2047_v0 = vmul.f32 %v7237_v32, %v7237_v32  ;;  %v2078_v42 = vsub.f32 %v1860_v23, %v7237_v32  ;;  %v2079_v39 = vsub.f32 %v1863_v53, %v7237_v32 }
 0x276   : > { %v2070_v52 = vsub.f32 %v7154_v60, %v7237_v32  ;;  %v2071_v48 = vsub.f32 %v7163_v36, %v7237_v32  ;;  %v2073_v58 = vsub.f32 %v7157_v24, %v7237_v32  ;;  %v2074_v35 = vsub.f32 %v7185_v11, %v7237_v32 }
 0x277   : > { %v2048_v26 = vsub.f32 %v2046_v6, %v2047_v0  ;;  %v2075_v23 = vsub.f32 %v7196_v54, %v7237_v32  ;;  %v2076_v53 = vsub.f32 %v7181_v57, %v7237_v32  ;;  %v2077_v20 = vsub.f32 %v7189_v49, %v7237_v32 }
 0x278   : > { %v2080_v60 = vsub.f32 %v7213_v59, %v7237_v32  ;;  %v2081_v36 = vsub.f32 %v7221_v38, %v7237_v32  ;;  %v2052_v24 = vsub.f32 %v7023_v5, %v7237_v32  ;;  %v2053_v11 = vsub.f32 %v7027_v33, %v7237_v32 }
 0x279   : > { %v2049_v29 = vmax.f32 %v2048_v26, 0.0  ;;  %v2050_v38 = vsub.f32 %v7025_v51, %v7237_v32  ;;  %v2051_v5 = vsub.f32 %v7029_v61, %v7237_v32  ;;  %v2062_v45 = vsub.f32 %v7088_v21, %v7237_v32 }
 0x27a   : > { %v2063_v62 = vsub.f32 %v7105_v31, %v7237_v32  ;;  %v2064_v10 = vsub.f32 %v7079_v34, %v7237_v32  ;;  %v2065_v51 = vsub.f32 %v7100_v3, %v7237_v32  ;;  %v2066_v21 = vsub.f32 %v7122_v50, %v7237_v32 }
 0x27b   : > { %v2082_v47 = vadd.f32 1e-05, %v2049_v29  ;;  %v2067_v31 = vsub.f32 %v7135_v27, %v7237_v32  ;;  %v2068_v34 = vsub.f32 %v7109_v18, %v7237_v32  ;;  %v2069_v46 = vsub.f32 %v7129_v13, %v7237_v32 }
 0x27c   : > { %v2072_v50 = vsub.f32 %v7148_v63, %v7237_v32 }
 0x27d   : > { %5575 = vrsqrt.f32 %v2082_v47 }
 0x28a   : > { %v7265_v1 = vpop.eup %5575 }
 0x28b   : > { %v7268_v54 = vmul.f32 %v7265_v1, %v2078_v42  ;;  %v7271_v57 = vmul.f32 %v7265_v1, %v2079_v39  ;;  %v2086_v49 = vmul.f32 %v7265_v1, %v2052_v24  ;;  %v2087_v59 = vmul.f32 %v7265_v1, %v2053_v11 }
 0x28c   : > { %v7313_v40 = vmul.f32 %v7265_v1, %v2062_v45  ;;  %v2084_v7 = vmul.f32 %v7265_v1, %v2050_v38  ;;  %v7323_v8 = vmul.f32 %v7265_v1, %v2051_v5  ;;  %v7330_v63 = vmul.f32 %v7265_v1, %v2063_v62 }
 0x28d   : > { %v9310_v33 = vmax.f32 %v7268_v54, 0.0  ;;  %v2145_v43 = vmax.f32 %v7271_v57, 0.0  ;;  %v2118_v41 = vmax.f32 %v2086_v49, 0.0  ;;  %v2119_v28 = vmax.f32 %v2087_v59, 0.0 }
 0x28e   : > { %v7333_v25 = vmul.f32 %v7265_v1, %v2064_v10  ;;  %v7336_v4 = vmul.f32 %v7265_v1, %v2065_v51  ;;  %v7339_v17 = vmul.f32 %v7265_v1, %v2066_v21  ;;  %v7342_v44 = vmul.f32 %v7265_v1, %v2067_v31 }
 0x28f   : > { %v7291_v61 = vrot.slane %v9310_v33, 7  ;;  %v7295_v37 = vrot.slane %v2145_v43, 7  ;;  %v2164_v30 = vrot.slane %v2118_v41, 1  ;;  %v2212_v14 = vrot.slane %v2118_v41, 7 }
 0x290   : > { %v2213_v3 = vrot.slane %v2119_v28, 7  ;;  %v7345_v6 = vmul.f32 %v7265_v1, %v2068_v34  ;;  %v7348_v0 = vmul.f32 %v7265_v1, %v2069_v46  ;;  %v7353_v42 = vmul.f32 %v7265_v1, %v2070_v52 }
 0x291   : > { %v7306_v16 = vsel %vm278_vm0, %v7291_v61, %v7295_v37  ;;  %v7319_v18 = vsel %vm278_vm0, %v2164_v30, %v2212_v14  ;;  %v7356_v39 = vmul.f32 %v7265_v1, %v2071_v48  ;;  %v7359_v26 = vmul.f32 %v7265_v1, %v2072_v50 }
 0x292   : > { %9507 = vst [vmem:[#allocation3_spill] sm:$0xff] %v7306_v16  ;;  %v7316_v27 = vsel %vm278_vm0, %v2212_v14, %v2213_v3  ;;  %9509 = vst [vmem:[#allocation5_spill] sm:$0xff] %v7319_v18  ;;  %v7362_v29 = vmul.f32 %v7265_v1, %v2073_v58  ;;  %v7365_v47 = vmul.f32 %v7265_v1, %v2074_v35  ;;  %v2117_v59 = vmax.f32 %v7323_v8, 0.0 }
 0x293   : > { %9508 = vst [vmem:[#allocation6_spill] sm:$0xff] %v7316_v27  ;;  %v7327_v13 = vpack.i.bf16 %v7316_v27, %v7319_v18  ;;  %v7368_v24 = vmul.f32 %v7265_v1, %v2075_v23  ;;  %v7371_v11 = vmul.f32 %v7265_v1, %v2076_v53  ;;  %v7374_v52 = vmul.f32 %v7265_v1, %v2077_v20 }
 0x294   : > { %v2054_v48 = vsub.f32 %v7033_v55, %v7237_v32  ;;  %v2055_v49 = vsub.f32 %v7043_v2, %v7237_v32  ;;  %v7381_v58 = vmul.f32 %v7265_v1, %v2080_v60  ;;  %v7384_v35 = vmul.f32 %v7265_v1, %v2081_v36 }
 0x295   : > { %4960 = vrot.lane.b32.xlu0 %v7327_v13, %s5621_s20  ;;  %v2116_v23 = vmax.f32 %v2084_v7, 0.0  ;;  %v7391_v55 = vrot.slane %v2117_v59, 7  ;;  %v2307_v41 = vrot.slane %v2119_v28, 5  ;;  %v2056_v10 = vsub.f32 %v7031_v22, %v7237_v32 }
 0x296   : > { %v2088_v53 = vmul.f32 %v7265_v1, %v2054_v48  ;;  %v7389_v20 = vmul.f32 %v7265_v1, %v2055_v49  ;;  %v2057_v28 = vsub.f32 %v7035_v9, %v7237_v32  ;;  %v2058_v46 = vsub.f32 %v7055_v12, %v7237_v32 }
 0x297   : > { %v2165_v38 = vrot.slane %v2116_v23, 1  ;;  %v2215_v5 = vrot.slane %v2116_v23, 7  ;;  %v7409_v51 = vsel %vm278_vm0, %v2213_v3, %v2307_v41  ;;  %v2090_v30 = vmul.f32 %v7265_v1, %v2056_v10 }
 0x298   : > { %v2120_v45 = vmax.f32 %v2088_v53, 0.0  ;;  %v2121_v62 = vmax.f32 %v7389_v20, 0.0  ;;  %9512 = vst [vmem:[#allocation11_spill] sm:$0xff] %v7409_v51  ;;  %v7415_v14 = vmul.f32 %v7265_v1, %v2057_v28  ;;  %v2059_v22 = vsub.f32 %v7075_v15, %v7237_v32 }
 0x299   : > { %v7395_v2 = vsel %vm278_vm0, %v2215_v5, %v7391_v55  ;;  %v7398_v60 = vsel %vm278_vm0, %v2165_v38, %v2215_v5  ;;  %v2060_v50 = vsub.f32 %v7048_v56, %v7237_v32  ;;  %v2321_v12 = vrot.slane %v2145_v43, 5 }
 0x29a   : > { %9510 = vst [vmem:[#allocation8_spill] sm:$0xff] %v7395_v2  ;;  %9511 = vst [vmem:[#allocation7_spill] sm:$0xff] %v7398_v60  ;;  %v4954_v36 = vpack.i.bf16 %v7395_v2, %v7398_v60  ;;  %v2166_v21 = vrot.slane %v2120_v45, 1  ;;  %v2218_v31 = vrot.slane %v2120_v45, 7  ;;  %v7411_v34 = vrot.slane %v2121_v62, 7 }
 0x29b   : > { %v2061_v15 = vsub.f32 %v7068_v19, %v7237_v32  ;;  %v7439_v8 = vmul.f32 %v7265_v1, %v2058_v46  ;;  %v7442_v48 = vmul.f32 %v7265_v1, %v2059_v22  ;;  %v2122_v49 = vmax.f32 %v2090_v30, 0.0 }
 0x29c   : > { %4955 = vrot.lane.b32.xlu1 %v4954_v36, %s5621_s20  ;;  %v7423_v9 = vsel %vm278_vm0, %v2218_v31, %v7411_v34  ;;  %v7426_v3 = vsel %vm278_vm0, %v2166_v21, %v2218_v31  ;;  %v9306_v56 = vmax.f32 %v7313_v40, 0.0  ;;  %v9302_v53 = vmax.f32 %v7330_v63, 0.0 }
 0x29d   : > { %9513 = vst [vmem:[#allocation10_spill] sm:$0xff] %v7423_v9  ;;  %9514 = vst [vmem:[#allocation14_spill] sm:$0xff] %v7426_v3  ;;  %v7432_v7 = vpack.i.bf16 %v7423_v9, %v7426_v3  ;;  %v9303_v57 = vmax.f32 %v7333_v25, 0.0  ;;  %v9304_v19 = vmax.f32 %v7336_v4, 0.0  ;;  %v9305_v32 = vmax.f32 %v7339_v17, 0.0 }
 0x29e   : > { %v9307_v43 = vmax.f32 %v7342_v44, 0.0  ;;  %v9308_v20 = vmax.f32 %v7345_v6, 0.0  ;;  %v9309_v38 = vmax.f32 %v7348_v0, 0.0  ;;  %v9311_v5 = vmax.f32 %v7353_v42, 0.0 }
 0x29f   : > { %4970 = vrot.lane.b32.xlu0 %v7432_v7, %s5624_s29  ;;  %v9312_v41 = vmax.f32 %v7356_v39, 0.0  ;;  %v2138_v36 = vmax.f32 %v7359_v26, 0.0  ;;  %v9313_v45 = vmax.f32 %v7362_v29, 0.0  ;;  %v2140_v10 = vmax.f32 %v7365_v47, 0.0 }
 0x2a0   : > { %v9319_v28 = vmax.f32 %v7368_v24, 0.0  ;;  %v2142_v21 = vmax.f32 %v7371_v11, 0.0  ;;  %v9322_v31 = vmax.f32 %v7374_v52, 0.0  ;;  %v2308_v30 = vrot.slane %v2117_v59, 5  ;;  %4965 = vrot.lane.b32.xlu1 %v7327_v13, %s5624_s29 }
 0x2a1   : > { %v7465_v46 = vrot.slane %v9306_v56, 7  ;;  %v7469_v22 = vrot.slane %v9302_v53, 7  ;;  %v7473_v26 = vrot.slane %v9303_v57, 7  ;;  %v7477_v47 = vrot.slane %v9304_v19, 7 }
 0x2a2   : > { %v7481_v11 = vrot.slane %v9305_v32, 7  ;;  %v7485_v59 = vrot.slane %v9307_v43, 7  ;;  %v7489_v53 = vrot.slane %v9308_v20, 7  ;;  %v7493_v57 = vrot.slane %v9309_v38, 7 }
 0x2a3   : > { %v7497_v19 = vrot.slane %v9311_v5, 7  ;;  %v7501_v32 = vrot.slane %v9312_v41, 7  ;;  %v7503_v56 = vrot.slane %v2138_v36, 7  ;;  %v7507_v43 = vrot.slane %v9313_v45, 7 }
 0x2a4   : > { %v7509_v20 = vrot.slane %v2140_v10, 7  ;;  %v7513_v38 = vrot.slane %v9319_v28, 7  ;;  %v7515_v33 = vrot.slane %v2142_v21, 7  ;;  %v7519_v5 = vrot.slane %v9322_v31, 7  ;;  %4975 = vrot.lane.b32.xlu1 %v7432_v7, %s5621_s20 }
 0x2a5   : > { %v7523_v41 = vsel %vm278_vm0, %v7391_v55, %v2308_v30  ;;  %v2094_v23 = vmul.f32 %v7265_v1, %v2060_v50  ;;  %v2167_v45 = vrot.slane %v2122_v49, 1  ;;  %v2221_v16 = vrot.slane %v2122_v49, 7 }
 0x2a6   : > { %9515 = vst [vmem:[#allocation13_spill] sm:$0xff] %v7523_v41  ;;  %v9516_v9 = vmax.f32 %v7415_v14, 0.0  ;;  %v2309_v28 = vrot.slane %v2121_v62, 5  ;;  %v7533_v2 = vsel %vm278_vm0, %v7465_v46, %v7469_v22  ;;  %v7538_v31 = vsel %vm278_vm0, %v7473_v26, %v7477_v47 }
 0x2a7   : > { %9517 = vst [vmem:[#allocation17_spill] sm:$0xff] %v7538_v31  ;;  %v7545_v55 = vsel %vm278_vm0, %v7481_v11, %v7485_v59  ;;  %v7550_v62 = vsel %vm278_vm0, %v7489_v53, %v7493_v57  ;;  %v7560_v50 = vsel %vm278_vm0, %v7503_v56, %v7507_v43  ;;  %v7565_v13 = vsel %vm278_vm0, %v7509_v20, %v7513_v38 }
 0x2a8   : > { %v7528_v3 = vrot.slane %v9516_v9, 7  ;;  %9518 = vst [vmem:[#allocation16_spill] sm:$0xff] %v7545_v55  ;;  %9519 = vst [vmem:[#allocation20_spill] sm:$0xff] %v7550_v62  ;;  %v7555_v9 = vsel %vm278_vm0, %v7497_v19, %v7501_v32  ;;  %v7570_v49 = vsel %vm278_vm0, %v7515_v33, %v7519_v5  ;;  %v7574_v30 = vsel %vm278_vm0, %v7295_v37, %v2321_v12 }
 0x2a9   : > { %9520 = vst [vmem:[#allocation19_spill] sm:$0xff] %v7555_v9  ;;  %9521 = vst [vmem:[#allocation41_spill] sm:$0xff] %v7560_v50  ;;  %v9525_v9 = vmax.f32 %v7268_v54, 0.0  ;;  %v2095_v55 = vmul.f32 %v7265_v1, %v2061_v15  ;;  %v2124_v50 = vmax.f32 %v7439_v8, 0.0  ;;  %v2125_v41 = vmax.f32 %v7442_v48, 0.0 }
 0x2aa   : > { %9522 = vst [vmem:[#allocation4_spill] sm:$0xff] %v7565_v13  ;;  %9523 = vst [vmem:[#allocation42_spill] sm:$0xff] %v7570_v49  ;;  %v2126_v60 = vmax.f32 %v2094_v23, 0.0  ;;  %v7583_v13 = vsel %vm278_vm0, %v2221_v16, %v7528_v3  ;;  %v7586_v49 = vsel %vm278_vm0, %v2167_v45, %v2221_v16  ;;  %v7590_v37 = vsel %vm278_vm0, %v7411_v34, %v2309_v28 }
 0x2ab   : > { %9524 = vst [vmem:[#allocation15_spill] sm:$0xff] %v7574_v30  ;;  %v2178_v62 = vrot.slane %v9525_v9, 1  ;;  %9526 = vst [vmem:[#allocation23_spill] sm:$0xff] %v7583_v13  ;;  %v2127_v15 = vmax.f32 %v2095_v55, 0.0  ;;  %v2146_v8 = vmax.f32 %v7381_v58, 0.0  ;;  %v2168_v48 = vrot.slane %v2124_v50, 1 }
 0x2ac   : > { %9527 = vst [vmem:[#allocation18_spill] sm:$0xff] %v7586_v49  ;;  %9528 = vst [vmem:[#allocation33_spill] sm:$0xff] %v7590_v37  ;;  %v2224_v23 = vrot.slane %v2124_v50, 7  ;;  %v2225_v9 = vrot.slane %v2125_v41, 7  ;;  %v4979_v16 = vpack.i.bf16 %v7583_v13, %v7586_v49  ;;  %v2147_v34 = vmax.f32 %v7384_v35, 0.0 }
 0x2ad   : > { %v7596_v12 = vsel %vm278_vm0, %v2178_v62, %v7291_v61  ;;  %v2169_v45 = vrot.slane %v2126_v60, 1  ;;  %v9530_v28 = vmax.f32 %v7313_v40, 0.0  ;;  %v9531_v1 = vmax.f32 %v7333_v25, 0.0 }
 0x2ae   : > { %9529 = vst [vmem:[#allocation35_spill] sm:$0xff] %v7596_v12  ;;  %v9532_v61 = vmax.f32 %v7339_v17, 0.0  ;;  %v9533_v58 = vmax.f32 %v7345_v6, 0.0  ;;  %v9534_v50 = vmax.f32 %v7353_v42, 0.0  ;;  %v2175_v27 = vrot.slane %v2138_v36, 1  ;;  %4980 = vrot.lane.b32.xlu0 %v4979_v16, %s5621_s20  ;;  %4985 = vrot.lane.b32.xlu1 %v4979_v16, %s5624_s29 }
 0x2af   : > { %v2170_v54 = vrot.slane %v9530_v28, 1  ;;  %v2171_v30 = vrot.slane %v9531_v1, 1  ;;  %v2176_v35 = vrot.slane %v2140_v10, 1  ;;  %v2177_v13 = vrot.slane %v2142_v21, 1 }
 0x2b0   : > { %v2172_v55 = vrot.slane %v9532_v61, 1  ;;  %v2173_v62 = vrot.slane %v9533_v58, 1  ;;  %v2174_v12 = vrot.slane %v9534_v50, 1  ;;  %v7613_v49 = vrot.slane %v2146_v8, 1 }
 0x2b1   : > { %v2227_v40 = vrot.slane %v2126_v60, 7  ;;  %v2228_v28 = vrot.slane %v2127_v15, 7  ;;  %v7615_v25 = vrot.slane %v2146_v8, 7  ;;  %v7618_v17 = vsel %vm278_vm0, %v2224_v23, %v2225_v9 }
 0x2b2   : > { %9535 = vst [vmem:[#allocation26_spill] sm:$0xff] %v7613_v49  ;;  %9537 = vst [vmem:[#allocation43_spill] sm:$0xff] %v7618_v17  ;;  %v7621_v6 = vsel %vm278_vm0, %v2168_v48, %v2224_v23  ;;  %v7623_v1 = vrot.slane %v2147_v34, 7  ;;  %v9539_v42 = vmax.f32 %v7415_v14, 0.0  ;;  %v2311_v61 = vrot.slane %v2125_v41, 5 }
 0x2b3   : > { %9536 = vst [vmem:[#allocation25_spill] sm:$0xff] %v7615_v25  ;;  %9538 = vst [vmem:[#allocation22_spill] sm:$0xff] %v7621_v6  ;;  %v2312_v10 = vrot.slane %v2127_v15, 5  ;;  %v9540_v21 = vmax.f32 %v7330_v63, 0.0  ;;  %v9541_v60 = vmax.f32 %v7336_v4, 0.0  ;;  %v9542_v50 = vmax.f32 %v7342_v44, 0.0 }
 0x2b4   : > { %v2310_v36 = vrot.slane %v9539_v42, 5  ;;  %v9543_v25 = vmax.f32 %v7348_v0, 0.0  ;;  %v9544_v23 = vmax.f32 %v7356_v39, 0.0  ;;  %v9545_v14 = vmax.f32 %v7362_v29, 0.0 }
 0x2b5   : > { %v2313_v58 = vrot.slane %v9540_v21, 5  ;;  %v2314_v8 = vrot.slane %v9541_v60, 5  ;;  %v2315_v49 = vrot.slane %v9542_v50, 5  ;;  %v4989_v41 = vpack.i.bf16 %v7618_v17, %v7621_v6  ;;  %v9557_v60 = vld [vmem:[#allocation5_spill] sm:$0xff]  ;;  %v9558_v50 = vld [vmem:[#allocation6_spill] sm:$0xff] }
 0x2b6   : > { %v2316_v48 = vrot.slane %v9543_v25, 5  ;;  %v2317_v18 = vrot.slane %v9544_v23, 5  ;;  %v2318_v42 = vrot.slane %v9545_v14, 5  ;;  %v9546_v63 = vmax.f32 %v7368_v24, 0.0  ;;  %v9559_v14 = vld [vmem:[#allocation7_spill] sm:$0xff]  ;;  %v9563_v25 = vld [vmem:[#allocation10_spill] sm:$0xff] }
 0x2b7   : > { %v9547_v4 = vmax.f32 %v7374_v52, 0.0  ;;  %v7646_v44 = vsel %vm278_vm0, %v2227_v40, %v2228_v28  ;;  %v7649_v0 = vsel %vm278_vm0, %v2169_v45, %v2227_v40  ;;  %v2322_v39 = vrot.slane %v2147_v34, 5  ;;  %4990 = vrot.lane.b32.xlu0 %v4989_v41, %s5624_s29  ;;  %4995 = vrot.lane.b32.xlu1 %v4989_v41, %s5621_s20  ;;  %v9560_v41 = vld [vmem:[#allocation8_spill] sm:$0xff] }
 0x2b8   : > { %v2319_v15 = vrot.slane %v9546_v63, 5  ;;  %9548 = vst [vmem:[#allocation9_spill] sm:$0xff] %v7646_v44  ;;  %9549 = vst [vmem:[#allocation44_spill] sm:$0xff] %v7649_v0  ;;  %v2404_v29 = vrot.slane %v7409_v51, 1  ;;  %v7657_v24 = vsel %vm278_vm0, %v2170_v54, %v7465_v46  ;;  %v7662_v52 = vsel %vm278_vm0, %v2171_v30, %v7473_v26 }
 0x2b9   : > { %v2320_v21 = vrot.slane %v9547_v4, 5  ;;  %9550 = vst [vmem:[#allocation21_spill] sm:$0xff] %v7662_v52  ;;  %v7666_v45 = vsel %vm278_vm0, %v2172_v55, %v7481_v11  ;;  %v7670_v7 = vsel %vm278_vm0, %v2173_v62, %v7489_v53  ;;  %v7674_v34 = vsel %vm278_vm0, %v2174_v12, %v7497_v19 }
 0x2ba   : > { %9551 = vst [vmem:[#allocation32_spill] sm:$0xff] %v7666_v45  ;;  %9552 = vst [vmem:[#allocation24_spill] sm:$0xff] %v7670_v7  ;;  %v7678_v46 = vsel %vm278_vm0, %v2175_v27, %v7503_v56  ;;  %v7682_v26 = vsel %vm278_vm0, %v2176_v35, %v7509_v20  ;;  %v4999_v11 = vpack.i.bf16 %v7646_v44, %v7649_v0  ;;  %v2407_v63 = vrot.slane %v9560_v41, 1  ;;  %v9565_v35 = vld [vmem:[#allocation20_spill] sm:$0xff] }
 0x2bb   : > { %9553 = vst [vmem:[#allocation34_spill] sm:$0xff] %v7674_v34  ;;  %v7688_v30 = vsel %vm278_vm0, %v2177_v13, %v7515_v33  ;;  %v7692_v53 = vsel %vm278_vm0, %v7528_v3, %v2310_v36  ;;  %v7695_v19 = vsel %vm278_vm0, %v2225_v9, %v2311_v61  ;;  %v7698_v27 = vsel %vm278_vm0, %v2228_v28, %v2312_v10  ;;  %v9564_v36 = vld [vmem:[#allocation16_spill] sm:$0xff]  ;;  %v9567_v9 = vld [vmem:[#allocation23_spill] sm:$0xff] }
 0x2bc   : > { %9554 = vst [vmem:[#allocation38_spill] sm:$0xff] %v7692_v53  ;;  %9555 = vst [vmem:[#allocation31_spill] sm:$0xff] %v7695_v19  ;;  %v7703_v56 = vsel %vm278_vm0, %v7469_v22, %v2313_v58  ;;  %v7707_v33 = vsel %vm278_vm0, %v7477_v47, %v2314_v8  ;;  %v7711_v3 = vsel %vm278_vm0, %v7485_v59, %v2315_v49  ;;  %5000 = vrot.lane.b32.xlu0 %v4999_v11, %s5621_s20  ;;  %v9566_v58 = vld [vmem:[#allocation18_spill] sm:$0xff] }
 0x2bd   : > { %v7715_v20 = vsel %vm278_vm0, %v7493_v57, %v2316_v48  ;;  %v7720_v13 = vsel %vm278_vm0, %v7501_v32, %v2317_v18  ;;  %v7724_v22 = vsel %vm278_vm0, %v7507_v43, %v2318_v42  ;;  %v7728_v47 = vsel %vm278_vm0, %v7513_v38, %v2319_v15  ;;  %5005 = vrot.lane.b32.xlu1 %v4999_v11, %s5624_s29  ;;  %v9561_v15 = vld [vmem:[#allocation13_spill] sm:$0xff] }
 0x2be   : > { %v7732_v59 = vsel %vm278_vm0, %v7519_v5, %v2320_v21  ;;  %v7736_v57 = vsel %vm278_vm0, %v7623_v1, %v2322_v39  ;;  %v2414_v49 = vrot.slane %v7590_v37, 1  ;;  %v5009_v18 = vpack.i.bf16 %v7533_v2, %v7657_v24  ;;  %v9562_v39 = vld [vmem:[#allocation14_spill] sm:$0xff]  ;;  %v9569_v38 = vld [vmem:[#allocation41_spill] sm:$0xff] }
 0x2bf   : > { %9556 = vst [vmem:[#allocation12_spill] sm:$0xff] %v7736_v57  ;;  %v2419_v32 = vrot.slane %v7692_v53, 1  ;;  %v2424_v43 = vrot.slane %v7695_v19, 1  ;;  %v5019_v61 = vpack.i.bf16 %v7538_v31, %v7662_v52  ;;  %v2401_v8 = vrot.slane %v9557_v60, 1 }
 0x2c0   : > { %5010 = vrot.lane.b32.xlu0 %v5009_v18, %s5624_s29  ;;  %v2402_v48 = vrot.slane %v9558_v50, 1  ;;  %v2406_v42 = vrot.slane %v9559_v14, 1  ;;  %v2409_v4 = vrot.slane %v9561_v15, 1  ;;  %v2411_v40 = vrot.slane %v9562_v39, 1 }
 0x2c1   : > { %v2412_v11 = vrot.slane %v9563_v25, 1  ;;  %v5029_v28 = vpack.i.bf16 %v9564_v36, %v7666_v45  ;;  %5015 = vrot.lane.b32.xlu1 %v5009_v18, %s5621_s20  ;;  %v5039_v62 = vpack.i.bf16 %v9565_v35, %v7670_v7  ;;  %v2416_v16 = vrot.slane %v9566_v58, 1 }
 0x2c2   : > { %v2403_v21 = vsel %vm468_vm1, %v2401_v8, %v2402_v48  ;;  %v2405_v55 = vsel %vm468_vm1, %v2402_v48, %v2404_v29  ;;  %v2408_v10 = vsel %vm468_vm1, %v2406_v42, %v2407_v63  ;;  %v2410_v23 = vsel %vm468_vm1, %v2407_v63, %v2409_v4  ;;  %v9568_v29 = vld [vmem:[#allocation19_spill] sm:$0xff]  ;;  %v9570_v63 = vld [vmem:[#allocation4_spill] sm:$0xff] }
 0x2c3   : > { %v2417_v12 = vrot.slane %v9567_v9, 1  ;;  %v2413_v18 = vsel %vm468_vm1, %v2411_v40, %v2412_v11  ;;  %v2415_v5 = vsel %vm468_vm1, %v2412_v11, %v2414_v49  ;;  %v2421_v8 = vrot.slane %v7621_v6, 1 }
 0x2c4   : > { %5020 = vrot.lane.b32.xlu0 %v5019_v61, %s5621_s20  ;;  %v2422_v54 = vrot.slane %v7618_v17, 1  ;;  %v5049_v48 = vpack.i.bf16 %v9568_v29, %v7674_v34  ;;  %v7797_v42 = vpack.i.bf16 %v9569_v38, %v7678_v46  ;;  %v7802_v4 = vpack.i.bf16 %v9570_v63, %v7682_v26 }
 0x2c5   : > { %5025 = vrot.lane.b32.xlu1 %v5019_v61, %s5624_s29  ;;  %v7804_v40 = vpack.i.bf16 %v2405_v55, %v2403_v21  ;;  %v7807_v49 = vpack.i.bf16 %v2410_v23, %v2408_v10  ;;  %v7809_v11 = vpack.i.bf16 %v2415_v5, %v2413_v18  ;;  %v2418_v9 = vsel %vm468_vm1, %v2416_v16, %v2417_v12 }
 0x2c6   : > { %9571 = vst [vmem:[#allocation45_spill] sm:$0xff] %v7802_v4  ;;  %v2420_v58 = vsel %vm468_vm1, %v2417_v12, %v2419_v32  ;;  %v2423_v53 = vsel %vm468_vm1, %v2421_v8, %v2422_v54  ;;  %v2425_v61 = vsel %vm468_vm1, %v2422_v54, %v2424_v43  ;;  %v2426_v17 = vrot.slane %v7649_v0, 1 }
 0x2c7   : > { %v2427_v6 = vrot.slane %v7646_v44, 1  ;;  %v2431_v55 = vrot.slane %v7657_v24, 1  ;;  %v2432_v21 = vrot.slane %v7533_v2, 1  ;;  %v2436_v10 = vrot.slane %v7662_v52, 1 }
 0x2c8   : > { %5030 = vrot.lane.b32.xlu0 %v5029_v28, %s5624_s29  ;;  %v2437_v5 = vrot.slane %v7538_v31, 1  ;;  %v2441_v32 = vrot.slane %v7666_v45, 1  ;;  %v2442_v12 = vrot.slane %v9564_v36, 1  ;;  %v2446_v43 = vrot.slane %v7670_v7, 1 }
 0x2c9   : > { %5035 = vrot.lane.b32.xlu1 %v5029_v28, %s5621_s20  ;;  %v2447_v54 = vrot.slane %v9565_v35, 1  ;;  %v7827_v16 = vpack.i.bf16 %v2420_v58, %v2418_v9  ;;  %v7829_v23 = vpack.i.bf16 %v2425_v61, %v2423_v53  ;;  %v2451_v18 = vrot.slane %v7674_v34, 1 }
 0x2ca   : > { %v2452_v8 = vrot.slane %v9568_v29, 1  ;;  %v2428_v28 = vsel %vm468_vm1, %v2426_v17, %v2427_v6  ;;  %v9572_v37 = vrot.slane %v7698_v27, 1  ;;  %v2456_v19 = vrot.slane %v7678_v46, 1 }
 0x2cb   : > { %v2457_v41 = vrot.slane %v9569_v38, 1  ;;  %v2433_v14 = vsel %vm468_vm1, %v2431_v55, %v2432_v21  ;;  %v9573_v9 = vrot.slane %v7703_v56, 1  ;;  %v2438_v58 = vsel %vm468_vm1, %v2436_v10, %v2437_v5 }
 0x2cc   : > { %5040 = vrot.lane.b32.xlu0 %v5039_v62, %s5621_s20  ;;  %v2430_v15 = vsel %vm468_vm1, %v2427_v6, %v9572_v37  ;;  %v9574_v61 = vrot.slane %v7707_v33, 1  ;;  %v2443_v37 = vsel %vm468_vm1, %v2441_v32, %v2442_v12  ;;  %v9575_v6 = vrot.slane %v7711_v3, 1 }
 0x2cd   : > { %v2435_v53 = vsel %vm468_vm1, %v2432_v21, %v9573_v9  ;;  %5045 = vrot.lane.b32.xlu1 %v5039_v62, %s5624_s29  ;;  %v2448_v55 = vsel %vm468_vm1, %v2446_v43, %v2447_v54  ;;  %v9576_v39 = vrot.slane %v7715_v20, 1  ;;  %v2453_v10 = vsel %vm468_vm1, %v2451_v18, %v2452_v8 }
 0x2ce   : > { %v2440_v17 = vsel %vm468_vm1, %v2437_v5, %v9574_v61  ;;  %v2445_v25 = vsel %vm468_vm1, %v2442_v12, %v9575_v6  ;;  %v9577_v5 = vrot.slane %v7720_v13, 1  ;;  %v2461_v32 = vrot.slane %v7682_v26, 1 }
 0x2cf   : > { %v2450_v21 = vsel %vm468_vm1, %v2447_v54, %v9576_v39  ;;  %v2462_v9 = vrot.slane %v9570_v63, 1  ;;  %v7864_v12 = vpack.i.bf16 %v2430_v15, %v2428_v28  ;;  %v7866_v43 = vpack.i.bf16 %v2435_v53, %v2433_v14  ;;  %v9580_v28 = vld [vmem:[#allocation35_spill] sm:$0xff] }
 0x2d0   : > { %5050 = vrot.lane.b32.xlu0 %v5049_v48, %s5624_s29  ;;  %v2455_v62 = vsel %vm468_vm1, %v2452_v8, %v9577_v5  ;;  %v2458_v61 = vsel %vm468_vm1, %v2456_v19, %v2457_v41  ;;  %v9578_v39 = vrot.slane %v7724_v22, 1  ;;  %v7872_v6 = vpack.i.bf16 %v2440_v17, %v2438_v58  ;;  %v9579_v5 = vld [vmem:[#allocation42_spill] sm:$0xff]  ;;  %v9581_v53 = vld [vmem:[#allocation3_spill] sm:$0xff] }
 0x2d1   : > { %v7874_v18 = vpack.i.bf16 %v2445_v25, %v2443_v37  ;;  %v2466_v8 = vrot.slane %v7688_v30, 1  ;;  %v2467_v51 = vrot.slane %v9579_v5, 1  ;;  %5055 = vrot.lane.b32.xlu1 %v5049_v48, %s5621_s20  ;;  %v7879_v15 = vpack.i.bf16 %v2450_v21, %v2448_v55 }
 0x2d2   : > { %v2460_v54 = vsel %vm468_vm1, %v2457_v41, %v9578_v39  ;;  %v7881_v14 = vpack.i.bf16 %v2455_v62, %v2453_v10  ;;  %v2471_v19 = vrot.slane %v9580_v28, 1  ;;  %v2472_v57 = vrot.slane %v9581_v53, 1 }
 0x2d3   : > { %v7887_v41 = vpack.i.bf16 %v2460_v54, %v2458_v61  ;;  %v2463_v25 = vsel %vm468_vm1, %v2461_v32, %v2462_v9  ;;  %v9582_v58 = vrot.slane %v7728_v47, 1  ;;  %v2591_v37 = vrot.slane %v7649_v0, 2 }
 0x2d4   : > { %5060 = vrot.lane.b32.xlu0 %v7797_v42, %s5621_s20  ;;  %v2592_v55 = vrot.slane %v7646_v44, 2  ;;  %v2596_v21 = vrot.slane %v7657_v24, 2  ;;  %v2597_v10 = vrot.slane %v7533_v2, 2  ;;  %v2468_v62 = vsel %vm468_vm1, %v2466_v8, %v2467_v51 }
 0x2d5   : > { %v2465_v17 = vsel %vm468_vm1, %v2462_v9, %v9582_v58  ;;  %v9583_v61 = vrot.slane %v7732_v59, 1  ;;  %v2601_v39 = vrot.slane %v7662_v52, 2  ;;  %v2602_v9 = vrot.slane %v7538_v31, 2  ;;  %5065 = vrot.lane.b32.xlu1 %v7797_v42, %s5624_s29  ;;  %v9584_v42 = vld [vmem:[#allocation15_spill] sm:$0xff] }
 0x2d6   : > { %v2473_v54 = vsel %vm468_vm1, %v2471_v19, %v2472_v57  ;;  %v2606_v48 = vrot.slane %v7666_v45, 2  ;;  %v2612_v8 = vrot.slane %v9565_v35, 2  ;;  %v2617_v52 = vrot.slane %v9568_v29, 2 }
 0x2d7   : > { %v2470_v32 = vsel %vm468_vm1, %v2467_v51, %v9583_v61  ;;  %v2611_v51 = vrot.slane %v7670_v7, 2  ;;  %v2616_v61 = vrot.slane %v7674_v34, 2  ;;  %v9585_v31 = vrot.slane %v9584_v42, 1 }
 0x2d8   : > { %5070 = vrot.lane.b32.xlu0 %v7802_v4, %s5624_s29  ;;  %v2607_v4 = vrot.slane %v9564_v36, 2  ;;  %v2593_v58 = vsel %vm634_vm2, %v2591_v37, %v2592_v55  ;;  %v9586_v45 = vrot.slane %v7698_v27, 2  ;;  %v2598_v0 = vsel %vm634_vm2, %v2596_v21, %v2597_v10 }
 0x2d9   : > { %v2475_v19 = vsel %vm468_vm1, %v2472_v57, %v9585_v31  ;;  %v9587_v7 = vrot.slane %v7703_v56, 2  ;;  %v2603_v34 = vsel %vm634_vm2, %v2601_v39, %v2602_v9  ;;  %v2621_v29 = vrot.slane %v7678_v46, 2  ;;  %5075 = vrot.lane.b32.xlu1 %v7804_v40, %s5619_s18 }
 0x2da   : > { %v2595_v36 = vsel %vm634_vm2, %v2592_v55, %v9586_v45  ;;  %v2622_v44 = vrot.slane %v9569_v38, 2  ;;  %v9588_v31 = vrot.slane %v7707_v33, 2  ;;  %v2608_v45 = vsel %vm634_vm2, %v2606_v48, %v2607_v4 }
 0x2db   : > { %v2600_v35 = vsel %vm634_vm2, %v2597_v10, %v9587_v7  ;;  %v2626_v57 = vrot.slane %v7682_v26, 2  ;;  %v2627_v56 = vrot.slane %v9570_v63, 2  ;;  %v9589_v7 = vrot.slane %v7711_v3, 2 }
 0x2dc   : > { %5080 = vrot.lane.b32.xlu0 %v7807_v49, %s5619_s18  ;;  %v2605_v27 = vsel %vm634_vm2, %v2602_v9, %v9588_v31  ;;  %v2613_v55 = vsel %vm634_vm2, %v2611_v51, %v2612_v8  ;;  %v9590_v21 = vrot.slane %v7715_v20, 2  ;;  %v2618_v10 = vsel %vm634_vm2, %v2616_v61, %v2617_v52 }
 0x2dd   : > { %v2610_v37 = vsel %vm634_vm2, %v2607_v4, %v9589_v7  ;;  %v9591_v48 = vrot.slane %v7720_v13, 2  ;;  %v2631_v9 = vrot.slane %v7688_v30, 2  ;;  %v2632_v31 = vrot.slane %v9579_v5, 2  ;;  %5085 = vrot.lane.b32.xlu1 %v7809_v11, %s5619_s18 }
 0x2de   : > { %v2615_v33 = vsel %vm634_vm2, %v2612_v8, %v9590_v21  ;;  %v2623_v3 = vsel %vm634_vm2, %v2621_v29, %v2622_v44  ;;  %v9592_v4 = vrot.slane %v7724_v22, 2  ;;  %v2628_v20 = vsel %vm634_vm2, %v2626_v57, %v2627_v56 }
 0x2df   : > { %v2620_v39 = vsel %vm634_vm2, %v2617_v52, %v9591_v48  ;;  %v9593_v8 = vrot.slane %v7728_v47, 2  ;;  %v2636_v52 = vrot.slane %v9580_v28, 2  ;;  %v2637_v29 = vrot.slane %v9581_v53, 2 }
 0x2e0   : > { %5090 = vrot.lane.b32.xlu0 %v7827_v16, %s5619_s18  ;;  %v2625_v51 = vsel %vm634_vm2, %v2622_v44, %v9592_v4  ;;  %v2633_v22 = vsel %vm634_vm2, %v2631_v9, %v2632_v31  ;;  %v9594_v44 = vrot.slane %v7732_v59, 2  ;;  %v7971_v7 = vpack.i.bf16 %v2595_v36, %v2593_v58 }
 0x2e1   : > { %v2630_v13 = vsel %vm634_vm2, %v2627_v56, %v9593_v8  ;;  %v7973_v57 = vpack.i.bf16 %v2600_v35, %v2598_v0  ;;  %5095 = vrot.lane.b32.xlu1 %v7829_v23, %s5619_s18  ;;  %v7977_v47 = vpack.i.bf16 %v2605_v27, %v2603_v34  ;;  %v7981_v56 = vpack.i.bf16 %v2610_v37, %v2608_v45 }
 0x2e2   : > { %v2635_v61 = vsel %vm634_vm2, %v2632_v31, %v9594_v44  ;;  %v7983_v21 = vpack.i.bf16 %v2615_v33, %v2613_v55  ;;  %v7985_v48 = vpack.i.bf16 %v2620_v39, %v2618_v10  ;;  %v7989_v59 = vpack.i.bf16 %v2625_v51, %v2623_v3  ;;  %v9598_v33 = vld [vmem:[#allocation25_spill] sm:$0xff]  ;;  %v9600_v10 = vld [vmem:[#allocation12_spill] sm:$0xff]  ;;  %v9605_v44 = vld [vmem:[#allocation10_spill] sm:$0xff] }
 0x2e3   : > { %v7991_v0 = vpack.i.bf16 %v2465_v17, %v2463_v25  ;;  %v2638_v34 = vsel %vm634_vm2, %v2636_v52, %v2637_v29  ;;  %v9595_v35 = vrot.slane %v9584_v42, 2  ;;  %v7999_v58 = vpack.i.bf16 %v2630_v13, %v2628_v20 }
 0x2e4   : > { %5100 = vrot.lane.b32.xlu0 %v7864_v12, %s5619_s18  ;;  %v8001_v27 = vpack.i.bf16 %v2470_v32, %v2468_v62  ;;  %v8003_v45 = vpack.i.bf16 %v2635_v61, %v2633_v22  ;;  %v8005_v37 = vpack.i.bf16 %v2475_v19, %v2473_v54  ;;  %v9596_v25 = vrot.slane %v9558_v50, 2  ;;  %v9599_v32 = vld [vmem:[#allocation26_spill] sm:$0xff] }
 0x2e5   : > { %5105 = vrot.lane.b32.xlu1 %v7866_v43, %s5619_s18  ;;  %v2640_v36 = vsel %vm634_vm2, %v2637_v29, %v9595_v35  ;;  %v9597_v17 = vrot.slane %v9557_v60, 2  ;;  %v2259_v62 = vsel %vm278_vm0, %v9598_v33, %v7623_v1  ;;  %v2354_v54 = vsel %vm278_vm0, %v9599_v32, %v9598_v33  ;;  %v9601_v1 = vld [vmem:[#allocation11_spill] sm:$0xff]  ;;  %v9604_v29 = vld [vmem:[#allocation14_spill] sm:$0xff] }
 0x2e6   : > { %v8014_v42 = vpack.i.bf16 %v2640_v36, %v2638_v34  ;;  %v2830_v19 = vrot.slane %v2259_v62, 1  ;;  %v2832_v39 = vrot.slane %v9600_v10, 1  ;;  %v8025_v9 = vpack.i.bf16 %v2259_v62, %v2354_v54 }
 0x2e7   : > { %v2568_v55 = vsel %vm634_vm2, %v9597_v17, %v9596_v25  ;;  %v2829_v31 = vrot.slane %v2354_v54, 1  ;;  %v2930_v3 = vrot.slane %v2354_v54, 2  ;;  %v2931_v51 = vrot.slane %v2259_v62, 2  ;;  %v9606_v17 = vld [vmem:[#allocation7_spill] sm:$0xff]  ;;  %v9607_v62 = vld [vmem:[#allocation8_spill] sm:$0xff] }
 0x2e8   : > { %5110 = vrot.lane.b32.xlu0 %v7872_v6, %s5619_s18  ;;  %v2833_v4 = vsel %vm468_vm1, %v2830_v19, %v2832_v39  ;;  %v2933_v20 = vrot.slane %v9600_v10, 2  ;;  %v9602_v8 = vrot.slane %v9601_v1, 2  ;;  %v9603_v13 = vmov %v9596_v25  ;;  %v9609_v10 = vld [vmem:[#allocation31_spill] sm:$0xff] }
 0x2e9   : > { %5115 = vrot.lane.b32.xlu1 %v7874_v18, %s5619_s18  ;;  %v2576_v22 = vrot.slane %v9604_v29, 2  ;;  %v2577_v61 = vrot.slane %v9605_v44, 2  ;;  %v2831_v34 = vsel %vm468_vm1, %v2829_v31, %v2830_v19  ;;  %v2932_v36 = vsel %vm634_vm2, %v2930_v3, %v2931_v51 }
 0x2ea   : > { %v2570_v52 = vsel %vm634_vm2, %v9603_v13, %v9602_v8  ;;  %v8041_v35 = vpack.i.bf16 %v2833_v4, %v2831_v34  ;;  %v2934_v25 = vsel %vm634_vm2, %v2931_v51, %v2933_v20  ;;  %v2571_v33 = vrot.slane %v9606_v17, 2  ;;  %v9610_v8 = vld [vmem:[#allocation13_spill] sm:$0xff]  ;;  %v9613_v20 = vld [vmem:[#allocation22_spill] sm:$0xff]  ;;  %v9614_v34 = vld [vmem:[#allocation43_spill] sm:$0xff] }
 0x2eb   : > { %v2572_v32 = vrot.slane %v9607_v62, 2  ;;  %v8047_v54 = vpack.i.bf16 %v2934_v25, %v2932_v36  ;;  %v2589_v39 = vrot.slane %v9609_v10, 2  ;;  %v5149_v1 = vpack.i.bf16 %v2570_v52, %v2568_v55  ;;  %v9611_v4 = vld [vmem:[#allocation33_spill] sm:$0xff]  ;;  %v9615_v36 = vld [vmem:[#allocation38_spill] sm:$0xff] }
 0x2ec   : > { %5120 = vrot.lane.b32.xlu0 %v7879_v15, %s5619_s18  ;;  %v2574_v19 = vrot.slane %v9610_v8, 2  ;;  %v2578_v31 = vsel %vm634_vm2, %v2576_v22, %v2577_v61  ;;  %v9612_v3 = vrot.slane %v9611_v4, 2  ;;  %v2586_v13 = vrot.slane %v9613_v20, 2  ;;  %v9616_v8 = vld [vmem:[#allocation18_spill] sm:$0xff]  ;;  %v9617_v22 = vld [vmem:[#allocation23_spill] sm:$0xff]  ;;  %v9639_v20 = vld [vmem:[#allocation44_spill] sm:$0xff] }
 0x2ed   : > { %5125 = vrot.lane.b32.xlu1 %v7881_v14, %s5619_s18  ;;  %9608 = vst [vmem:[#allocation27_spill] sm:$0xff] %v8047_v54  ;;  %v2587_v29 = vrot.slane %v9614_v34, 2  ;;  %v2584_v25 = vrot.slane %v9615_v36, 2  ;;  %v2573_v55 = vsel %vm634_vm2, %v2571_v33, %v2572_v32  ;;  %v2581_v44 = vrot.slane %v9616_v8, 2 }
 0x2ee   : > { %v2580_v51 = vsel %vm634_vm2, %v2577_v61, %v9612_v3  ;;  %v2575_v52 = vsel %vm634_vm2, %v2572_v32, %v2574_v19  ;;  %v2582_v54 = vrot.slane %v9617_v22, 2 }
 0x2ef   : > { %v5159_v10 = vpack.i.bf16 %v2580_v51, %v2578_v31  ;;  %v2588_v61 = vsel %vm634_vm2, %v2586_v13, %v2587_v29  ;;  %v2590_v4 = vsel %vm634_vm2, %v2587_v29, %v2589_v39  ;;  %v5154_v3 = vpack.i.bf16 %v2575_v52, %v2573_v55  ;;  %v5572_v29 = vld [vmem:[%s9229_s2 + $0x10] ss:$0 sps:$4 sm:$0x33]   ;;  %v5574_v31 = vld [vmem:[%s9229_s2] sm:$0xff]  }
 0x2f0   : > { %5130 = vrot.lane.b32.xlu0 %v7887_v41, %s5619_s18  ;;  %v2583_v36 = vsel %vm634_vm2, %v2581_v44, %v2582_v54  ;;  %v2585_v33 = vsel %vm634_vm2, %v2582_v54, %v2584_v25  ;;  %v5169_v32 = vpack.i.bf16 %v2590_v4, %v2588_v61  ;;  %4322 = vmatprep.subr.msk.bf16.mxu1 %vm1710_vm3, %v5572_v29  ;;  %v3633_v44 = vsel %vm1710_vm3, %v5572_v29, 0  ;;  %v5573_v54 = vld [vmem:[%s9229_s2 + $0x8] sm:$0xff]  }
 0x2f1   : > { %5135 = vrot.lane.b32.xlu1 %v7991_v0, %s5619_s18  ;;  %v5164_v19 = vpack.i.bf16 %v2585_v33, %v2583_v36  ;;  %4284 = vmatpush3.bf16.msra.mxu1 %v3633_v44 }
 0x2f2   : > { %4285 = vmatprep.subr.bf16.mxu1 %v5573_v54 }
 0x2f4   : > { %5140 = vrot.lane.b32.xlu0 %v8001_v27, %s5619_s18 }
 0x2f5   : > { %5145 = vrot.lane.b32.xlu1 %v8005_v37, %s5619_s18  ;;  %4286 = vmatpush3.bf16.msra.mxu1 %v5573_v54 }
 0x2f6   : > { %4287 = vmatprep.subr.bf16.mxu1 %v5574_v31 }
 0x2f8   : > { %5150 = vrot.lane.b32.xlu0 %v5149_v1, %s5620_s19 }
 0x2f9   : > { %5155 = vrot.lane.b32.xlu1 %v5154_v3, %s5620_s19  ;;  %4288 = vmatpush3.bf16.msra.mxu1 %v5574_v31 }
 0x2fc   : > { %5160 = vrot.lane.b32.xlu0 %v5159_v10, %s5620_s19 }
 0x2fd   : > { %5165 = vrot.lane.b32.xlu1 %v5164_v19, %s5620_s19 }
 0x300   : > { %5170 = vrot.lane.b32.xlu0 %v5169_v32, %s5620_s19 }
 0x301   : > { %5175 = vrot.lane.b32.xlu1 %v7971_v7, %s5620_s19 }
 0x304   : > { %5180 = vrot.lane.b32.xlu0 %v7973_v57, %s5620_s19 }
 0x305   : > { %5185 = vrot.lane.b32.xlu1 %v7977_v47, %s5620_s19 }
 0x307   : > { %v8105_v39 = vpop.permute.xlu0 %4960 }
 0x308   : > { %5190 = vrot.lane.b32.xlu0 %v7981_v56, %s5620_s19 }
 0x309   : > { %5195 = vrot.lane.b32.xlu1 %v7983_v21, %s5620_s19 }
 0x30c   : > { %5200 = vrot.lane.b32.xlu0 %v7985_v48, %s5620_s19 }
 0x30d   : > { %5205 = vrot.lane.b32.xlu1 %v7989_v59, %s5620_s19 }
 0x30e   : > { %v8113_v51 = vpop.permute.xlu1 %4955 }
 0x310   : > { %5210 = vrot.lane.b32.xlu0 %v7999_v58, %s5620_s19 }
 0x311   : > { %5215 = vrot.lane.b32.xlu1 %v8003_v45, %s5620_s19  ;;  %v8115_v13 = vpop.permute.xlu0 %4970 }
 0x314   : > { %5220 = vrot.lane.b32.xlu0 %v8014_v42, %s5620_s19 }
 0x315   : > { %5225 = vrot.lane.b32.xlu1 %v7807_v49, %s5622_s21  ;;  %v8122_v49 = vpop.permute.xlu1 %4965 }
 0x318   : > { %5230 = vrot.lane.b32.xlu0 %v7804_v40, %s5622_s21 }
 0x319   : > { %5235 = vrot.lane.b32.xlu1 %v5154_v3, %s5623_s26  ;;  %v8130_v55 = vpop.permute.xlu1 %4975 }
 0x31c   : > { %5240 = vrot.lane.b32.xlu0 %v5149_v1, %s5623_s26 }
 0x31d   : > { %5245 = vrot.lane.b32.xlu1 %v7804_v40, %s5625_s30 }
 0x320   : > { %5250 = vrot.lane.b32.xlu0 %v7809_v11, %s5625_s30  ;;  %v8125_v25 = vpop.permute.xlu0 %4980  ;;  %v8137_v40 = vpop.permute.xlu1 %4985 }
 0x321   : > { %5255 = vrot.lane.b32.xlu1 %v5149_v1, %s5626_s4 }
 0x324   : > { %5260 = vrot.lane.b32.xlu0 %v5159_v10, %s5626_s4 }
 0x325   : > { %5265 = vrot.lane.b32.xlu1 %v7809_v11, %s5622_s21 }
 0x328   : > { %5270 = vrot.lane.b32.xlu0 %v7827_v16, %s5622_s21 }
 0x329   : > { %v8132_v52 = vpop.permute.xlu0 %4990  ;;  %5275 = vrot.lane.b32.xlu1 %v5159_v10, %s5623_s26  ;;  %v8144_v1 = vpop.permute.xlu1 %4995 }
 0x32a   : > { %9619 = vst [vmem:[#allocation39_spill] sm:$0xff] %v8144_v1 }
 0x32c   : > { %5280 = vrot.lane.b32.xlu0 %v5164_v19, %s5623_s26 }
 0x32d   : > { %5285 = vrot.lane.b32.xlu1 %v7827_v16, %s5625_s30 }
 0x32e   : > { %v8139_v61 = vpop.permute.xlu0 %5000 }
 0x32f   : > { %9618 = vst [vmem:[#allocation46_spill] sm:$0xff] %v8139_v61  ;;  %v8151_v11 = vpop.permute.xlu1 %5005  ;;  %v8287_v61 = vpack.i.bf16 %v9581_v53, %v9580_v28 }
 0x330   : > { %5290 = vrot.lane.b32.xlu0 %v7829_v23, %s5625_s30  ;;  %9621 = vst [vmem:[#allocation37_spill] sm:$0xff] %v8151_v11 }
 0x331   : > { %5295 = vrot.lane.b32.xlu1 %v5164_v19, %s5626_s4 }
 0x332   : > { %v8146_v4 = vpop.permute.xlu0 %5010 }
 0x333   : > { %9620 = vst [vmem:[#allocation36_spill] sm:$0xff] %v8146_v4  ;;  %v8158_v10 = vpop.permute.xlu1 %5015  ;;  %v8275_v4 = vpack.i.bf16 %v9579_v5, %v7688_v30 }
 0x334   : > { %5300 = vrot.lane.b32.xlu0 %v5169_v32, %s5626_s4  ;;  %9623 = vst [vmem:[#allocation30_spill] sm:$0xff] %v8158_v10 }
 0x335   : > { %5305 = vrot.lane.b32.xlu1 %v7829_v23, %s5622_s21 }
 0x336   : > { %v8153_v3 = vpop.permute.xlu0 %5020 }
 0x337   : > { %9622 = vst [vmem:[#allocation2_spill] sm:$0xff] %v8153_v3  ;;  %v8166_v16 = vpop.permute.xlu1 %5025 }
 0x338   : > { %5310 = vrot.lane.b32.xlu0 %v7864_v12, %s5622_s21  ;;  %9625 = vst [vmem:[#allocation29_spill] sm:$0xff] %v8166_v16 }
 0x339   : > { %5315 = vrot.lane.b32.xlu1 %v5169_v32, %s5623_s26 }
 0x33a   : > { %v8160_v36 = vpop.permute.xlu0 %5030 }
 0x33b   : > { %9624 = vst [vmem:[#allocation40_spill] sm:$0xff] %v8160_v36  ;;  %v8173_v19 = vpop.permute.xlu1 %5035 }
 0x33c   : > { %5320 = vrot.lane.b32.xlu0 %v7971_v7, %s5623_s26  ;;  %9627 = vst [vmem:[#allocation5_spill] sm:$0xff] %v8173_v19 }
 0x33d   : > { %5325 = vrot.lane.b32.xlu1 %v7864_v12, %s5625_s30 }
 0x33e   : > { %v8168_v33 = vpop.permute.xlu0 %5040 }
 0x33f   : > { %9626 = vst [vmem:[#allocation28_spill] sm:$0xff] %v8168_v33  ;;  %v8181_v23 = vpop.permute.xlu1 %5045 }
 0x340   : > { %5330 = vrot.lane.b32.xlu0 %v7866_v43, %s5625_s30  ;;  %9629 = vst [vmem:[#allocation41_spill] sm:$0xff] %v8181_v23 }
 0x341   : > { %5335 = vrot.lane.b32.xlu1 %v7971_v7, %s5626_s4 }
 0x342   : > { %v8175_v29 = vpop.permute.xlu0 %5050 }
 0x343   : > { %9628 = vst [vmem:[#allocation6_spill] sm:$0xff] %v8175_v29  ;;  %v8189_v32 = vpop.permute.xlu1 %5055 }
 0x344   : > { %5340 = vrot.lane.b32.xlu0 %v7973_v57, %s5626_s4  ;;  %9631 = vst [vmem:[#allocation42_spill] sm:$0xff] %v8189_v32 }
 0x345   : > { %5345 = vrot.lane.b32.xlu1 %v7866_v43, %s5622_s21 }
 0x346   : > { %v8183_v44 = vpop.permute.xlu0 %5060 }
 0x347   : > { %9630 = vst [vmem:[#allocation4_spill] sm:$0xff] %v8183_v44  ;;  %v8197_v12 = vpop.permute.xlu1 %5065 }
 0x348   : > { %5350 = vrot.lane.b32.xlu0 %v7872_v6, %s5622_s21  ;;  %9633 = vst [vmem:[#allocation3_spill] sm:$0xff] %v8197_v12 }
 0x349   : > { %5355 = vrot.lane.b32.xlu1 %v7973_v57, %s5623_s26 }
 0x34a   : > { %v8191_v54 = vpop.permute.xlu0 %5070 }
 0x34b   : > { %9632 = vst [vmem:[#allocation35_spill] sm:$0xff] %v8191_v54  ;;  %v8205_v7 = vpop.permute.xlu1 %5075 }
 0x34c   : > { %5360 = vrot.lane.b32.xlu0 %v7977_v47, %s5623_s26 }
 0x34d   : > { %5365 = vrot.lane.b32.xlu1 %v7872_v6, %s5625_s30 }
 0x34e   : > { %v8199_v31 = vpop.permute.xlu0 %5080 }
 0x34f   : > { %v8213_v43 = vpop.permute.xlu1 %5085 }
 0x350   : > { %5370 = vrot.lane.b32.xlu0 %v7874_v18, %s5625_s30 }
 0x351   : > { %5375 = vrot.lane.b32.xlu1 %v7977_v47, %s5626_s4 }
 0x352   : > { %v8207_v32 = vpop.permute.xlu0 %5090 }
 0x353   : > { %9634 = vst [vmem:[#allocation15_spill] sm:$0xff] %v8207_v32  ;;  %v8219_v57 = vpop.permute.xlu1 %5095 }
 0x354   : > { %5380 = vrot.lane.b32.xlu0 %v7981_v56, %s5626_s4  ;;  %9635 = vst [vmem:[#allocation25_spill] sm:$0xff] %v8219_v57  ;;  %v9640_v57 = vld [vmem:[#allocation16_spill] sm:$0xff] }
 0x355   : > { %5385 = vrot.lane.b32.xlu1 %v7874_v18, %s5622_s21 }
 0x356   : > { %v5101_v12 = vpop.permute.xlu0 %5100 }
 0x357   : > { %v5106_v6 = vpop.permute.xlu1 %5105  ;;  %v5103_v10 = vunpack.i.h.bf16 %v5101_v12  ;;  %v5102_v3 = vunpack.i.l.bf16 %v5101_v12 }
 0x358   : > { %5390 = vrot.lane.b32.xlu0 %v7879_v15, %s5622_s21  ;;  %v5107_v36 = vunpack.i.l.bf16 %v5106_v6 }
 0x359   : > { %5395 = vrot.lane.b32.xlu1 %v7981_v56, %s5623_s26 }
 0x35a   : > { %v8221_v54 = vpop.permute.xlu0 %5110  ;;  %v3313_v12 = vsel %vm1370_vm4, %v7657_v24, %v5107_v36 }
 0x35b   : > { %v5116_v47 = vpop.permute.xlu1 %5115  ;;  %v5113_v24 = vunpack.i.h.bf16 %v8221_v54  ;;  %v5112_v36 = vunpack.i.l.bf16 %v8221_v54 }
 0x35c   : > { %5400 = vrot.lane.b32.xlu0 %v7983_v21, %s5623_s26  ;;  %v5118_v8 = vunpack.i.h.bf16 %v5116_v47  ;;  %v5117_v22 = vunpack.i.l.bf16 %v5116_v47 }
 0x35d   : > { %5405 = vrot.lane.b32.xlu1 %v7879_v15, %s5625_s30 }
 0x35e   : > { %v8227_v44 = vpop.permute.xlu0 %5120 }
 0x35f   : > { %v8239_v18 = vpop.permute.xlu1 %5125 }
 0x360   : > { %5410 = vrot.lane.b32.xlu0 %v7881_v14, %s5625_s30 }
 0x361   : > { %5415 = vrot.lane.b32.xlu1 %v7983_v21, %s5626_s4 }
 0x362   : > { %v8233_v23 = vpop.permute.xlu0 %5130 }
 0x363   : > { %v8247_v56 = vpop.permute.xlu1 %5135 }
 0x364   : > { %5420 = vrot.lane.b32.xlu0 %v7985_v48, %s5626_s4 }
 0x365   : > { %5425 = vrot.lane.b32.xlu1 %v7881_v14, %s5622_s21  ;;  %v5108_v14 = vunpack.i.h.bf16 %v5106_v6 }
 0x366   : > { %v8241_v29 = vpop.permute.xlu0 %5140 }
 0x367   : > { %v8255_v15 = vpop.permute.xlu1 %5145  ;;  %v3314_v6 = vsel %vm1370_vm4, %v7533_v2, %v5108_v14 }
 0x368   : > { %5430 = vrot.lane.b32.xlu0 %v7887_v41, %s5622_s21 }
 0x369   : > { %5435 = vrot.lane.b32.xlu1 %v7985_v48, %s5623_s26 }
 0x36a   : > { %v8249_v19 = vpop.permute.xlu0 %5150 }
 0x36b   : > { %v8263_v21 = vpop.permute.xlu1 %5155 }
 0x36c   : > { %5440 = vrot.lane.b32.xlu0 %v7989_v59, %s5623_s26 }
 0x36d   : > { %5445 = vrot.lane.b32.xlu1 %v7887_v41, %s5625_s30 }
 0x36e   : > { %v8257_v33 = vpop.permute.xlu0 %5160 }
 0x36f   : > { %v8271_v11 = vpop.permute.xlu1 %5165 }
 0x370   : > { %5450 = vrot.lane.b32.xlu0 %v7991_v0, %s5625_s30  ;;  %9637 = vst [vmem:[#allocation12_spill] sm:$0xff] %v8271_v11  ;;  %v9638_v11 = vld [vmem:[#allocation9_spill] sm:$0xff] }
 0x371   : > { %5455 = vrot.lane.b32.xlu1 %v7989_v59, %s5626_s4  ;;  %v3312_v47 = vsel %vm1370_vm4, %v9638_v11, %v5103_v10  ;;  %v3311_v59 = vsel %vm1370_vm4, %v9639_v20, %v5102_v3  ;;  %v3318_v11 = vsel %vm1370_vm4, %v9640_v57, %v5118_v8  ;;  %v9641_v10 = vld [vmem:[#allocation32_spill] sm:$0xff]  ;;  %v9642_v3 = vld [vmem:[#allocation45_spill] sm:$0xff]  ;;  %v5123_v8 = vunpack.i.h.bf16 %v8227_v44 }
 0x372   : > { %v8265_v16 = vpop.permute.xlu0 %5170  ;;  %v3317_v20 = vsel %vm1370_vm4, %v9641_v10, %v5117_v22  ;;  %v5122_v22 = vunpack.i.l.bf16 %v8227_v44  ;;  %v5137_v44 = vunpack.i.l.bf16 %v8247_v56 }
 0x373   : > { %9636 = vst [vmem:[#allocation26_spill] sm:$0xff] %v8265_v16 }
 0x374   : > { %5460 = vrot.lane.b32.xlu0 %v7999_v58, %s5626_s4 }
 0x375   : > { %5465 = vrot.lane.b32.xlu1 %v9642_v3, %s5621_s20 }
 0x376   : > { %v5181_v48 = vpop.permute.xlu0 %5180 }
 0x377   : > { %v5183_v41 = vunpack.i.h.bf16 %v5181_v48  ;;  %v5182_v1 = vunpack.i.l.bf16 %v5181_v48  ;;  %v5176_v48 = vpop.permute.xlu1 %5175 }
 0x378   : > { %5470 = vrot.lane.b32.xlu0 %v8275_v4, %s5621_s20  ;;  %v5178_v14 = vunpack.i.h.bf16 %v5176_v48  ;;  %v5177_v16 = vunpack.i.l.bf16 %v5176_v48 }
 0x379   : > { %v8294_v34 = vsel %vm1401_vm5, %v3314_v6, %v5183_v41  ;;  %v8297_v2 = vsel %vm1401_vm5, %v3313_v12, %v5182_v1  ;;  %v5128_v1 = vunpack.i.h.bf16 %v8239_v18  ;;  %v5127_v12 = vunpack.i.l.bf16 %v8239_v18  ;;  %v9646_v18 = vld [vmem:[#allocation17_spill] sm:$0xff]  ;;  %5475 = vrot.lane.b32.xlu1 %v7991_v0, %s5622_s21 }
 0x37a   : > { %v5191_v32 = vpop.permute.xlu0 %5190  ;;  %v8310_v54 = vsel %vm1401_vm5, %v3311_v59, %v5177_v16  ;;  %v8313_v48 = vsel %vm1401_vm5, %v3312_v47, %v5178_v14  ;;  %v3316_v16 = vsel %vm1370_vm4, %v9646_v18, %v5113_v24  ;;  %v9647_v59 = vld [vmem:[#allocation21_spill] sm:$0xff]  ;;  %v9651_v18 = vld [vmem:[#allocation24_spill] sm:$0xff] }
 0x37b   : > { %v5193_v41 = vunpack.i.h.bf16 %v5191_v32  ;;  %v5192_v6 = vunpack.i.l.bf16 %v5191_v32  ;;  %9643 = vst [vmem:[#allocation11_spill] sm:$0xff] %v8310_v54  ;;  %9644 = vst [vmem:[#allocation7_spill] sm:$0xff] %v8313_v48  ;;  %v5186_v57 = vpop.permute.xlu1 %5185  ;;  %v3315_v47 = vsel %vm1370_vm4, %v9647_v59, %v5112_v36  ;;  %v5138_v54 = vunpack.i.h.bf16 %v8247_v56  ;;  %v9650_v56 = vld [vmem:[#allocation20_spill] sm:$0xff] }
 0x37c   : > { %5480 = vrot.lane.b32.xlu0 %v8001_v27, %s5622_s21  ;;  %v5188_v14 = vunpack.i.h.bf16 %v5186_v57  ;;  %v5187_v3 = vunpack.i.l.bf16 %v5186_v57  ;;  %v3320_v0 = vsel %vm1370_vm4, %v9650_v56, %v5123_v8 }
 0x37d   : > { %v8320_v32 = vsel %vm1401_vm5, %v3318_v11, %v5193_v41  ;;  %v8323_v10 = vsel %vm1401_vm5, %v3317_v20, %v5192_v6  ;;  %v9648_v20 = vld [vmem:[#allocation19_spill] sm:$0xff]  ;;  %v3326_v8 = vsel %vm1370_vm4, %v9570_v63, %v5138_v54  ;;  %5485 = vrot.lane.b32.xlu1 %v7999_v58, %s5623_s26 }
 0x37e   : > { %9645 = vst [vmem:[#allocation8_spill] sm:$0xff] %v8320_v32  ;;  %v5201_v48 = vpop.permute.xlu0 %5200  ;;  %v3322_v6 = vsel %vm1370_vm4, %v9648_v20, %v5128_v1  ;;  %v9649_v32 = vld [vmem:[#allocation34_spill] sm:$0xff]  ;;  %v8338_v36 = vsel %vm1401_vm5, %v3315_v47, %v5187_v3  ;;  %v8341_v57 = vsel %vm1401_vm5, %v3316_v16, %v5188_v14  ;;  %v5132_v16 = vunpack.i.l.bf16 %v8233_v23 }
 0x37f   : > { %v5203_v11 = vunpack.i.h.bf16 %v5201_v48  ;;  %v5202_v41 = vunpack.i.l.bf16 %v5201_v48  ;;  %v3321_v24 = vsel %vm1370_vm4, %v9649_v32, %v5127_v12  ;;  %v3319_v48 = vsel %vm1370_vm4, %v9651_v18, %v5122_v22  ;;  %v5196_v59 = vpop.permute.xlu1 %5195 }
 0x380   : > { %5490 = vrot.lane.b32.xlu0 %v8003_v45, %s5623_s26  ;;  %v5133_v32 = vunpack.i.h.bf16 %v8233_v23  ;;  %v5198_v47 = vunpack.i.h.bf16 %v5196_v59  ;;  %v5197_v14 = vunpack.i.l.bf16 %v5196_v59  ;;  %v3325_v22 = vsel %vm1370_vm4, %v7682_v26, %v5137_v44 }
 0x381   : > { %v8350_v1 = vsel %vm1401_vm5, %v3322_v6, %v5203_v11  ;;  %v8353_v12 = vsel %vm1401_vm5, %v3321_v24, %v5202_v41  ;;  %v5148_v41 = vunpack.i.h.bf16 %v8255_v15  ;;  %v5147_v6 = vunpack.i.l.bf16 %v8255_v15  ;;  %5495 = vrot.lane.b32.xlu1 %v8275_v4, %s5624_s29 }
 0x382   : > { %v5211_v3 = vpop.permute.xlu0 %5210  ;;  %v8366_v23 = vsel %vm1401_vm5, %v3319_v48, %v5197_v14  ;;  %v8369_v24 = vsel %vm1401_vm5, %v3320_v0, %v5198_v47  ;;  %v3324_v54 = vsel %vm1370_vm4, %v9569_v38, %v5133_v32  ;;  %v3323_v15 = vsel %vm1370_vm4, %v7678_v46, %v5132_v16 }
 0x383   : > { %v5213_v11 = vunpack.i.h.bf16 %v5211_v3  ;;  %v5212_v20 = vunpack.i.l.bf16 %v5211_v3  ;;  %v5206_v63 = vpop.permute.xlu1 %5205  ;;  %v5143_v18 = vunpack.i.h.bf16 %v8241_v29  ;;  %v5142_v48 = vunpack.i.l.bf16 %v8241_v29 }
 0x384   : > { %5500 = vrot.lane.b32.xlu0 %v8287_v61, %s5624_s29  ;;  %v5208_v44 = vunpack.i.h.bf16 %v5206_v63  ;;  %v5207_v56 = vunpack.i.l.bf16 %v5206_v63  ;;  %v3330_v14 = vsel %vm1370_vm4, %v9581_v53, %v5148_v41  ;;  %v3329_v38 = vsel %vm1370_vm4, %v9580_v28, %v5147_v6 }
 0x385   : > { %v8374_v26 = vsel %vm1401_vm5, %v3326_v8, %v5213_v11  ;;  %v8377_v58 = vsel %vm1401_vm5, %v3325_v22, %v5212_v20  ;;  %v5083_v29 = vunpack.i.h.bf16 %v8199_v31  ;;  %v5082_v4 = vunpack.i.l.bf16 %v8199_v31  ;;  %5505 = vrot.lane.b32.xlu1 %v8001_v27, %s5625_s30 }
 0x386   : > { %v5221_v0 = vpop.permute.xlu0 %5220  ;;  %v8392_v46 = vsel %vm1401_vm5, %v3323_v15, %v5207_v56  ;;  %v8395_v32 = vsel %vm1401_vm5, %v3324_v54, %v5208_v44  ;;  %v5158_v28 = vunpack.i.h.bf16 %v8263_v21  ;;  %v5157_v8 = vunpack.i.l.bf16 %v8263_v21 }
 0x387   : > { %v5223_v59 = vunpack.i.h.bf16 %v5221_v0  ;;  %v5222_v47 = vunpack.i.l.bf16 %v5221_v0  ;;  %v5216_v16 = vpop.permute.xlu1 %5215  ;;  %v5078_v41 = vunpack.i.h.bf16 %v8205_v7  ;;  %v5077_v6 = vunpack.i.l.bf16 %v8205_v7 }
 0x388   : > { %5510 = vrot.lane.b32.xlu0 %v8005_v37, %s5625_s30  ;;  %v5218_v22 = vunpack.i.h.bf16 %v5216_v16  ;;  %v5217_v11 = vunpack.i.l.bf16 %v5216_v16  ;;  %v3328_v31 = vsel %vm1370_vm4, %v9579_v5, %v5143_v18  ;;  %v3327_v63 = vsel %vm1370_vm4, %v7688_v30, %v5142_v48 }
 0x389   : > { %v8402_v3 = vsel %vm1401_vm5, %v3330_v14, %v5223_v59  ;;  %v8405_v53 = vsel %vm1401_vm5, %v3329_v38, %v5222_v47  ;;  %v5153_v54 = vunpack.i.h.bf16 %v8249_v19  ;;  %v5152_v21 = vunpack.i.l.bf16 %v8249_v19  ;;  %5515 = vrot.lane.b32.xlu1 %v8003_v45, %s5626_s4 }
 0x38a   : > { %v5231_v20 = vpop.permute.xlu0 %5230  ;;  %v8420_v15 = vsel %vm1401_vm5, %v3327_v63, %v5217_v11  ;;  %v8423_v44 = vsel %vm1401_vm5, %v3328_v31, %v5218_v22  ;;  %v4963_v5 = vunpack.i.h.bf16 %v8105_v39  ;;  %v4962_v30 = vunpack.i.l.bf16 %v8105_v39 }
 0x38b   : > { %v3304_v27 = vsel %vm1370_vm4, %v9607_v62, %v5083_v29  ;;  %v3303_v7 = vsel %vm1370_vm4, %v9606_v17, %v5082_v4  ;;  %v5226_v19 = vpop.permute.xlu1 %5225  ;;  %v5233_v18 = vunpack.i.h.bf16 %v5231_v20  ;;  %v5232_v48 = vunpack.i.l.bf16 %v5231_v20 }
 0x38c   : > { %5520 = vrot.lane.b32.xlu0 %v8014_v42, %s5626_s4  ;;  %v3333_v56 = vsel %vm1401_vm5, %v3303_v7, %v5157_v8  ;;  %v3334_v0 = vsel %vm1401_vm5, %v3304_v27, %v5158_v28  ;;  %v3302_v47 = vsel %vm1370_vm4, %v9558_v50, %v5078_v41  ;;  %v3301_v39 = vsel %vm1370_vm4, %v9557_v60, %v5077_v6 }
 0x38d   : > { %v4958_v17 = vunpack.i.h.bf16 %v8113_v51  ;;  %v4957_v38 = vunpack.i.l.bf16 %v8113_v51  ;;  %v8444_v29 = vsel %vm1401_vm5, %v3302_v47, %v5153_v54  ;;  %v8447_v4 = vsel %vm1401_vm5, %v3301_v39, %v5152_v21  ;;  %5525 = vrot.lane.b32.xlu1 %v8287_v61, %s5621_s20 }
 0x38e   : > { %v5241_v59 = vpop.permute.xlu0 %5240  ;;  %v5228_v50 = vunpack.i.h.bf16 %v5226_v19  ;;  %v5227_v60 = vunpack.i.l.bf16 %v5226_v19  ;;  %v3363_v16 = vsel %vm1432_vm6, %v3333_v56, %v4962_v30  ;;  %v3364_v45 = vsel %vm1432_vm6, %v3334_v0, %v4963_v5 }
 0x38f   : > { %v5243_v62 = vunpack.i.h.bf16 %v5241_v59  ;;  %v5242_v14 = vunpack.i.l.bf16 %v5241_v59  ;;  %v5236_v28 = vpop.permute.xlu1 %5235  ;;  %v3395_v8 = vsel %vm1465_vm7, %v3363_v16, %v5232_v48  ;;  %v3396_v51 = vsel %vm1465_vm7, %v3364_v45, %v5233_v18 }
 0x390   : > { %5530 = vrot.lane.b32.xlu0 %v8025_v9, %s5621_s20  ;;  %v5238_v22 = vunpack.i.h.bf16 %v5236_v28  ;;  %v5237_v11 = vunpack.i.l.bf16 %v5236_v28  ;;  %v4973_v41 = vunpack.i.h.bf16 %v8115_v13  ;;  %v4972_v6 = vunpack.i.l.bf16 %v8115_v13 }
 0x391   : > { %v3427_v31 = vsel %vm1498_vm8, %v3395_v8, %v5242_v14  ;;  %v3428_v63 = vsel %vm1498_vm8, %v3396_v51, %v5243_v62  ;;  %v3361_v54 = vsel %vm1432_vm6, %v8447_v4, %v4957_v38  ;;  %v3362_v21 = vsel %vm1432_vm6, %v8444_v29, %v4958_v17  ;;  %5535 = vrot.lane.b32.xlu1 %v8005_v37, %s5622_s21 }
 0x392   : > { %v5251_v20 = vpop.permute.xlu0 %5250  ;;  %v4968_v13 = vunpack.i.h.bf16 %v8122_v49  ;;  %v4967_v27 = vunpack.i.l.bf16 %v8122_v49  ;;  %v3393_v7 = vsel %vm1465_vm7, %v3361_v54, %v5227_v60  ;;  %v3394_v19 = vsel %vm1465_vm7, %v3362_v21, %v5228_v50  ;;  %v9652_v60 = vld [vmem:[#allocation27_spill] sm:$0xff]  ;;  %v9653_v54 = vld [vmem:[#allocation10_spill] sm:$0xff] }
 0x393   : > { %v5253_v5 = vunpack.i.h.bf16 %v5251_v20  ;;  %v5252_v30 = vunpack.i.l.bf16 %v5251_v20  ;;  %v5246_v61 = vpop.permute.xlu1 %5245  ;;  %v3425_v56 = vsel %vm1498_vm8, %v3393_v7, %v5237_v11  ;;  %v3426_v0 = vsel %vm1498_vm8, %v3394_v19, %v5238_v22 }
 0x394   : > { %5540 = vrot.lane.b32.xlu0 %v8041_v35, %s5622_s21  ;;  %v3459_v18 = vsel %vm1531_vm9, %v3427_v31, %v4972_v6  ;;  %v3460_v48 = vsel %vm1531_vm9, %v3428_v63, %v4973_v41  ;;  %v5248_v47 = vunpack.i.h.bf16 %v5246_v61  ;;  %v5247_v39 = vunpack.i.l.bf16 %v5246_v61 }
 0x395   : > { %v5088_v14 = vunpack.i.h.bf16 %v8213_v43  ;;  %v5087_v17 = vunpack.i.l.bf16 %v8213_v43  ;;  %v3491_v38 = vsel %vm1564_vm10, %v3459_v18, %v5252_v30  ;;  %v3492_v50 = vsel %vm1564_vm10, %v3460_v48, %v5253_v5  ;;  %5545 = vrot.lane.b32.xlu1 %v8014_v42, %s5623_s26  ;;  %v9654_v5 = vld [vmem:[#allocation14_spill] sm:$0xff] }
 0x396   : > { %v5261_v59 = vpop.permute.xlu0 %5260  ;;  %v5163_v16 = vunpack.i.h.bf16 %v8257_v33  ;;  %v5162_v45 = vunpack.i.l.bf16 %v8257_v33  ;;  %v3457_v43 = vsel %vm1531_vm9, %v3425_v56, %v4967_v27  ;;  %v3458_v20 = vsel %vm1531_vm9, %v3426_v0, %v4968_v13 }
 0x397   : > { %v5263_v49 = vunpack.i.h.bf16 %v5261_v59  ;;  %v5262_v62 = vunpack.i.l.bf16 %v5261_v59  ;;  %v5256_v28 = vpop.permute.xlu1 %5255  ;;  %v3489_v41 = vsel %vm1564_vm10, %v3457_v43, %v5247_v39  ;;  %v3490_v6 = vsel %vm1564_vm10, %v3458_v20, %v5248_v47  ;;  %v9655_v20 = vld [vmem:[#allocation25_spill] sm:$0xff] }
 0x398   : > { %5550 = vrot.lane.b32.xlu0 %v9652_v60, %s5623_s26  ;;  %v5258_v51 = vunpack.i.h.bf16 %v5256_v28  ;;  %v5257_v22 = vunpack.i.l.bf16 %v5256_v28  ;;  %v3306_v21 = vsel %vm1370_vm4, %v9653_v54, %v5088_v14  ;;  %v3305_v30 = vsel %vm1370_vm4, %v9654_v5, %v5087_v17 }
 0x399   : > { %v3523_v37 = vsel %vm1597_vm11, %v3491_v38, %v5262_v62  ;;  %v3524_v8 = vsel %vm1597_vm11, %v3492_v50, %v5263_v49  ;;  %v3336_v27 = vsel %vm1401_vm5, %v3306_v21, %v5163_v16  ;;  %v3335_v7 = vsel %vm1401_vm5, %v3305_v30, %v5162_v45  ;;  %5555 = vrot.lane.b32.xlu1 %v8025_v9, %s5624_s29 }
 0x39a   : > { %v5271_v11 = vpop.permute.xlu0 %5270  ;;  %v3554_v33 = vpack.c.bf16 %v3524_v8, %v3523_v37  ;;  %v3521_v31 = vsel %vm1597_vm11, %v3489_v41, %v5257_v22  ;;  %v3522_v63 = vsel %vm1597_vm11, %v3490_v6, %v5258_v51  ;;  %v4982_v0 = vunpack.i.l.bf16 %v8125_v25 }
 0x39b   : > { %v5266_v13 = vpop.permute.xlu1 %5265  ;;  %v3553_v42 = vpack.c.bf16 %v3522_v63, %v3521_v31  ;;  %v5273_v19 = vunpack.i.h.bf16 %v5271_v11  ;;  %v5272_v61 = vunpack.i.l.bf16 %v5271_v11  ;;  %v4978_v59 = vunpack.i.h.bf16 %v8130_v55 }
 0x39c   : > { %5560 = vrot.lane.b32.xlu0 %v8041_v35, %s5625_s30  ;;  %v4983_v35 = vunpack.i.h.bf16 %v8125_v25  ;;  %v4977_v47 = vunpack.i.l.bf16 %v8130_v55  ;;  %v4993_v39 = vunpack.i.h.bf16 %v8132_v52  ;;  %v4992_v49 = vunpack.i.l.bf16 %v8132_v52 }
 0x39d   : > { %4289 = vmatprep.mubr.msk.bf16.mxu1 %vm1661_vm12, %v3553_v42  ;;  %v5268_v62 = vunpack.i.h.bf16 %v5266_v13  ;;  %v5267_v14 = vunpack.i.l.bf16 %v5266_v13  ;;  %v3367_v25 = vsel %vm1432_vm6, %v3335_v7, %v4982_v0  ;;  %v4988_v28 = vunpack.i.h.bf16 %v8137_v40  ;;  %5565 = vrot.lane.b32.xlu1 %v9652_v60, %s5626_s4  ;;  %v9656_v42 = vld [vmem:[#allocation15_spill] sm:$0xff]  ;;  %v9657_v7 = vld [vmem:[#allocation26_spill] sm:$0xff] }
 0x39e   : > { %v5281_v56 = vpop.permute.xlu0 %5280  ;;  %4290 = vmatmul.mubr.msk.bf16.vlgmr.msra.gmra.mxu1 %vm1661_vm12, %v3554_v33  ;;  %v3368_v9 = vsel %vm1432_vm6, %v3336_v27, %v4983_v35  ;;  %v3399_v38 = vsel %vm1465_vm7, %v3367_v25, %v5272_v61  ;;  %v4987_v52 = vunpack.i.l.bf16 %v8137_v40  ;;  %v3365_v51 = vsel %vm1432_vm6, %v8447_v4, %v4977_v47  ;;  %v9658_v25 = vld [vmem:[#allocation43_spill] sm:$0xff] }
 0x39f   : > { %v5283_v18 = vunpack.i.h.bf16 %v5281_v56  ;;  %v5282_v48 = vunpack.i.l.bf16 %v5281_v56  ;;  %v5276_v17 = vpop.permute.xlu1 %5275  ;;  %v3400_v50 = vsel %vm1465_vm7, %v3368_v9, %v5273_v19  ;;  %v3366_v22 = vsel %vm1432_vm6, %v8444_v29, %v4978_v59 }
 0x3a0   : > { %v5278_v16 = vunpack.i.h.bf16 %v5276_v17  ;;  %v5277_v45 = vunpack.i.l.bf16 %v5276_v17  ;;  %v5098_v41 = vunpack.i.h.bf16 %v9655_v20  ;;  %v5097_v6 = vunpack.i.l.bf16 %v9655_v20  ;;  %v9659_v17 = vld [vmem:[#allocation22_spill] sm:$0xff] }
 0x3a1   : > { %v3431_v37 = vsel %vm1498_vm8, %v3399_v38, %v5282_v48  ;;  %v3432_v8 = vsel %vm1498_vm8, %v3400_v50, %v5283_v18  ;;  %v3397_v40 = vsel %vm1465_vm7, %v3365_v51, %v5267_v14  ;;  %v3398_v33 = vsel %vm1465_vm7, %v3366_v22, %v5268_v62  ;;  %v9661_v20 = vld [vmem:[#allocation46_spill] sm:$0xff] }
 0x3a2   : > { %v5291_v55 = vpop.permute.xlu0 %5290  ;;  %v3429_v63 = vsel %vm1498_vm8, %v3397_v40, %v5277_v45  ;;  %v3430_v60 = vsel %vm1498_vm8, %v3398_v33, %v5278_v16  ;;  %v3463_v4 = vsel %vm1531_vm9, %v3431_v37, %v4992_v49  ;;  %v3464_v54 = vsel %vm1531_vm9, %v3432_v8, %v4993_v39  ;;  %v9660_v37 = vld [vmem:[#allocation12_spill] sm:$0xff] }
 0x3a3   : > { %v5293_v11 = vunpack.i.h.bf16 %v5291_v55  ;;  %v5292_v43 = vunpack.i.l.bf16 %v5291_v55  ;;  %v5286_v31 = vpop.permute.xlu1 %5285  ;;  %v5093_v27 = vunpack.i.h.bf16 %v9656_v42  ;;  %v5173_v19 = vunpack.i.h.bf16 %v9657_v7 }
 0x3a4   : > { %v5288_v21 = vunpack.i.h.bf16 %v5286_v31  ;;  %v5287_v5 = vunpack.i.l.bf16 %v5286_v31  ;;  %v5092_v35 = vunpack.i.l.bf16 %v9656_v42  ;;  %v5172_v0 = vunpack.i.l.bf16 %v9657_v7 }
 0x3a5   : > { %v3495_v61 = vsel %vm1564_vm10, %v3463_v4, %v5292_v43  ;;  %v3496_v56 = vsel %vm1564_vm10, %v3464_v54, %v5293_v11  ;;  %v3461_v47 = vsel %vm1531_vm9, %v3429_v63, %v4987_v52  ;;  %v3462_v39 = vsel %vm1531_vm9, %v3430_v60, %v4988_v28  ;;  %v9662_v63 = vld [vmem:[#allocation39_spill] sm:$0xff] }
 0x3a6   : > { %v5301_v29 = vpop.permute.xlu0 %5300  ;;  %v3310_v9 = vsel %vm1370_vm4, %v9658_v25, %v5098_v41  ;;  %v3309_v38 = vsel %vm1370_vm4, %v9659_v17, %v5097_v6  ;;  %v3493_v50 = vsel %vm1564_vm10, %v3461_v47, %v5287_v5  ;;  %v3494_v16 = vsel %vm1564_vm10, %v3462_v39, %v5288_v21  ;;  %v9663_v21 = vld [vmem:[#allocation23_spill] sm:$0xff]  ;;  %v9665_v39 = vld [vmem:[#allocation36_spill] sm:$0xff] }
 0x3a7   : > { %v5303_v30 = vunpack.i.h.bf16 %v5301_v29  ;;  %v5302_v13 = vunpack.i.l.bf16 %v5301_v29  ;;  %v5296_v18 = vpop.permute.xlu1 %5295  ;;  %v3340_v45 = vsel %vm1401_vm5, %v3310_v9, %v5173_v19  ;;  %v5168_v8 = vunpack.i.h.bf16 %v9660_v37 }
 0x3a8   : > { %v5298_v49 = vunpack.i.h.bf16 %v5296_v18  ;;  %v5297_v62 = vunpack.i.l.bf16 %v5296_v18  ;;  %v5167_v51 = vunpack.i.l.bf16 %v9660_v37  ;;  %v3339_v22 = vsel %vm1401_vm5, %v3309_v38, %v5172_v0 }
 0x3a9   : > { %v3527_v48 = vsel %vm1597_vm11, %v3495_v61, %v5302_v13  ;;  %v3528_v59 = vsel %vm1597_vm11, %v3496_v56, %v5303_v30  ;;  %v5003_v41 = vunpack.i.h.bf16 %v9661_v20  ;;  %v5002_v6 = vunpack.i.l.bf16 %v9661_v20  ;;  %v9664_v30 = vld [vmem:[#allocation18_spill] sm:$0xff] }
 0x3aa   : > { %v5311_v14 = vpop.permute.xlu0 %5310  ;;  %v3525_v55 = vsel %vm1597_vm11, %v3493_v50, %v5297_v62  ;;  %v3526_v52 = vsel %vm1597_vm11, %v3494_v16, %v5298_v49  ;;  %v3556_v28 = vpack.c.bf16 %v3528_v59, %v3527_v48  ;;  %v4998_v60 = vunpack.i.h.bf16 %v9662_v63 }
 0x3ab   : > { %v3555_v11 = vpack.c.bf16 %v3526_v52, %v3525_v55  ;;  %v5306_v43 = vpop.permute.xlu1 %5305  ;;  %v5313_v40 = vunpack.i.h.bf16 %v5311_v14  ;;  %v5312_v33 = vunpack.i.l.bf16 %v5311_v14  ;;  %v4997_v4 = vunpack.i.l.bf16 %v9662_v63 }
 0x3ac   : > { %v3308_v5 = vsel %vm1370_vm4, %v9663_v21, %v5093_v27  ;;  %v3307_v13 = vsel %vm1370_vm4, %v9664_v30, %v5092_v35  ;;  %v3371_v42 = vsel %vm1432_vm6, %v3339_v22, %v5002_v6  ;;  %v3372_v7 = vsel %vm1432_vm6, %v3340_v45, %v5003_v41  ;;  %v9666_v41 = vld [vmem:[#allocation37_spill] sm:$0xff] }
 0x3ad   : > { %4293 = vmatprep.mubr.msk.bf16.mxu1 %vm1661_vm12, %v3555_v11  ;;  %v3337_v19 = vsel %vm1401_vm5, %v3307_v13, %v5167_v51  ;;  %v3338_v61 = vsel %vm1401_vm5, %v3308_v5, %v5168_v8  ;;  %v5308_v56 = vunpack.i.h.bf16 %v5306_v43  ;;  %v5307_v0 = vunpack.i.l.bf16 %v5306_v43 }
 0x3ae   : > { %v5321_v31 = vpop.permute.xlu0 %5320  ;;  %4294 = vmatmul.mubr.msk.bf16.gmra.mxu1 %vm1661_vm12, %v3556_v28  ;;  %v3403_v48 = vsel %vm1465_vm7, %v3371_v42, %v5312_v33  ;;  %v3404_v27 = vsel %vm1465_vm7, %v3372_v7, %v5313_v40  ;;  %v5013_v49 = vunpack.i.h.bf16 %v9665_v39  ;;  %v5012_v62 = vunpack.i.l.bf16 %v9665_v39 }
 0x3af   : > { %v5323_v54 = vunpack.i.h.bf16 %v5321_v31  ;;  %v5322_v29 = vunpack.i.l.bf16 %v5321_v31  ;;  %v5316_v18 = vpop.permute.xlu1 %5315  ;;  %v3369_v9 = vsel %vm1432_vm6, %v3337_v19, %v4997_v4  ;;  %v3370_v17 = vsel %vm1432_vm6, %v3338_v61, %v4998_v60 }
 0x3b0   : > { %v5318_v59 = vunpack.i.h.bf16 %v5316_v18  ;;  %v5317_v47 = vunpack.i.l.bf16 %v5316_v18  ;;  %v3401_v16 = vsel %vm1465_vm7, %v3369_v9, %v5307_v0  ;;  %v3402_v45 = vsel %vm1465_vm7, %v3370_v17, %v5308_v56 }
 0x3b1   : > { %v3435_v14 = vsel %vm1498_vm8, %v3403_v48, %v5322_v29  ;;  %v3436_v25 = vsel %vm1498_vm8, %v3404_v27, %v5323_v54  ;;  %v5008_v6 = vunpack.i.h.bf16 %v9666_v41  ;;  %v5007_v40 = vunpack.i.l.bf16 %v9666_v41 }
 0x3b2   : > { %v5331_v35 = vpop.permute.xlu0 %5330  ;;  %v3433_v52 = vsel %vm1498_vm8, %v3401_v16, %v5317_v47  ;;  %v3434_v28 = vsel %vm1498_vm8, %v3402_v45, %v5318_v59  ;;  %v3467_v37 = vsel %vm1531_vm9, %v3435_v14, %v5012_v62  ;;  %v3468_v8 = vsel %vm1531_vm9, %v3436_v25, %v5013_v49  ;;  %v9667_v59 = vld [vmem:[#allocation2_spill] sm:$0xff] }
 0x3b3   : > { %v5333_v38 = vunpack.i.h.bf16 %v5331_v35  ;;  %v5332_v50 = vunpack.i.l.bf16 %v5331_v35  ;;  %v5326_v55 = vpop.permute.xlu1 %5325  ;;  %v3465_v54 = vsel %vm1531_vm9, %v3433_v52, %v5007_v40  ;;  %v3466_v29 = vsel %vm1531_vm9, %v3434_v28, %v5008_v6  ;;  %v9668_v62 = vld [vmem:[#allocation30_spill] sm:$0xff] }
 0x3b4   : > { %v5328_v22 = vunpack.i.h.bf16 %v5326_v55  ;;  %v5327_v11 = vunpack.i.l.bf16 %v5326_v55  ;;  %v5023_v47 = vunpack.i.h.bf16 %v9667_v59  ;;  %v5022_v35 = vunpack.i.l.bf16 %v9667_v59 }
 0x3b5   : > { %v3499_v33 = vsel %vm1564_vm10, %v3467_v37, %v5332_v50  ;;  %v3500_v31 = vsel %vm1564_vm10, %v3468_v8, %v5333_v38  ;;  %v5018_v14 = vunpack.i.h.bf16 %v9668_v62  ;;  %v5017_v25 = vunpack.i.l.bf16 %v9668_v62  ;;  %v9669_v8 = vld [vmem:[#allocation40_spill] sm:$0xff] }
 0x3b6   : > { %v5341_v51 = vpop.permute.xlu0 %5340  ;;  %v3497_v13 = vsel %vm1564_vm10, %v3465_v54, %v5327_v11  ;;  %v3498_v42 = vsel %vm1564_vm10, %v3466_v29, %v5328_v22  ;;  %v3375_v38 = vsel %vm1432_vm6, %v8297_v2, %v5022_v35  ;;  %v3376_v50 = vsel %vm1432_vm6, %v8294_v34, %v5023_v47  ;;  %v9670_v2 = vld [vmem:[#allocation11_spill] sm:$0xff] }
 0x3b7   : > { %v5343_v43 = vunpack.i.h.bf16 %v5341_v51  ;;  %v5342_v20 = vunpack.i.l.bf16 %v5341_v51  ;;  %v5336_v63 = vpop.permute.xlu1 %5335  ;;  %v5033_v51 = vunpack.i.h.bf16 %v9669_v8  ;;  %v5032_v22 = vunpack.i.l.bf16 %v9669_v8  ;;  %v9671_v34 = vld [vmem:[#allocation7_spill] sm:$0xff] }
 0x3b8   : > { %v5338_v21 = vunpack.i.h.bf16 %v5336_v63  ;;  %v5337_v5 = vunpack.i.l.bf16 %v5336_v63  ;;  %v3374_v41 = vsel %vm1432_vm6, %v9671_v34, %v5018_v14 }
 0x3b9   : > { %v3531_v60 = vsel %vm1597_vm11, %v3499_v33, %v5342_v20  ;;  %v3532_v4 = vsel %vm1597_vm11, %v3500_v31, %v5343_v43  ;;  %v3373_v20 = vsel %vm1432_vm6, %v9670_v2, %v5017_v25  ;;  %v9672_v33 = vld [vmem:[#allocation29_spill] sm:$0xff] }
 0x3ba   : > { %v5351_v30 = vpop.permute.xlu0 %5350  ;;  %v3529_v7 = vsel %vm1597_vm11, %v3497_v13, %v5337_v5  ;;  %v3530_v19 = vsel %vm1597_vm11, %v3498_v42, %v5338_v21  ;;  %v3558_v61 = vpack.c.bf16 %v3532_v4, %v3531_v60  ;;  %v5027_v31 = vunpack.i.l.bf16 %v9672_v33 }
 0x3bb   : > { %v3557_v56 = vpack.c.bf16 %v3530_v19, %v3529_v7  ;;  %v5346_v0 = vpop.permute.xlu1 %5345  ;;  %v5353_v18 = vunpack.i.h.bf16 %v5351_v30  ;;  %v5352_v48 = vunpack.i.l.bf16 %v5351_v30 }
 0x3bc   : > { %v5348_v9 = vunpack.i.h.bf16 %v5346_v0  ;;  %v5347_v17 = vunpack.i.l.bf16 %v5346_v0 }
 0x3bd   : > { %4297 = vmatprep.mubr.msk.bf16.mxu1 %vm1661_vm12, %v3557_v56  ;;  %v3407_v45 = vsel %vm1465_vm7, %v3375_v38, %v5352_v48  ;;  %v3408_v55 = vsel %vm1465_vm7, %v3376_v50, %v5353_v18 }
 0x3be   : > { %v5361_v27 = vpop.permute.xlu0 %5360  ;;  %4298 = vmatmul.mubr.msk.bf16.gmra.mxu1 %vm1661_vm12, %v3558_v61  ;;  %v3405_v63 = vsel %vm1465_vm7, %v3373_v20, %v5347_v17  ;;  %v3406_v60 = vsel %vm1465_vm7, %v3374_v41, %v5348_v9  ;;  %v5028_v61 = vunpack.i.h.bf16 %v9672_v33  ;;  %v9675_v41 = vld [vmem:[#allocation8_spill] sm:$0xff] }
 0x3bf   : > { %v5363_v39 = vunpack.i.h.bf16 %v5361_v27  ;;  %v5362_v49 = vunpack.i.l.bf16 %v5361_v27  ;;  %v5356_v16 = vpop.permute.xlu1 %5355 }
 0x3c0   : > { %v5358_v52 = vunpack.i.h.bf16 %v5356_v16  ;;  %v5357_v28 = vunpack.i.l.bf16 %v5356_v16 }
 0x3c1   : > { %v3439_v11 = vsel %vm1498_vm8, %v3407_v45, %v5362_v49  ;;  %v3440_v43 = vsel %vm1498_vm8, %v3408_v55, %v5363_v39 }
 0x3c2   : > { %v5371_v37 = vpop.permute.xlu0 %5370  ;;  %v3437_v54 = vsel %vm1498_vm8, %v3405_v63, %v5357_v28  ;;  %v3438_v29 = vsel %vm1498_vm8, %v3406_v60, %v5358_v52  ;;  %v3471_v21 = vsel %vm1531_vm9, %v3439_v11, %v5032_v22  ;;  %v3472_v5 = vsel %vm1531_vm9, %v3440_v43, %v5033_v51  ;;  %v9673_v52 = vld [vmem:[#allocation28_spill] sm:$0xff]  ;;  %v9674_v22 = vld [vmem:[#allocation5_spill] sm:$0xff] }
 0x3c3   : > { %v5373_v6 = vunpack.i.h.bf16 %v5371_v37  ;;  %v5372_v40 = vunpack.i.l.bf16 %v5371_v37  ;;  %v5366_v4 = vpop.permute.xlu1 %5365  ;;  %v3469_v18 = vsel %vm1531_vm9, %v3437_v54, %v5027_v31  ;;  %v3470_v47 = vsel %vm1531_vm9, %v3438_v29, %v5028_v61  ;;  %v9676_v54 = vld [vmem:[#allocation6_spill] sm:$0xff] }
 0x3c4   : > { %v5368_v13 = vunpack.i.h.bf16 %v5366_v4  ;;  %v5367_v42 = vunpack.i.l.bf16 %v5366_v4  ;;  %v5043_v28 = vunpack.i.h.bf16 %v9673_v52  ;;  %v5042_v37 = vunpack.i.l.bf16 %v9673_v52 }
 0x3c5   : > { %v3503_v56 = vsel %vm1564_vm10, %v3471_v21, %v5372_v40  ;;  %v3504_v0 = vsel %vm1564_vm10, %v3472_v5, %v5373_v6  ;;  %v5038_v11 = vunpack.i.h.bf16 %v9674_v22  ;;  %v5037_v43 = vunpack.i.l.bf16 %v9674_v22 }
 0x3c6   : > { %v5381_v30 = vpop.permute.xlu0 %5380  ;;  %v3501_v14 = vsel %vm1564_vm10, %v3469_v18, %v5367_v42  ;;  %v3502_v25 = vsel %vm1564_vm10, %v3470_v47, %v5368_v13  ;;  %v3379_v34 = vsel %vm1432_vm6, %v8323_v10, %v5042_v37  ;;  %v3380_v6 = vsel %vm1432_vm6, %v9675_v41, %v5043_v28  ;;  %v9678_v41 = vld [vmem:[#allocation4_spill] sm:$0xff] }
 0x3c7   : > { %v5383_v7 = vunpack.i.h.bf16 %v5381_v30  ;;  %v5382_v19 = vunpack.i.l.bf16 %v5381_v30  ;;  %v5376_v48 = vpop.permute.xlu1 %5375  ;;  %v5053_v29 = vunpack.i.h.bf16 %v9676_v54  ;;  %v5052_v21 = vunpack.i.l.bf16 %v9676_v54 }
 0x3c8   : > { %v5378_v35 = vunpack.i.h.bf16 %v5376_v48  ;;  %v5377_v39 = vunpack.i.l.bf16 %v5376_v48  ;;  %v3377_v10 = vsel %vm1432_vm6, %v8338_v36, %v5037_v43  ;;  %v3378_v13 = vsel %vm1432_vm6, %v8341_v57, %v5038_v11 }
 0x3c9   : > { %v3535_v27 = vsel %vm1597_vm11, %v3503_v56, %v5382_v19  ;;  %v3536_v59 = vsel %vm1597_vm11, %v3504_v0, %v5383_v7  ;;  %v9677_v19 = vld [vmem:[#allocation41_spill] sm:$0xff] }
 0x3ca   : > { %v3560_v49 = vpack.c.bf16 %v3536_v59, %v3535_v27  ;;  %v5391_v62 = vpop.permute.xlu0 %5390  ;;  %v3533_v9 = vsel %vm1597_vm11, %v3501_v14, %v5377_v39  ;;  %v3534_v17 = vsel %vm1597_vm11, %v3502_v25, %v5378_v35  ;;  %v5047_v61 = vunpack.i.l.bf16 %v9677_v19 }
 0x3cb   : > { %v3559_v38 = vpack.c.bf16 %v3534_v17, %v3533_v9  ;;  %v5386_v50 = vpop.permute.xlu1 %5385  ;;  %v5393_v16 = vunpack.i.h.bf16 %v5391_v62  ;;  %v5392_v45 = vunpack.i.l.bf16 %v5391_v62  ;;  %v5048_v62 = vunpack.i.h.bf16 %v9677_v19 }
 0x3cc   : > { %v5388_v2 = vunpack.i.h.bf16 %v5386_v50  ;;  %v5387_v20 = vunpack.i.l.bf16 %v5386_v50 }
 0x3cd   : > { %4301 = vmatprep.mubr.msk.bf16.mxu1 %vm1661_vm12, %v3559_v38  ;;  %v3411_v33 = vsel %vm1465_vm7, %v3379_v34, %v5392_v45  ;;  %v3412_v31 = vsel %vm1465_vm7, %v3380_v6, %v5393_v16  ;;  %v5063_v6 = vunpack.i.h.bf16 %v9678_v41 }
 0x3ce   : > { %v5401_v55 = vpop.permute.xlu0 %5400  ;;  %4302 = vmatmul.mubr.msk.bf16.gmra.mxu1 %vm1661_vm12, %v3560_v49  ;;  %v3409_v56 = vsel %vm1465_vm7, %v3377_v10, %v5387_v20  ;;  %v3410_v0 = vsel %vm1465_vm7, %v3378_v13, %v5388_v2 }
 0x3cf   : > { %v5403_v8 = vunpack.i.h.bf16 %v5401_v55  ;;  %v5402_v51 = vunpack.i.l.bf16 %v5401_v55  ;;  %v5396_v40 = vpop.permute.xlu1 %5395 }
 0x3d0   : > { %v5398_v63 = vunpack.i.h.bf16 %v5396_v40  ;;  %v5397_v60 = vunpack.i.l.bf16 %v5396_v40  ;;  %v5062_v40 = vunpack.i.l.bf16 %v9678_v41 }
 0x3d1   : > { %v3443_v5 = vsel %vm1498_vm8, %v3411_v33, %v5402_v51  ;;  %v3444_v30 = vsel %vm1498_vm8, %v3412_v31, %v5403_v8 }
 0x3d2   : > { %v5411_v4 = vpop.permute.xlu0 %5410  ;;  %v3441_v48 = vsel %vm1498_vm8, %v3409_v56, %v5397_v60  ;;  %v3442_v27 = vsel %vm1498_vm8, %v3410_v0, %v5398_v63  ;;  %v3475_v59 = vsel %vm1531_vm9, %v3443_v5, %v5052_v21  ;;  %v3476_v36 = vsel %vm1531_vm9, %v3444_v30, %v5053_v29  ;;  %v9679_v63 = vld [vmem:[#allocation42_spill] sm:$0xff] }
 0x3d3   : > { %v5413_v42 = vunpack.i.h.bf16 %v5411_v4  ;;  %v5412_v7 = vunpack.i.l.bf16 %v5411_v4  ;;  %v5406_v18 = vpop.permute.xlu1 %5405  ;;  %v3473_v9 = vsel %vm1531_vm9, %v3441_v48, %v5047_v61  ;;  %v3474_v16 = vsel %vm1531_vm9, %v3442_v27, %v5048_v62  ;;  %v9680_v61 = vld [vmem:[#allocation35_spill] sm:$0xff] }
 0x3d4   : > { %v5408_v35 = vunpack.i.h.bf16 %v5406_v18  ;;  %v5407_v57 = vunpack.i.l.bf16 %v5406_v18  ;;  %v5058_v60 = vunpack.i.h.bf16 %v9679_v63  ;;  %v5057_v4 = vunpack.i.l.bf16 %v9679_v63 }
 0x3d5   : > { %v3507_v14 = vsel %vm1564_vm10, %v3475_v59, %v5412_v7  ;;  %v3508_v25 = vsel %vm1564_vm10, %v3476_v36, %v5413_v42  ;;  %v3383_v21 = vsel %vm1432_vm6, %v8353_v12, %v5062_v40  ;;  %v3384_v5 = vsel %vm1432_vm6, %v8350_v1, %v5063_v6  ;;  %v9681_v36 = vld [vmem:[#allocation3_spill] sm:$0xff] }
 0x3d6   : > { %v5421_v47 = vpop.permute.xlu0 %5420  ;;  %v3505_v37 = vsel %vm1564_vm10, %v3473_v9, %v5407_v57  ;;  %v3506_v8 = vsel %vm1564_vm10, %v3474_v16, %v5408_v35  ;;  %v5073_v56 = vunpack.i.h.bf16 %v9680_v61  ;;  %v5072_v0 = vunpack.i.l.bf16 %v9680_v61 }
 0x3d7   : > { %v5423_v39 = vunpack.i.h.bf16 %v5421_v47  ;;  %v5422_v49 = vunpack.i.l.bf16 %v5421_v47  ;;  %v5416_v17 = vpop.permute.xlu1 %5415  ;;  %v3381_v12 = vsel %vm1432_vm6, %v8366_v23, %v5057_v4  ;;  %v3382_v1 = vsel %vm1432_vm6, %v8369_v24, %v5058_v60 }
 0x3d8   : > { %v5418_v45 = vunpack.i.h.bf16 %v5416_v17  ;;  %v5417_v55 = vunpack.i.l.bf16 %v5416_v17  ;;  %v5067_v47 = vunpack.i.l.bf16 %v9681_v36 }
 0x3d9   : > { %v3539_v38 = vsel %vm1597_vm11, %v3507_v14, %v5422_v49  ;;  %v3540_v50 = vsel %vm1597_vm11, %v3508_v25, %v5423_v39 }
 0x3da   : > { %v3562_v52 = vpack.c.bf16 %v3540_v50, %v3539_v38  ;;  %v5431_v28 = vpop.permute.xlu0 %5430  ;;  %v3537_v51 = vsel %vm1597_vm11, %v3505_v37, %v5417_v55  ;;  %v3538_v22 = vsel %vm1597_vm11, %v3506_v8, %v5418_v45  ;;  %v5068_v50 = vunpack.i.h.bf16 %v9681_v36 }
 0x3db   : > { %v3561_v11 = vpack.c.bf16 %v3538_v22, %v3537_v51  ;;  %v5426_v43 = vpop.permute.xlu1 %5425  ;;  %v5433_v2 = vunpack.i.h.bf16 %v5431_v28  ;;  %v5432_v20 = vunpack.i.l.bf16 %v5431_v28 }
 0x3dc   : > { %v5428_v54 = vunpack.i.h.bf16 %v5426_v43  ;;  %v5427_v29 = vunpack.i.l.bf16 %v5426_v43 }
 0x3dd   : > { %4305 = vmatprep.mubr.msk.bf16.mxu1 %vm1661_vm12, %v3561_v11  ;;  %v3415_v10 = vsel %vm1465_vm7, %v3383_v21, %v5432_v20  ;;  %v3416_v13 = vsel %vm1465_vm7, %v3384_v5, %v5433_v2 }
 0x3de   : > { %v5441_v34 = vpop.permute.xlu0 %5440  ;;  %4306 = vmatmul.mubr.msk.bf16.gmra.mxu1 %vm1661_vm12, %v3562_v52  ;;  %v3413_v35 = vsel %vm1465_vm7, %v3381_v12, %v5427_v29  ;;  %v3414_v57 = vsel %vm1465_vm7, %v3382_v1, %v5428_v54 }
 0x3df   : > { %v5443_v33 = vunpack.i.h.bf16 %v5441_v34  ;;  %v5442_v31 = vunpack.i.l.bf16 %v5441_v34  ;;  %v5436_v30 = vpop.permute.xlu1 %5435 }
 0x3e0   : > { %v5438_v42 = vunpack.i.h.bf16 %v5436_v30  ;;  %v5437_v7 = vunpack.i.l.bf16 %v5436_v30 }
 0x3e1   : > { %v3447_v18 = vsel %vm1498_vm8, %v3415_v10, %v5442_v31  ;;  %v3448_v48 = vsel %vm1498_vm8, %v3416_v13, %v5443_v33 }
 0x3e2   : > { %v5451_v19 = vpop.permute.xlu0 %5450  ;;  %v3445_v49 = vsel %vm1498_vm8, %v3413_v35, %v5437_v7  ;;  %v3446_v62 = vsel %vm1498_vm8, %v3414_v57, %v5438_v42  ;;  %v3479_v14 = vsel %vm1531_vm9, %v3447_v18, %v5072_v0  ;;  %v3480_v23 = vsel %vm1531_vm9, %v3448_v48, %v5073_v56 }
 0x3e3   : > { %v5453_v27 = vunpack.i.h.bf16 %v5451_v19  ;;  %v5452_v59 = vunpack.i.l.bf16 %v5451_v19  ;;  %v5446_v39 = vpop.permute.xlu1 %5445  ;;  %v3477_v55 = vsel %vm1531_vm9, %v3445_v49, %v5067_v47  ;;  %v3478_v8 = vsel %vm1531_vm9, %v3446_v62, %v5068_v50 }
 0x3e4   : > { %v5448_v9 = vunpack.i.h.bf16 %v5446_v39  ;;  %v5447_v24 = vunpack.i.l.bf16 %v5446_v39 }
 0x3e5   : > { %v3511_v16 = vsel %vm1564_vm10, %v3479_v14, %v5452_v59  ;;  %v3512_v45 = vsel %vm1564_vm10, %v3480_v23, %v5453_v27 }
 0x3e6   : > { %v5461_v25 = vpop.permute.xlu0 %5460  ;;  %v3509_v2 = vsel %vm1564_vm10, %v3477_v55, %v5447_v24  ;;  %v3510_v20 = vsel %vm1564_vm10, %v3478_v8, %v5448_v9 }
 0x3e7   : > { %v5463_v17 = vunpack.i.h.bf16 %v5461_v25  ;;  %v5462_v38 = vunpack.i.l.bf16 %v5461_v25  ;;  %v5456_v52 = vpop.permute.xlu1 %5455 }
 0x3e8   : > { %v5458_v51 = vunpack.i.h.bf16 %v5456_v52  ;;  %v5457_v22 = vunpack.i.l.bf16 %v5456_v52 }
 0x3e9   : > { %v3543_v28 = vsel %vm1597_vm11, %v3511_v16, %v5462_v38  ;;  %v3544_v37 = vsel %vm1597_vm11, %v3512_v45, %v5463_v17 }
 0x3ea   : > { %v3564_v11 = vpack.c.bf16 %v3544_v37, %v3543_v28  ;;  %v5471_v43 = vpop.permute.xlu0 %5470  ;;  %v3541_v34 = vsel %vm1597_vm11, %v3509_v2, %v5457_v22  ;;  %v3542_v41 = vsel %vm1597_vm11, %v3510_v20, %v5458_v51 }
 0x3eb   : > { %v3563_v6 = vpack.c.bf16 %v3542_v41, %v3541_v34  ;;  %v5466_v40 = vpop.permute.xlu1 %5465  ;;  %v5472_v60 = vunpack.i.l.bf16 %v5471_v43  ;;  %v5473_v54 = vunpack.i.h.bf16 %v5471_v43 }
 0x3ec   : > { %v5468_v21 = vunpack.i.h.bf16 %v5466_v40  ;;  %v5467_v5 = vunpack.i.l.bf16 %v5466_v40 }
 0x3ed   : > { %4309 = vmatprep.mubr.msk.bf16.mxu1 %vm1661_vm12, %v3563_v6  ;;  %v3387_v13 = vsel %vm1432_vm6, %v8377_v58, %v5472_v60  ;;  %v3388_v61 = vsel %vm1432_vm6, %v8374_v26, %v5473_v54 }
 0x3ee   : > { %v5481_v33 = vpop.permute.xlu0 %5480  ;;  %4310 = vmatmul.mubr.msk.bf16.gmra.mxu1 %vm1661_vm12, %v3564_v11  ;;  %v3385_v12 = vsel %vm1432_vm6, %v8392_v46, %v5467_v5  ;;  %v3386_v1 = vsel %vm1432_vm6, %v8395_v32, %v5468_v21 }
 0x3ef   : > { %v5476_v31 = vpop.permute.xlu1 %5475  ;;  %v5483_v30 = vunpack.i.h.bf16 %v5481_v33  ;;  %v5482_v10 = vunpack.i.l.bf16 %v5481_v33 }
 0x3f0   : > { %v5477_v56 = vunpack.i.l.bf16 %v5476_v31  ;;  %v5478_v59 = vunpack.i.h.bf16 %v5476_v31 }
 0x3f1   : > { %v3419_v58 = vsel %vm1465_vm7, %v3387_v13, %v5482_v10  ;;  %v3420_v27 = vsel %vm1465_vm7, %v3388_v61, %v5483_v30 }
 0x3f2   : > { %v5491_v63 = vpop.permute.xlu0 %5490  ;;  %v3417_v62 = vsel %vm1465_vm7, %v3385_v12, %v5477_v56  ;;  %v3418_v50 = vsel %vm1465_vm7, %v3386_v1, %v5478_v59 }
 0x3f3   : > { %v5486_v4 = vpop.permute.xlu1 %5485  ;;  %v5493_v42 = vunpack.i.h.bf16 %v5491_v63  ;;  %v5492_v7 = vunpack.i.l.bf16 %v5491_v63 }
 0x3f4   : > { %v5487_v36 = vunpack.i.l.bf16 %v5486_v4  ;;  %v5488_v35 = vunpack.i.h.bf16 %v5486_v4 }
 0x3f5   : > { %v3451_v57 = vsel %vm1498_vm8, %v3419_v58, %v5492_v7  ;;  %v3452_v39 = vsel %vm1498_vm8, %v3420_v27, %v5493_v42 }
 0x3f6   : > { %v8713_v29 = vpop.permute.xlu0 %5500  ;;  %v3449_v16 = vsel %vm1498_vm8, %v3417_v62, %v5487_v36  ;;  %v3450_v52 = vsel %vm1498_vm8, %v3418_v50, %v5488_v35 }
 0x3f7   : > { %v5496_v19 = vpop.permute.xlu1 %5495  ;;  %v5503_v0 = vunpack.i.h.bf16 %v8713_v29  ;;  %v5502_v18 = vunpack.i.l.bf16 %v8713_v29 }
 0x3f8   : > { %v5497_v49 = vunpack.i.l.bf16 %v5496_v19  ;;  %v5498_v32 = vunpack.i.h.bf16 %v5496_v19 }
 0x3f9   : > { %v3483_v14 = vsel %vm1531_vm9, %v3451_v57, %v5502_v18  ;;  %v3484_v23 = vsel %vm1531_vm9, %v3452_v39, %v5503_v0 }
 0x3fa   : > { %v8721_v48 = vpop.permute.xlu0 %5510  ;;  %v3481_v28 = vsel %vm1531_vm9, %v3449_v16, %v5497_v49  ;;  %v3482_v22 = vsel %vm1531_vm9, %v3450_v52, %v5498_v32 }
 0x3fb   : > { %v5513_v26 = vunpack.i.h.bf16 %v8721_v48  ;;  %v5512_v47 = vunpack.i.l.bf16 %v8721_v48  ;;  %v5506_v46 = vpop.permute.xlu1 %5505 }
 0x3fc   : > { %v5508_v9 = vunpack.i.h.bf16 %v5506_v46  ;;  %v5507_v24 = vunpack.i.l.bf16 %v5506_v46 }
 0x3fd   : > { %v3515_v45 = vsel %vm1564_vm10, %v3483_v14, %v5512_v47  ;;  %v3516_v55 = vsel %vm1564_vm10, %v3484_v23, %v5513_v26 }
 0x3fe   : > { %v5521_v25 = vpop.permute.xlu0 %5520  ;;  %v3513_v34 = vsel %vm1564_vm10, %v3481_v28, %v5507_v24  ;;  %v3514_v41 = vsel %vm1564_vm10, %v3482_v22, %v5508_v9 }
 0x3ff   : > { %v5523_v17 = vunpack.i.h.bf16 %v5521_v25  ;;  %v5522_v38 = vunpack.i.l.bf16 %v5521_v25  ;;  %v5516_v37 = vpop.permute.xlu1 %5515 }
 0x400   : > { %v5518_v11 = vunpack.i.h.bf16 %v5516_v37  ;;  %v5517_v43 = vunpack.i.l.bf16 %v5516_v37 }
 0x401   : > { %v3547_v8 = vsel %vm1597_vm11, %v3515_v45, %v5522_v38  ;;  %v3548_v51 = vsel %vm1597_vm11, %v3516_v55, %v5523_v17 }
 0x402   : > { %v3566_v2 = vpack.c.bf16 %v3548_v51, %v3547_v8  ;;  %v5531_v20 = vpop.permute.xlu0 %5530  ;;  %v3545_v6 = vsel %vm1597_vm11, %v3513_v34, %v5517_v43  ;;  %v3546_v40 = vsel %vm1597_vm11, %v3514_v41, %v5518_v11 }
 0x403   : > { %v3565_v33 = vpack.c.bf16 %v3546_v40, %v3545_v6  ;;  %v5526_v31 = vpop.permute.xlu1 %5525  ;;  %v5533_v60 = vunpack.i.h.bf16 %v5531_v20  ;;  %v5532_v4 = vunpack.i.l.bf16 %v5531_v20 }
 0x404   : > { %v5528_v56 = vunpack.i.h.bf16 %v5526_v31  ;;  %v5527_v12 = vunpack.i.l.bf16 %v5526_v31 }
 0x405   : > { %4313 = vmatprep.mubr.msk.bf16.mxu1 %vm1661_vm12, %v3565_v33  ;;  %v3391_v10 = vsel %vm1432_vm6, %v8405_v53, %v5532_v4  ;;  %v3392_v13 = vsel %vm1432_vm6, %v8402_v3, %v5533_v60 }
 0x406   : > { %v5541_v63 = vpop.permute.xlu0 %5540  ;;  %4314 = vmatmul.mubr.msk.bf16.gmra.mxu1 %vm1661_vm12, %v3566_v2  ;;  %v3390_v29 = vsel %vm1432_vm6, %v8423_v44, %v5528_v56 }
 0x407   : > { %v5543_v54 = vunpack.i.h.bf16 %v5541_v63  ;;  %v5542_v21 = vunpack.i.l.bf16 %v5541_v63  ;;  %v5536_v5 = vpop.permute.xlu1 %5535 }
 0x408   : > { %v5538_v59 = vunpack.i.h.bf16 %v5536_v5  ;;  %v5537_v36 = vunpack.i.l.bf16 %v5536_v5 }
 0x409   : > { %v3423_v19 = vsel %vm1465_vm7, %v3391_v10, %v5542_v21  ;;  %v3424_v61 = vsel %vm1465_vm7, %v3392_v13, %v5543_v54 }
 0x40a   : > { %v5551_v30 = vpop.permute.xlu0 %5550 }
 0x40b   : > { %v5553_v42 = vunpack.i.h.bf16 %v5551_v30  ;;  %v5552_v7 = vunpack.i.l.bf16 %v5551_v30  ;;  %v5546_v1 = vpop.permute.xlu1 %5545 }
 0x40c   : > { %v5548_v35 = vunpack.i.h.bf16 %v5546_v1  ;;  %v5547_v57 = vunpack.i.l.bf16 %v5546_v1 }
 0x40d   : > { %v3455_v58 = vsel %vm1498_vm8, %v3423_v19, %v5552_v7  ;;  %v3456_v27 = vsel %vm1498_vm8, %v3424_v61, %v5553_v42 }
 0x40e   : > { %v3487_v53 = vsel %vm1531_vm9, %v3455_v58, %v5502_v18  ;;  %v3488_v3 = vsel %vm1531_vm9, %v3456_v27, %v5503_v0  ;;  %v5561_v46 = vpop.permute.xlu0 %5560  ;;  %v3389_v18 = vsel %vm1432_vm6, %v8420_v15, %v5527_v12 }
 0x40f   : > { %v3519_v39 = vsel %vm1564_vm10, %v3487_v53, %v5512_v47  ;;  %v3520_v49 = vsel %vm1564_vm10, %v3488_v3, %v5513_v26  ;;  %v5556_v0 = vpop.permute.xlu1 %5555  ;;  %v3421_v23 = vsel %vm1465_vm7, %v3389_v18, %v5537_v36  ;;  %v3422_v47 = vsel %vm1465_vm7, %v3390_v29, %v5538_v59 }
 0x410   : > { %v3551_v62 = vsel %vm1597_vm11, %v3519_v39, %v5522_v38  ;;  %v3552_v32 = vsel %vm1597_vm11, %v3520_v49, %v5523_v17  ;;  %v5558_v48 = vunpack.i.h.bf16 %v5556_v0  ;;  %v5557_v25 = vunpack.i.l.bf16 %v5556_v0 }
 0x411   : > { %v3568_v14 = vpack.c.bf16 %v3552_v32, %v3551_v62  ;;  %v3453_v26 = vsel %vm1498_vm8, %v3421_v23, %v5547_v57  ;;  %v3454_v9 = vsel %vm1498_vm8, %v3422_v47, %v5548_v35  ;;  %v5563_v24 = vunpack.i.h.bf16 %v5561_v46 }
 0x412   : > { %v5562_v17 = vunpack.i.l.bf16 %v5561_v46  ;;  %v3485_v38 = vsel %vm1531_vm9, %v3453_v26, %v5557_v25  ;;  %v3486_v15 = vsel %vm1531_vm9, %v3454_v9, %v5558_v48 }
 0x413   : > { %v5566_v50 = vpop.permute.xlu1 %5565  ;;  %v3518_v55 = vsel %vm1564_vm10, %v3486_v15, %v5563_v24 }
 0x414   : > { %v5568_v44 = vunpack.i.h.bf16 %v5566_v50  ;;  %v5567_v16 = vunpack.i.l.bf16 %v5566_v50  ;;  %v3517_v45 = vsel %vm1564_vm10, %v3485_v38, %v5562_v17 }
 0x416   : > { %v3549_v52 = vsel %vm1597_vm11, %v3517_v45, %v5567_v16  ;;  %v3550_v28 = vsel %vm1597_vm11, %v3518_v55, %v5568_v44 }
 0x417   : > { %v3567_v37 = vpack.c.bf16 %v3550_v28, %v3549_v52 }
 0x419   : > { %4317 = vmatprep.mubr.msk.bf16.mxu1 %vm1661_vm12, %v3567_v37 }
 0x41a   : > { %4318 = vmatmul.mubr.msk.bf16.gmra.mxu1 %vm1661_vm12, %v3568_v14 }
 0x45e   : > { %v8793_v8 = vpop.f32.mrf.mxu1 }
 0x45f   : > { %v3868_v4 = vmul.f32 %v8793_v8, %v8793_v8  ;;  %v3799_v30 = vsel %vm1370_vm4, %v8793_v8, 0.0 }
 0x460   : > { %v8795_v51 = vpop.f32.mrf.mxu1 }
 0x461   : > { %v3866_v6 = vmul.f32 %v8795_v51, %v8795_v51  ;;  %v3796_v31 = vsel %vm1370_vm4, %v8795_v51, 0.0  ;;  %v3901_v13 = vsel %vm1370_vm4, %v3868_v4, 0.0 }
 0x462   : > { %v8797_v22 = vpop.f32.mrf.mxu1 }
 0x463   : > { %v3898_v54 = vsel %vm1370_vm4, %v3866_v6, 0.0  ;;  %v3869_v42 = vmul.f32 %v8797_v22, %v8797_v22  ;;  %v3801_v56 = vsel %vm1370_vm4, %v8797_v22, 0.0 }
 0x464   : > { %v8799_v11 = vpop.f32.mrf.mxu1 }
 0x465   : > { %v3867_v34 = vmul.f32 %v8799_v11, %v8799_v11  ;;  %v3797_v40 = vsel %vm1370_vm4, %v8799_v11, 0.0  ;;  %v3903_v27 = vsel %vm1370_vm4, %v3869_v42, 0.0 }
 0x466   : > { %v3798_v60 = vadd.f32 %v3797_v40, %v3796_v31 }
 0x467   : > { %v3899_v63 = vsel %vm1370_vm4, %v3867_v34, 0.0 }
 0x468   : > { %v3900_v21 = vadd.f32 %v3899_v63, %v3898_v54  ;;  %v3800_v10 = vadd.f32 %v3799_v30, %v3798_v60 }
 0x46a   : > { %v3902_v19 = vadd.f32 %v3901_v13, %v3900_v21  ;;  %v3802_v58 = vadd.f32 %v3801_v56, %v3800_v10 }
 0x46c   : > { %v3904_v3 = vadd.f32 %v3903_v27, %v3902_v19 }
 0x46e   : > { %v8801_v43 = vpop.f32.mrf.mxu1 }
 0x46f   : > { %v3872_v62 = vmul.f32 %v8801_v43, %v8801_v43  ;;  %v3807_v18 = vsel %vm1370_vm4, %v8801_v43, 0.0 }
 0x470   : > { %v8803_v2 = vpop.f32.mrf.mxu1 }
 0x471   : > { %v3870_v7 = vmul.f32 %v8803_v2, %v8803_v2  ;;  %v3803_v12 = vsel %vm1370_vm4, %v8803_v2, 0.0  ;;  %v3909_v14 = vsel %vm1370_vm4, %v3872_v62, 0.0 }
 0x472   : > { %v8805_v20 = vpop.f32.mrf.mxu1  ;;  %v3804_v53 = vadd.f32 %v3803_v12, %v3802_v58 }
 0x473   : > { %v3905_v59 = vsel %vm1370_vm4, %v3870_v7, 0.0  ;;  %v3873_v23 = vmul.f32 %v8805_v20, %v8805_v20  ;;  %v3809_v25 = vsel %vm1370_vm4, %v8805_v20, 0.0 }
 0x474   : > { %v8809_v41 = vpop.f32.mrf.mxu1  ;;  %v3906_v39 = vadd.f32 %v3905_v59, %v3904_v3 }
 0x475   : > { %v3871_v1 = vmul.f32 %v8809_v41, %v8809_v41  ;;  %v3805_v36 = vsel %vm1370_vm4, %v8809_v41, 0.0  ;;  %v3911_v38 = vsel %vm1370_vm4, %v3873_v23, 0.0 }
 0x476   : > { %v3806_v49 = vadd.f32 %v3805_v36, %v3804_v53 }
 0x477   : > { %v3907_v57 = vsel %vm1370_vm4, %v3871_v1, 0.0 }
 0x478   : > { %v3908_v32 = vadd.f32 %v3907_v57, %v3906_v39  ;;  %v3808_v29 = vadd.f32 %v3807_v18, %v3806_v49 }
 0x47a   : > { %v3910_v48 = vadd.f32 %v3909_v14, %v3908_v32  ;;  %v3810_v24 = vadd.f32 %v3809_v25, %v3808_v29 }
 0x47c   : > { %v3912_v16 = vadd.f32 %v3911_v38, %v3910_v48 }
 0x47e   : > { %v8815_v33 = vpop.f32.mrf.mxu1 }
 0x47f   : > { %v3876_v37 = vmul.f32 %v8815_v33, %v8815_v33  ;;  %v3815_v40 = vsel %vm1370_vm4, %v8815_v33, 0.0 }
 0x480   : > { %v8823_v5 = vpop.f32.mrf.mxu1 }
 0x481   : > { %v3874_v47 = vmul.f32 %v8823_v5, %v8823_v5  ;;  %v3811_v26 = vsel %vm1370_vm4, %v8823_v5, 0.0  ;;  %v3917_v63 = vsel %vm1370_vm4, %v3876_v37, 0.0 }
 0x482   : > { %v8832_v61 = vpop.f32.mrf.mxu1  ;;  %v3812_v44 = vadd.f32 %v3811_v26, %v3810_v24 }
 0x483   : > { %v3913_v15 = vsel %vm1370_vm4, %v3874_v47, 0.0  ;;  %v3877_v60 = vmul.f32 %v8832_v61, %v8832_v61  ;;  %v3817_v30 = vsel %vm1370_vm4, %v8832_v61, 0.0 }
 0x484   : > { %v8844_v35 = vpop.f32.mrf.mxu1  ;;  %v3914_v55 = vadd.f32 %v3913_v15, %v3912_v16 }
 0x485   : > { %v3875_v9 = vmul.f32 %v8844_v35, %v8844_v35  ;;  %v3813_v50 = vsel %vm1370_vm4, %v8844_v35, 0.0  ;;  %v3919_v7 = vsel %vm1370_vm4, %v3877_v60, 0.0 }
 0x486   : > { %v3814_v52 = vadd.f32 %v3813_v50, %v3812_v44 }
 0x487   : > { %v3915_v45 = vsel %vm1370_vm4, %v3875_v9, 0.0 }
 0x488   : > { %v3916_v34 = vadd.f32 %v3915_v45, %v3914_v55  ;;  %v3816_v31 = vadd.f32 %v3815_v40, %v3814_v52 }
 0x48a   : > { %v3918_v54 = vadd.f32 %v3917_v63, %v3916_v34  ;;  %v3818_v42 = vadd.f32 %v3817_v30, %v3816_v31 }
 0x48c   : > { %v3920_v1 = vadd.f32 %v3919_v7, %v3918_v54 }
 0x48e   : > { %v8847_v46 = vpop.f32.mrf.mxu1 }
 0x48f   : > { %v3880_v53 = vmul.f32 %v8847_v46, %v8847_v46  ;;  %v3823_v39 = vsel %vm1370_vm4, %v8847_v46, 0.0 }
 0x490   : > { %v8853_v0 = vpop.f32.mrf.mxu1 }
 0x491   : > { %v3878_v4 = vmul.f32 %v8853_v0, %v8853_v0  ;;  %v3819_v10 = vsel %vm1370_vm4, %v8853_v0, 0.0  ;;  %v3925_v32 = vsel %vm1370_vm4, %v3880_v53, 0.0 }
 0x492   : > { %v8866_v17 = vpop.f32.mrf.mxu1  ;;  %v3820_v12 = vadd.f32 %v3819_v10, %v3818_v42 }
 0x493   : > { %v3921_v19 = vsel %vm1370_vm4, %v3878_v4, 0.0  ;;  %v3881_v18 = vmul.f32 %v8866_v17, %v8866_v17  ;;  %v3825_v23 = vsel %vm1370_vm4, %v8866_v17, 0.0 }
 0x494   : > { %v8873_v28 = vpop.f32.mrf.mxu1  ;;  %v3922_v59 = vadd.f32 %v3921_v19, %v3920_v1 }
 0x495   : > { %v3879_v13 = vmul.f32 %v8873_v28, %v8873_v28  ;;  %v3821_v56 = vsel %vm1370_vm4, %v8873_v28, 0.0  ;;  %v3927_v9 = vsel %vm1370_vm4, %v3881_v18, 0.0 }
 0x496   : > { %v3822_v36 = vadd.f32 %v3821_v56, %v3820_v12 }
 0x497   : > { %v3923_v27 = vsel %vm1370_vm4, %v3879_v13, 0.0 }
 0x498   : > { %v3924_v3 = vadd.f32 %v3923_v27, %v3922_v59  ;;  %v3824_v49 = vadd.f32 %v3823_v39, %v3822_v36 }
 0x49a   : > { %v3926_v14 = vadd.f32 %v3925_v32, %v3924_v3  ;;  %v3826_v25 = vadd.f32 %v3825_v23, %v3824_v49 }
 0x49c   : > { %v3928_v50 = vadd.f32 %v3927_v9, %v3926_v14 }
 0x49e   : > { %v8877_v6 = vpop.f32.mrf.mxu1 }
 0x49f   : > { %v3884_v52 = vmul.f32 %v8877_v6, %v8877_v6  ;;  %v3831_v34 = vsel %vm1370_vm4, %v8877_v6, 0.0 }
 0x4a0   : > { %v8886_v21 = vpop.f32.mrf.mxu1 }
 0x4a1   : > { %v3882_v29 = vmul.f32 %v8886_v21, %v8886_v21  ;;  %v3827_v47 = vsel %vm1370_vm4, %v8886_v21, 0.0  ;;  %v3933_v63 = vsel %vm1370_vm4, %v3884_v52, 0.0 }
 0x4a2   : > { %v8898_v58 = vpop.f32.mrf.mxu1  ;;  %v3828_v15 = vadd.f32 %v3827_v47, %v3826_v25 }
 0x4a3   : > { %v3929_v24 = vsel %vm1370_vm4, %v3882_v29, 0.0  ;;  %v3885_v60 = vmul.f32 %v8898_v58, %v8898_v58  ;;  %v3833_v30 = vsel %vm1370_vm4, %v8898_v58, 0.0 }
 0x4a4   : > { %v8903_v57 = vpop.f32.mrf.mxu1  ;;  %v3930_v16 = vadd.f32 %v3929_v24, %v3928_v50 }
 0x4a5   : > { %v3883_v48 = vmul.f32 %v8903_v57, %v8903_v57  ;;  %v3829_v38 = vsel %vm1370_vm4, %v8903_v57, 0.0  ;;  %v3935_v19 = vsel %vm1370_vm4, %v3885_v60, 0.0 }
 0x4a6   : > { %v3830_v45 = vadd.f32 %v3829_v38, %v3828_v15 }
 0x4a7   : > { %v3931_v44 = vsel %vm1370_vm4, %v3883_v48, 0.0 }
 0x4a8   : > { %v3932_v37 = vadd.f32 %v3931_v44, %v3930_v16  ;;  %v3832_v40 = vadd.f32 %v3831_v34, %v3830_v45 }
 0x4aa   : > { %v3934_v54 = vadd.f32 %v3933_v63, %v3932_v37  ;;  %v3834_v42 = vadd.f32 %v3833_v30, %v3832_v40 }
 0x4ac   : > { %v3936_v27 = vadd.f32 %v3935_v19, %v3934_v54 }
 0x4ae   : > { %v8907_v62 = vpop.f32.mrf.mxu1 }
 0x4af   : > { %v3888_v49 = vmul.f32 %v8907_v62, %v8907_v62  ;;  %v3839_v18 = vsel %vm1370_vm4, %v8907_v62, 0.0 }
 0x4b0   : > { %v8920_v26 = vpop.f32.mrf.mxu1 }
 0x4b1   : > { %v3886_v4 = vmul.f32 %v8920_v26, %v8920_v26  ;;  %v3835_v10 = vsel %vm1370_vm4, %v8920_v26, 0.0  ;;  %v3941_v23 = vsel %vm1370_vm4, %v3888_v49, 0.0 }
 0x4b2   : > { %v8927_v55 = vpop.f32.mrf.mxu1  ;;  %v3836_v1 = vadd.f32 %v3835_v10, %v3834_v42 }
 0x4b3   : > { %v3937_v56 = vsel %vm1370_vm4, %v3886_v4, 0.0  ;;  %v3889_v47 = vmul.f32 %v8927_v55, %v8927_v55  ;;  %v3841_v9 = vsel %vm1370_vm4, %v8927_v55, 0.0 }
 0x4b4   : > { %v8933_v31 = vpop.f32.mrf.mxu1  ;;  %v3938_v53 = vadd.f32 %v3937_v56, %v3936_v27 }
 0x4b5   : > { %v3887_v13 = vmul.f32 %v8933_v31, %v8933_v31  ;;  %v3837_v12 = vsel %vm1370_vm4, %v8933_v31, 0.0  ;;  %v3943_v50 = vsel %vm1370_vm4, %v3889_v47, 0.0 }
 0x4b6   : > { %v3838_v3 = vadd.f32 %v3837_v12, %v3836_v1 }
 0x4b7   : > { %v3939_v36 = vsel %vm1370_vm4, %v3887_v13, 0.0 }
 0x4b8   : > { %v3940_v32 = vadd.f32 %v3939_v36, %v3938_v53  ;;  %v3840_v29 = vadd.f32 %v3839_v18, %v3838_v3 }
 0x4ba   : > { %v3942_v25 = vadd.f32 %v3941_v23, %v3940_v32  ;;  %v3842_v15 = vadd.f32 %v3841_v9, %v3840_v29 }
 0x4bc   : > { %v3944_v52 = vadd.f32 %v3943_v50, %v3942_v25 }
 0x4c6   : > { %v8946_v7 = vpop.f32.mrf.mxu1 }
 0x4c7   : > { %v3892_v63 = vmul.f32 %v8946_v7, %v8946_v7  ;;  %v3847_v4 = vsel %vm1370_vm4, %v8946_v7, 0.0 }
 0x4c8   : > { %v8952_v59 = vpop.f32.mrf.mxu1 }
 0x4c9   : > { %v3890_v48 = vmul.f32 %v8952_v59, %v8952_v59  ;;  %v3843_v24 = vsel %vm1370_vm4, %v8952_v59, 0.0  ;;  %v3949_v10 = vsel %vm1370_vm4, %v3892_v63, 0.0 }
 0x4ca   : > { %v8955_v39 = vpop.f32.mrf.mxu1  ;;  %v3844_v45 = vadd.f32 %v3843_v24, %v3842_v15 }
 0x4cb   : > { %v3945_v44 = vsel %vm1370_vm4, %v3890_v48, 0.0  ;;  %v3893_v13 = vmul.f32 %v8955_v39, %v8955_v39  ;;  %v3849_v56 = vsel %vm1370_vm4, %v8955_v39, 0.0 }
 0x4cc   : > { %v8961_v14 = vpop.f32.mrf.mxu1  ;;  %v3946_v34 = vadd.f32 %v3945_v44, %v3944_v52 }
 0x4cd   : > { %v3891_v38 = vmul.f32 %v8961_v14, %v8961_v14  ;;  %v3845_v16 = vsel %vm1370_vm4, %v8961_v14, 0.0  ;;  %v3951_v53 = vsel %vm1370_vm4, %v3893_v13, 0.0 }
 0x4ce   : > { %v3846_v40 = vadd.f32 %v3845_v16, %v3844_v45 }
 0x4cf   : > { %v3947_v37 = vsel %vm1370_vm4, %v3891_v38, 0.0 }
 0x4d0   : > { %v3948_v60 = vadd.f32 %v3947_v37, %v3946_v34  ;;  %v3848_v54 = vadd.f32 %v3847_v4, %v3846_v40 }
 0x4d2   : > { %v3950_v42 = vadd.f32 %v3949_v10, %v3948_v60  ;;  %v3850_v27 = vadd.f32 %v3849_v56, %v3848_v54 }
 0x4d4   : > { %v3952_v32 = vadd.f32 %v3951_v53, %v3950_v42 }
 0x4da   : > { %v8983_v30 = vpop.f32.mrf.mxu1 }
 0x4db   : > { %v3896_v29 = vmul.f32 %v8983_v30, %v8983_v30  ;;  %v3855_v9 = vsel %vm1370_vm4, %v8983_v30, 0.0 }
 0x4dc   : > { %v8988_v19 = vpop.f32.mrf.mxu1 }
 0x4dd   : > { %v3851_v12 = vsel %vm1370_vm4, %v8988_v19, 0.0  ;;  %v3894_v1 = vmul.f32 %v8988_v19, %v8988_v19  ;;  %v3957_v44 = vsel %vm1370_vm4, %v3896_v29, 0.0 }
 0x4de   : > { %v8996_v36 = vpop.f32.mrf.mxu1  ;;  %v3852_v49 = vadd.f32 %v3851_v12, %v3850_v27 }
 0x4df   : > { %v3953_v3 = vsel %vm1370_vm4, %v3894_v1, 0.0  ;;  %v3897_v24 = vmul.f32 %v8996_v36, %v8996_v36  ;;  %v3857_v16 = vsel %vm1370_vm4, %v8996_v36, 0.0 }
 0x4e0   : > { %v9000_v18 = vpop.f32.mrf.mxu1  ;;  %v3954_v48 = vadd.f32 %v3953_v3, %v3952_v32 }
 0x4e1   : > { %v3853_v23 = vsel %vm1370_vm4, %v9000_v18, 0.0  ;;  %v3895_v47 = vmul.f32 %v9000_v18, %v9000_v18  ;;  %v3959_v37 = vsel %vm1370_vm4, %v3897_v24, 0.0 }
 0x4e2   : > { %v3854_v25 = vadd.f32 %v3853_v23, %v3852_v49 }
 0x4e3   : > { %v3955_v38 = vsel %vm1370_vm4, %v3895_v47, 0.0 }
 0x4e4   : > { %v3856_v15 = vadd.f32 %v3855_v9, %v3854_v25  ;;  %v3956_v50 = vadd.f32 %v3955_v38, %v3954_v48 }
 0x4e6   : > { %v3858_v45 = vadd.f32 %v3857_v16, %v3856_v15  ;;  %v3958_v52 = vadd.f32 %v3957_v44, %v3956_v50 }
 0x4e8   : > { %v3859_v34 = vrot.slane %v3858_v45, 4  ;;  %v3960_v40 = vadd.f32 %v3959_v37, %v3958_v52 }
 0x4ea   : > { %v3860_v63 = vadd.f32 %v3859_v34, %v3858_v45  ;;  %v3961_v60 = vrot.slane %v3960_v40, 4 }
 0x4ec   : > { %v3861_v4 = vrot.slane %v3860_v63, 2  ;;  %v3962_v54 = vadd.f32 %v3961_v60, %v3960_v40 }
 0x4ee   : > { %v3862_v10 = vadd.f32 %v3861_v4, %v3860_v63  ;;  %v3963_v13 = vrot.slane %v3962_v54, 2 }
 0x4f0   : > { %v3863_v42 = vrot.slane %v3862_v10, 1  ;;  %v3964_v56 = vadd.f32 %v3963_v13, %v3962_v54 }
 0x4f2   : > { %v3864_v12 = vadd.f32 %v3863_v42, %v3862_v10  ;;  %v3965_v1 = vrot.slane %v3964_v56, 1 }
 0x4f4   : > { %v9017_v27 = vmul.f32 0.00390625, %v3864_v12  ;;  %v3966_v53 = vadd.f32 %v3965_v1, %v3964_v56 }
 0x4f6   : > { %v3967_v3 = vmul.f32 0.00390625, %v3966_v53  ;;  %v3968_v49 = vmul.f32 %v9017_v27, %v9017_v27  ;;  %v3971_v47 = vsub.f32 %v8795_v51, %v9017_v27  ;;  %v3972_v48 = vsub.f32 %v8799_v11, %v9017_v27 }
 0x4f7   : > { %v3973_v25 = vsub.f32 %v8793_v8, %v9017_v27  ;;  %v3974_v9 = vsub.f32 %v8797_v22, %v9017_v27  ;;  %v3975_v24 = vsub.f32 %v8803_v2, %v9017_v27  ;;  %v3976_v38 = vsub.f32 %v8809_v41, %v9017_v27 }
 0x4f8   : > { %v3969_v32 = vsub.f32 %v3967_v3, %v3968_v49  ;;  %v3977_v15 = vsub.f32 %v8801_v43, %v9017_v27  ;;  %v3978_v51 = vsub.f32 %v8805_v20, %v9017_v27  ;;  %v3979_v11 = vsub.f32 %v8823_v5, %v9017_v27 }
 0x4f9   : > { %v3980_v8 = vsub.f32 %v8844_v35, %v9017_v27  ;;  %v3981_v22 = vsub.f32 %v8815_v33, %v9017_v27  ;;  %v3982_v2 = vsub.f32 %v8832_v61, %v9017_v27  ;;  %v3983_v41 = vsub.f32 %v8853_v0, %v9017_v27 }
 0x4fa   : > { %v3970_v29 = vmax.f32 %v3969_v32, 0.0  ;;  %v3984_v43 = vsub.f32 %v8873_v28, %v9017_v27  ;;  %v3985_v20 = vsub.f32 %v8847_v46, %v9017_v27  ;;  %v3986_v5 = vsub.f32 %v8866_v17, %v9017_v27 }
 0x4fb   : > { %v3987_v35 = vsub.f32 %v8886_v21, %v9017_v27  ;;  %v3988_v33 = vsub.f32 %v8903_v57, %v9017_v27  ;;  %v3989_v61 = vsub.f32 %v8877_v6, %v9017_v27  ;;  %v3990_v0 = vsub.f32 %v8898_v58, %v9017_v27 }
 0x4fc   : > { %v4003_v23 = vadd.f32 1e-05, %v3970_v29  ;;  %v3991_v28 = vsub.f32 %v8920_v26, %v9017_v27  ;;  %v3992_v46 = vsub.f32 %v8933_v31, %v9017_v27  ;;  %v3993_v17 = vsub.f32 %v8907_v62, %v9017_v27 }
 0x4fd   : > { %v3994_v21 = vsub.f32 %v8927_v55, %v9017_v27  ;;  %v3995_v57 = vsub.f32 %v8952_v59, %v9017_v27  ;;  %v3996_v6 = vsub.f32 %v8961_v14, %v9017_v27  ;;  %v3997_v58 = vsub.f32 %v8946_v7, %v9017_v27 }
 0x4fe   : > { %5577 = vrsqrt.f32 %v4003_v23  ;;  %v3998_v26 = vsub.f32 %v8955_v39, %v9017_v27  ;;  %v3999_v31 = vsub.f32 %v8988_v19, %v9017_v27  ;;  %v4000_v62 = vsub.f32 %v9000_v18, %v9017_v27 }
 0x4ff   : > { %v4001_v55 = vsub.f32 %v8983_v30, %v9017_v27  ;;  %v4002_v59 = vsub.f32 %v8996_v36, %v9017_v27 }
 0x50b   : > { %v5578_v50 = vpop.eup %5577 }
 0x50c   : > { %v4005_v14 = vmul.f32 %v5578_v50, %v3971_v47  ;;  %v4006_v44 = vmul.f32 %v5578_v50, %v3972_v48  ;;  %v4007_v16 = vmul.f32 %v5578_v50, %v3973_v25  ;;  %v4008_v7 = vmul.f32 %v5578_v50, %v3974_v9  ;;  %v5579_v48 = vld [vmem:[%s5663_s17] sm:$0xff]  ;;  %v5580_v9 = vld [vmem:[%s5663_s17 + $0x8] sm:$0xff] }
 0x50d   : > { %v4009_v45 = vmul.f32 %v5578_v50, %v3975_v24  ;;  %v4010_v52 = vmul.f32 %v5578_v50, %v3976_v38  ;;  %v4011_v39 = vmul.f32 %v5578_v50, %v3977_v15  ;;  %v4012_v37 = vmul.f32 %v5578_v50, %v3978_v51  ;;  %v5581_v38 = vld [vmem:[%s5663_s17 + $0x10] sm:$0xff]  ;;  %v5582_v51 = vld [vmem:[%s5663_s17 + $0x18] sm:$0xff] }
 0x50e   : > { %v4013_v34 = vmul.f32 %v5578_v50, %v3979_v11  ;;  %v4014_v40 = vmul.f32 %v5578_v50, %v3980_v8  ;;  %v4015_v19 = vmul.f32 %v5578_v50, %v3981_v22  ;;  %v4016_v63 = vmul.f32 %v5578_v50, %v3982_v2  ;;  %v5583_v8 = vld [vmem:[%s5663_s17 + $0x20] sm:$0xff]  ;;  %v5584_v2 = vld [vmem:[%s5663_s17 + $0x28] sm:$0xff] }
 0x50f   : > { %v4017_v60 = vmul.f32 %v5578_v50, %v3983_v41  ;;  %v4018_v18 = vmul.f32 %v5578_v50, %v3984_v43  ;;  %v4019_v4 = vmul.f32 %v5578_v50, %v3985_v20  ;;  %v4020_v30 = vmul.f32 %v5578_v50, %v3986_v5  ;;  %v5585_v43 = vld [vmem:[%s5663_s17 + $0x30] sm:$0xff]  ;;  %v5586_v5 = vld [vmem:[%s5663_s17 + $0x38] sm:$0xff] }
 0x510   : > { %v4021_v54 = vmul.f32 %v5578_v50, %v3987_v35  ;;  %v4022_v10 = vmul.f32 %v5578_v50, %v3988_v33  ;;  %v4023_v36 = vmul.f32 %v5578_v50, %v3989_v61  ;;  %v4024_v13 = vmul.f32 %v5578_v50, %v3990_v0  ;;  %v5587_v33 = vld [vmem:[%s5663_s17 + $0x40] sm:$0xff]  ;;  %v5588_v0 = vld [vmem:[%s5663_s17 + $0x48] sm:$0xff] }
 0x511   : > { %v9085_v42 = vmul.f32 %v5578_v50, %v3991_v28  ;;  %v9087_v56 = vmul.f32 %v5578_v50, %v3992_v46  ;;  %v9089_v12 = vmul.f32 %v5578_v50, %v3993_v17  ;;  %v9091_v1 = vmul.f32 %v5578_v50, %v3994_v21  ;;  %v5589_v46 = vld [vmem:[%s5663_s17 + $0x50] sm:$0xff]  ;;  %v5590_v21 = vld [vmem:[%s5663_s17 + $0x58] sm:$0xff] }
 0x512   : > { %v9093_v27 = vmul.f32 %v5578_v50, %v3995_v57  ;;  %v9095_v53 = vmul.f32 %v5578_v50, %v3996_v6  ;;  %v9097_v3 = vmul.f32 %v5578_v50, %v3997_v58  ;;  %v9099_v49 = vmul.f32 %v5578_v50, %v3998_v26  ;;  %v5591_v6 = vld [vmem:[%s5663_s17 + $0x60] sm:$0xff]  ;;  %v5592_v26 = vld [vmem:[%s5663_s17 + $0x68] sm:$0xff] }
 0x513   : > { %v9108_v32 = vmul.f32 %v5578_v50, %v3999_v31  ;;  %v9110_v29 = vmul.f32 %v5578_v50, %v4000_v62  ;;  %v9112_v23 = vmul.f32 %v5578_v50, %v4001_v55  ;;  %v9114_v47 = vmul.f32 %v5578_v50, %v4002_v59  ;;  %v5593_v31 = vld [vmem:[%s5663_s17 + $0x70] sm:$0xff]  ;;  %v5594_v55 = vld [vmem:[%s5663_s17 + $0x78] sm:$0xff] }
 0x514   : > { %v4037_v25 = vadd.f32 %v5579_v48, %v4005_v14  ;;  %v4038_v24 = vadd.f32 %v5580_v9, %v4006_v44  ;;  %v4039_v15 = vadd.f32 %v5581_v38, %v4007_v16  ;;  %v4040_v11 = vadd.f32 %v5582_v51, %v4008_v7  ;;  %v5595_v14 = vld [vmem:[%s5663_s17 + $0x80] sm:$0xff]  ;;  %v5596_v16 = vld [vmem:[%s5663_s17 + $0x88] sm:$0xff]  ;;  %v5609_v48 = vld [vmem:[%s5663_s17 + $0xf0] sm:$0xff] }
 0x515   : > { %v4041_v22 = vadd.f32 %v5583_v8, %v4009_v45  ;;  %v4042_v41 = vadd.f32 %v5584_v2, %v4010_v52  ;;  %v4043_v20 = vadd.f32 %v5585_v43, %v4011_v39  ;;  %v4044_v35 = vadd.f32 %v5586_v5, %v4012_v37  ;;  %v5597_v45 = vld [vmem:[%s5663_s17 + $0x90] sm:$0xff]  ;;  %v5598_v39 = vld [vmem:[%s5663_s17 + $0x98] sm:$0xff] }
 0x516   : > { %v4045_v61 = vadd.f32 %v5587_v33, %v4013_v34  ;;  %v4046_v28 = vadd.f32 %v5588_v0, %v4014_v40  ;;  %v4047_v17 = vadd.f32 %v5589_v46, %v4015_v19  ;;  %v4048_v57 = vadd.f32 %v5590_v21, %v4016_v63  ;;  %4069 = vst.msk [vmem:[%s9106_s16] sm:$0xff] %vm1370_vm4, %v4037_v25  ;;  %v5599_v34 = vld [vmem:[%s5663_s17 + $0xa0] sm:$0xff]  ;;  %v5600_v19 = vld [vmem:[%s5663_s17 + $0xa8] sm:$0xff]  ;;  %v5610_v9 = vld [vmem:[%s5663_s17 + $0xf8] sm:$0xff] }
 0x517   : > { %4070 = vst.msk [vmem:[%s9106_s16 + $0x8] sm:$0xff] %vm1370_vm4, %v4038_v24  ;;  %4071 = vst.msk [vmem:[%s9106_s16 + $0x10] sm:$0xff] %vm1370_vm4, %v4039_v15  ;;  %v4049_v58 = vadd.f32 %v5591_v6, %v4017_v60  ;;  %v4050_v50 = vadd.f32 %v5592_v26, %v4018_v18  ;;  %v4051_v62 = vadd.f32 %v5593_v31, %v4019_v4  ;;  %v5601_v60 = vld [vmem:[%s5663_s17 + $0xb0] sm:$0xff]  ;;  %v5602_v4 = vld [vmem:[%s5663_s17 + $0xb8] sm:$0xff] }
 0x518   : > { %4072 = vst.msk [vmem:[%s9106_s16 + $0x18] sm:$0xff] %vm1370_vm4, %v4040_v11  ;;  %v4052_v59 = vadd.f32 %v5594_v55, %v4020_v30  ;;  %4073 = vst.msk [vmem:[%s9106_s16 + $0x20] sm:$0xff] %vm1370_vm4, %v4041_v22  ;;  %v4053_v44 = vadd.f32 %v5595_v14, %v4021_v54  ;;  %v4054_v7 = vadd.f32 %v5596_v16, %v4022_v10  ;;  %v5603_v54 = vld [vmem:[%s5663_s17 + $0xc0] sm:$0xff] }
 0x519   : > { %4074 = vst.msk [vmem:[%s9106_s16 + $0x28] sm:$0xff] %vm1370_vm4, %v4042_v41  ;;  %4075 = vst.msk [vmem:[%s9106_s16 + $0x30] sm:$0xff] %vm1370_vm4, %v4043_v20  ;;  %v4055_v52 = vadd.f32 %v5597_v45, %v4023_v36  ;;  %v4056_v37 = vadd.f32 %v5598_v39, %v4024_v13  ;;  %v4057_v40 = vadd.f32 %v5599_v34, %v9085_v42  ;;  %v5604_v36 = vld [vmem:[%s5663_s17 + $0xc8] sm:$0xff]  ;;  %v5605_v42 = vld [vmem:[%s5663_s17 + $0xd0] sm:$0xff] }
 0x51a   : > { %4076 = vst.msk [vmem:[%s9106_s16 + $0x38] sm:$0xff] %vm1370_vm4, %v4044_v35  ;;  %4077 = vst.msk [vmem:[%s9106_s16 + $0x40] sm:$0xff] %vm1370_vm4, %v4045_v61  ;;  %v4058_v63 = vadd.f32 %v5600_v19, %v9087_v56  ;;  %v4059_v18 = vadd.f32 %v5601_v60, %v9089_v12  ;;  %v4060_v30 = vadd.f32 %v5602_v4, %v9091_v1  ;;  %v5606_v12 = vld [vmem:[%s5663_s17 + $0xd8] sm:$0xff] }
 0x51b   : > { %4078 = vst.msk [vmem:[%s9106_s16 + $0x48] sm:$0xff] %vm1370_vm4, %v4046_v28  ;;  %4079 = vst.msk [vmem:[%s9106_s16 + $0x50] sm:$0xff] %vm1370_vm4, %v4047_v17  ;;  %v4061_v10 = vadd.f32 %v5603_v54, %v9093_v27  ;;  %v4062_v13 = vadd.f32 %v5604_v36, %v9095_v53  ;;  %v4063_v56 = vadd.f32 %v5605_v42, %v9097_v3  ;;  %v5607_v27 = vld [vmem:[%s5663_s17 + $0xe0] sm:$0xff]  ;;  %v5608_v3 = vld [vmem:[%s5663_s17 + $0xe8] sm:$0xff] }
 0x51c   : > { %4080 = vst.msk [vmem:[%s9106_s16 + $0x58] sm:$0xff] %vm1370_vm4, %v4048_v57  ;;  %4081 = vst.msk [vmem:[%s9106_s16 + $0x60] sm:$0xff] %vm1370_vm4, %v4049_v58  ;;  %v4064_v1 = vadd.f32 %v5606_v12, %v9099_v49  ;;  %v4065_v53 = vadd.f32 %v5607_v27, %v9108_v32  ;;  %v4066_v49 = vadd.f32 %v5608_v3, %v9110_v29 }
 0x51d   : > { %4082 = vst.msk [vmem:[%s9106_s16 + $0x68] sm:$0xff] %vm1370_vm4, %v4050_v50  ;;  %4083 = vst.msk [vmem:[%s9106_s16 + $0x70] sm:$0xff] %vm1370_vm4, %v4051_v62  ;;  %v4067_v25 = vadd.f32 %v5609_v48, %v9112_v23  ;;  %v4068_v24 = vadd.f32 %v5610_v9, %v9114_v47 }
 0x51e   : > { %4084 = vst.msk [vmem:[%s9106_s16 + $0x78] sm:$0xff] %vm1370_vm4, %v4052_v59  ;;  %4085 = vst.msk [vmem:[%s9106_s16 + $0x80] sm:$0xff] %vm1370_vm4, %v4053_v44 }
 0x51f   : > { %4086 = vst.msk [vmem:[%s9106_s16 + $0x88] sm:$0xff] %vm1370_vm4, %v4054_v7  ;;  %4087 = vst.msk [vmem:[%s9106_s16 + $0x90] sm:$0xff] %vm1370_vm4, %v4055_v52 }
 0x520   : > { %4088 = vst.msk [vmem:[%s9106_s16 + $0x98] sm:$0xff] %vm1370_vm4, %v4056_v37  ;;  %4089 = vst.msk [vmem:[%s9106_s16 + $0xa0] sm:$0xff] %vm1370_vm4, %v4057_v40 }
 0x521   : > { %4090 = vst.msk [vmem:[%s9106_s16 + $0xa8] sm:$0xff] %vm1370_vm4, %v4058_v63  ;;  %4091 = vst.msk [vmem:[%s9106_s16 + $0xb0] sm:$0xff] %vm1370_vm4, %v4059_v18 }
 0x522   : > { %4092 = vst.msk [vmem:[%s9106_s16 + $0xb8] sm:$0xff] %vm1370_vm4, %v4060_v30  ;;  %4093 = vst.msk [vmem:[%s9106_s16 + $0xc0] sm:$0xff] %vm1370_vm4, %v4061_v10 }
 0x523   : > { %4094 = vst.msk [vmem:[%s9106_s16 + $0xc8] sm:$0xff] %vm1370_vm4, %v4062_v13  ;;  %4095 = vst.msk [vmem:[%s9106_s16 + $0xd0] sm:$0xff] %vm1370_vm4, %v4063_v56 }
 0x524   : > { %4096 = vst.msk [vmem:[%s9106_s16 + $0xd8] sm:$0xff] %vm1370_vm4, %v4064_v1  ;;  %4097 = vst.msk [vmem:[%s9106_s16 + $0xe0] sm:$0xff] %vm1370_vm4, %v4065_v53 }
 0x525   : > { %4098 = vst.msk [vmem:[%s9106_s16 + $0xe8] sm:$0xff] %vm1370_vm4, %v4066_v49  ;;  %4099 = vst.msk [vmem:[%s9106_s16 + $0xf0] sm:$0xff] %vm1370_vm4, %v4067_v25 }
 0x526   : > { %4100 = vst.msk [vmem:[%s9106_s16 + $0xf8] sm:$0xff] %vm1370_vm4, %v4068_v24 }
 0x527 PF: > { %s13_s12 = sadd.s32 1, %s5617_s12  }
 0x528   : > { %p10_p4 = scmp.ge.s32.totalorder %s13_s12, 4  }
 0x52a   :  { %12 = sbr.rel (!%p10_p4) target bundleno = 1 (0x1), region = 62 }

</bundles_post_ra>
